<compile_context>
chip_gen: v7x
topology: tpu7x:2x2x1
jax: 0.10.0
libtpu: 0.0.40
codegen_flags: <defaults>
</compile_context>

<pallas_src>
import jax
import jax.numpy as jnp
from jax.experimental import pallas as pl
from jax.experimental.pallas import tpu as pltpu
import numpy as np

# Small, TPU-tile-friendly stand-ins for the real dims
# (real flair news-forward/backward = 2048 each, glove = 100).
VOCAB = 512
D_FWD = 256
D_BWD = 256
D_GLOVE = 128
D_TOTAL = D_FWD + D_BWD + D_GLOVE   # stacked "embedding_length" (640 = 5*128 lanes)
SEQ = 128                           # number of tokens in the sentence
TB = 32                             # tokens gathered per grid step


def flair_embed_kernel(ids_ref, table_hbm, out_ref, sem):
    """Gather TB rows of the pre-concatenated table from HBM into the output block.

    ids_ref:   SMEM  (SEQ,) int32           scalar-prefetched token ids
    table_hbm: HBM   (VOCAB, D_TOTAL) f32   stacked [fwd | bwd | glove] table (pl.ANY)
    out_ref:   VMEM  (TB, D_TOTAL) f32      stacked embeddings for this token block
    sem:       DMA semaphores, one per in-flight row copy
    """
    blk = pl.program_id(0)
    base = blk * TB
    copies = []
    # TB is static -> fully unrolled; all TB row-DMAs are in flight concurrently.
    for r in range(TB):
        tid = ids_ref[base + r]                          # scalar read from SMEM
        cp = pltpu.make_async_copy(
            table_hbm.at[pl.ds(tid, 1), :],              # one contiguous row in HBM
            out_ref.at[pl.ds(r, 1), :],                  # straight into the output tile
            sem.at[r],
        )
        cp.start()
        copies.append(cp)
    for cp in copies:
        cp.wait()


def build_stacked_table(fwd_table, bwd_table, glove_table):
    """One-time (init) concatenation of the three embedders' tables."""
    return jnp.concatenate([fwd_table, bwd_table, glove_table], axis=-1)


@jax.jit
def flair_embed(token_ids, stacked_table):
    """token_ids: (SEQ,) int32 -> (SEQ, D_TOTAL) float32 stacked embeddings."""
    seq = token_ids.shape[0]
    vocab, d_total = stacked_table.shape
    assert seq % TB == 0

    # Guard against out-of-range ids (HBM DMA gathers have no runtime OOB check).
    ids = jnp.clip(token_ids.astype(jnp.int32), 0, vocab - 1)

    grid_spec = pltpu.PrefetchScalarGridSpec(
        num_scalar_prefetch=1,                           # token ids land in SMEM
        grid=(seq // TB,),
        in_specs=[
            pl.BlockSpec(memory_space=pl.ANY),           # table stays in HBM; manual row DMA
        ],
        out_specs=pl.BlockSpec((TB, d_total), lambda i, ids: (i, 0)),
        scratch_shapes=[pltpu.SemaphoreType.DMA((TB,))],
    )
    return pl.pallas_call(
        flair_embed_kernel,
        out_shape=jax.ShapeDtypeStruct((seq, d_total), jnp.float32),
        grid_spec=grid_spec,
        compiler_params=pltpu.CompilerParams(
            dimension_semantics=("parallel",)),          # token blocks are independent
    )(ids, stacked_table)


if __name__ == "__main__":
    key = jax.random.PRNGKey(0)
    k_ids, k_f, k_b, k_g = jax.random.split(key, 4)

    # Deterministic synthetic "sentence" (token ids) and embedding tables.
    token_ids = jax.random.randint(k_ids, (SEQ,), 0, VOCAB, dtype=jnp.int32)
    fwd_table = jax.random.normal(k_f, (VOCAB, D_FWD), dtype=jnp.float32)
    bwd_table = jax.random.normal(k_b, (VOCAB, D_BWD), dtype=jnp.float32)
    glove_table = jax.random.normal(k_g, (VOCAB, D_GLOVE), dtype=jnp.float32)

    # Init-time stacking (analogue of StackedEmbeddings construction).
    stacked_table = jax.block_until_ready(
        build_stacked_table(fwd_table, bwd_table, glove_table))

    out = flair_embed(token_ids, stacked_table)
    out = jax.block_until_ready(out)

    # Pure-JAX reference: gather + concat per token, view as [-1, embedding_length].
    ref = jnp.concatenate(
        [fwd_table[token_ids], bwd_table[token_ids], glove_table[token_ids]],
        axis=-1,
    ).reshape(-1, D_TOTAL)

    np.testing.assert_allclose(np.asarray(out), np.asarray(ref), rtol=1e-6, atol=1e-6)
    assert out.shape == (SEQ, D_TOTAL)
    print("KERNEL_OK")
</pallas_src>

<mosaic_0001>
module attributes {stable_mosaic.version = 11 : i64} {
  func.func @flair_embed_kernel(%arg0: i32, %arg1: memref<128xi32, #tpu.memory_space<smem>>, %arg2: memref<512x640xf32, #tpu.memory_space<any>>, %arg3: memref<32x640xf32, #tpu.memory_space<vmem>>, %arg4: memref<32x!tpu.dma_semaphore, #tpu.memory_space<semaphore_mem>>) attributes {dimension_semantics = [#tpu.dimension_semantics<parallel>], iteration_bounds = array<i64: 4>, scalar_prefetch = 1 : i64, scratch_operands = 1 : i64, tpu.core_type = #tpu.core_type<tc>, window_params = [{}, {transform_indices = @transform_1, window_bounds = array<i64: 32, 640>}]} {
    %c32_i32 = arith.constant 32 : i32
    %0 = arith.muli %arg0, %c32_i32 : i32
    %c0_i32 = arith.constant 0 : i32
    %1 = arith.addi %0, %c0_i32 : i32
    %2 = arith.index_cast %1 : i32 to index
    %3 = memref.load %arg1[%2] : memref<128xi32, #tpu.memory_space<smem>>
    %c0_i32_0 = arith.constant 0 : i32
    %c0_i32_1 = arith.constant 0 : i32
    %4 = tpu.memref_slice %arg2[%3, %c0_i32_1] : memref<512x640xf32, #tpu.memory_space<any>> -> memref<1x640xf32, #tpu.memory_space<any>>
    %c0_i32_2 = arith.constant 0 : i32
    %c0_i32_3 = arith.constant 0 : i32
    %5 = tpu.memref_slice %arg3[%c0_i32_2, %c0_i32_3] : memref<32x640xf32, #tpu.memory_space<vmem>> -> memref<1x640xf32, #tpu.memory_space<vmem>>
    %6 = tpu.memref_slice %arg4[%c0_i32_0] : memref<32x!tpu.dma_semaphore, #tpu.memory_space<semaphore_mem>> -> memref<1x!tpu.dma_semaphore, #tpu.memory_space<semaphore_mem>>
    %7 = tpu.memref_squeeze %6 : memref<1x!tpu.dma_semaphore, #tpu.memory_space<semaphore_mem>> -> memref<!tpu.dma_semaphore, #tpu.memory_space<semaphore_mem>>
    tpu.enqueue_dma source(%4 : memref<1x640xf32, #tpu.memory_space<any>>) target(%5 : memref<1x640xf32, #tpu.memory_space<vmem>>) target_semaphore(%7 : memref<!tpu.dma_semaphore, #tpu.memory_space<semaphore_mem>>)
    %c1_i32 = arith.constant 1 : i32
    %8 = arith.addi %0, %c1_i32 : i32
    %9 = arith.index_cast %8 : i32 to index
    %10 = memref.load %arg1[%9] : memref<128xi32, #tpu.memory_space<smem>>
    %c1_i32_4 = arith.constant 1 : i32
    %c0_i32_5 = arith.constant 0 : i32
    %11 = tpu.memref_slice %arg2[%10, %c0_i32_5] : memref<512x640xf32, #tpu.memory_space<any>> -> memref<1x640xf32, #tpu.memory_space<any>>
    %c1_i32_6 = arith.constant 1 : i32
    %c0_i32_7 = arith.constant 0 : i32
    %12 = tpu.memref_slice %arg3[%c1_i32_6, %c0_i32_7] : memref<32x640xf32, #tpu.memory_space<vmem>> -> memref<1x640xf32, #tpu.memory_space<vmem>>
    %13 = tpu.memref_slice %arg4[%c1_i32_4] : memref<32x!tpu.dma_semaphore, #tpu.memory_space<semaphore_mem>> -> memref<1x!tpu.dma_semaphore, #tpu.memory_space<semaphore_mem>>
    %14 = tpu.memref_squeeze %13 : memref<1x!tpu.dma_semaphore, #tpu.memory_space<semaphore_mem>> -> memref<!tpu.dma_semaphore, #tpu.memory_space<semaphore_mem>>
    tpu.enqueue_dma source(%11 : memref<1x640xf32, #tpu.memory_space<any>>) target(%12 : memref<1x640xf32, #tpu.memory_space<vmem>>) target_semaphore(%14 : memref<!tpu.dma_semaphore, #tpu.memory_space<semaphore_mem>>)
    %c2_i32 = arith.constant 2 : i32
    %15 = arith.addi %0, %c2_i32 : i32
    %16 = arith.index_cast %15 : i32 to index
    %17 = memref.load %arg1[%16] : memref<128xi32, #tpu.memory_space<smem>>
    %c2_i32_8 = arith.constant 2 : i32
    %c0_i32_9 = arith.constant 0 : i32
    %18 = tpu.memref_slice %arg2[%17, %c0_i32_9] : memref<512x640xf32, #tpu.memory_space<any>> -> memref<1x640xf32, #tpu.memory_space<any>>
    %c2_i32_10 = arith.constant 2 : i32
    %c0_i32_11 = arith.constant 0 : i32
    %19 = tpu.memref_slice %arg3[%c2_i32_10, %c0_i32_11] : memref<32x640xf32, #tpu.memory_space<vmem>> -> memref<1x640xf32, #tpu.memory_space<vmem>>
    %20 = tpu.memref_slice %arg4[%c2_i32_8] : memref<32x!tpu.dma_semaphore, #tpu.memory_space<semaphore_mem>> -> memref<1x!tpu.dma_semaphore, #tpu.memory_space<semaphore_mem>>
    %21 = tpu.memref_squeeze %20 : memref<1x!tpu.dma_semaphore, #tpu.memory_space<semaphore_mem>> -> memref<!tpu.dma_semaphore, #tpu.memory_space<semaphore_mem>>
    tpu.enqueue_dma source(%18 : memref<1x640xf32, #tpu.memory_space<any>>) target(%19 : memref<1x640xf32, #tpu.memory_space<vmem>>) target_semaphore(%21 : memref<!tpu.dma_semaphore, #tpu.memory_space<semaphore_mem>>)
    %c3_i32 = arith.constant 3 : i32
    %22 = arith.addi %0, %c3_i32 : i32
    %23 = arith.index_cast %22 : i32 to index
    %24 = memref.load %arg1[%23] : memref<128xi32, #tpu.memory_space<smem>>
    %c3_i32_12 = arith.constant 3 : i32
    %c0_i32_13 = arith.constant 0 : i32
    %25 = tpu.memref_slice %arg2[%24, %c0_i32_13] : memref<512x640xf32, #tpu.memory_space<any>> -> memref<1x640xf32, #tpu.memory_space<any>>
    %c3_i32_14 = arith.constant 3 : i32
    %c0_i32_15 = arith.constant 0 : i32
    %26 = tpu.memref_slice %arg3[%c3_i32_14, %c0_i32_15] : memref<32x640xf32, #tpu.memory_space<vmem>> -> memref<1x640xf32, #tpu.memory_space<vmem>>
    %27 = tpu.memref_slice %arg4[%c3_i32_12] : memref<32x!tpu.dma_semaphore, #tpu.memory_space<semaphore_mem>> -> memref<1x!tpu.dma_semaphore, #tpu.memory_space<semaphore_mem>>
    %28 = tpu.memref_squeeze %27 : memref<1x!tpu.dma_semaphore, #tpu.memory_space<semaphore_mem>> -> memref<!tpu.dma_semaphore, #tpu.memory_space<semaphore_mem>>
    tpu.enqueue_dma source(%25 : memref<1x640xf32, #tpu.memory_space<any>>) target(%26 : memref<1x640xf32, #tpu.memory_space<vmem>>) target_semaphore(%28 : memref<!tpu.dma_semaphore, #tpu.memory_space<semaphore_mem>>)
    %c4_i32 = arith.constant 4 : i32
    %29 = arith.addi %0, %c4_i32 : i32
    %30 = arith.index_cast %29 : i32 to index
    %31 = memref.load %arg1[%30] : memref<128xi32, #tpu.memory_space<smem>>
    %c4_i32_16 = arith.constant 4 : i32
    %c0_i32_17 = arith.constant 0 : i32
    %32 = tpu.memref_slice %arg2[%31, %c0_i32_17] : memref<512x640xf32, #tpu.memory_space<any>> -> memref<1x640xf32, #tpu.memory_space<any>>
    %c4_i32_18 = arith.constant 4 : i32
    %c0_i32_19 = arith.constant 0 : i32
    %33 = tpu.memref_slice %arg3[%c4_i32_18, %c0_i32_19] : memref<32x640xf32, #tpu.memory_space<vmem>> -> memref<1x640xf32, #tpu.memory_space<vmem>>
    %34 = tpu.memref_slice %arg4[%c4_i32_16] : memref<32x!tpu.dma_semaphore, #tpu.memory_space<semaphore_mem>> -> memref<1x!tpu.dma_semaphore, #tpu.memory_space<semaphore_mem>>
    %35 = tpu.memref_squeeze %34 : memref<1x!tpu.dma_semaphore, #tpu.memory_space<semaphore_mem>> -> memref<!tpu.dma_semaphore, #tpu.memory_space<semaphore_mem>>
    tpu.enqueue_dma source(%32 : memref<1x640xf32, #tpu.memory_space<any>>) target(%33 : memref<1x640xf32, #tpu.memory_space<vmem>>) target_semaphore(%35 : memref<!tpu.dma_semaphore, #tpu.memory_space<semaphore_mem>>)
    %c5_i32 = arith.constant 5 : i32
    %36 = arith.addi %0, %c5_i32 : i32
    %37 = arith.index_cast %36 : i32 to index
    %38 = memref.load %arg1[%37] : memref<128xi32, #tpu.memory_space<smem>>
    %c5_i32_20 = arith.constant 5 : i32
    %c0_i32_21 = arith.constant 0 : i32
    %39 = tpu.memref_slice %arg2[%38, %c0_i32_21] : memref<512x640xf32, #tpu.memory_space<any>> -> memref<1x640xf32, #tpu.memory_space<any>>
    %c5_i32_22 = arith.constant 5 : i32
    %c0_i32_23 = arith.constant 0 : i32
    %40 = tpu.memref_slice %arg3[%c5_i32_22, %c0_i32_23] : memref<32x640xf32, #tpu.memory_space<vmem>> -> memref<1x640xf32, #tpu.memory_space<vmem>>
    %41 = tpu.memref_slice %arg4[%c5_i32_20] : memref<32x!tpu.dma_semaphore, #tpu.memory_space<semaphore_mem>> -> memref<1x!tpu.dma_semaphore, #tpu.memory_space<semaphore_mem>>
    %42 = tpu.memref_squeeze %41 : memref<1x!tpu.dma_semaphore, #tpu.memory_space<semaphore_mem>> -> memref<!tpu.dma_semaphore, #tpu.memory_space<semaphore_mem>>
    tpu.enqueue_dma source(%39 : memref<1x640xf32, #tpu.memory_space<any>>) target(%40 : memref<1x640xf32, #tpu.memory_space<vmem>>) target_semaphore(%42 : memref<!tpu.dma_semaphore, #tpu.memory_space<semaphore_mem>>)
    %c6_i32 = arith.constant 6 : i32
    %43 = arith.addi %0, %c6_i32 : i32
    %44 = arith.index_cast %43 : i32 to index
    %45 = memref.load %arg1[%44] : memref<128xi32, #tpu.memory_space<smem>>
    %c6_i32_24 = arith.constant 6 : i32
    %c0_i32_25 = arith.constant 0 : i32
    %46 = tpu.memref_slice %arg2[%45, %c0_i32_25] : memref<512x640xf32, #tpu.memory_space<any>> -> memref<1x640xf32, #tpu.memory_space<any>>
    %c6_i32_26 = arith.constant 6 : i32
    %c0_i32_27 = arith.constant 0 : i32
    %47 = tpu.memref_slice %arg3[%c6_i32_26, %c0_i32_27] : memref<32x640xf32, #tpu.memory_space<vmem>> -> memref<1x640xf32, #tpu.memory_space<vmem>>
    %48 = tpu.memref_slice %arg4[%c6_i32_24] : memref<32x!tpu.dma_semaphore, #tpu.memory_space<semaphore_mem>> -> memref<1x!tpu.dma_semaphore, #tpu.memory_space<semaphore_mem>>
    %49 = tpu.memref_squeeze %48 : memref<1x!tpu.dma_semaphore, #tpu.memory_space<semaphore_mem>> -> memref<!tpu.dma_semaphore, #tpu.memory_space<semaphore_mem>>
    tpu.enqueue_dma source(%46 : memref<1x640xf32, #tpu.memory_space<any>>) target(%47 : memref<1x640xf32, #tpu.memory_space<vmem>>) target_semaphore(%49 : memref<!tpu.dma_semaphore, #tpu.memory_space<semaphore_mem>>)
    %c7_i32 = arith.constant 7 : i32
    %50 = arith.addi %0, %c7_i32 : i32
    %51 = arith.index_cast %50 : i32 to index
    %52 = memref.load %arg1[%51] : memref<128xi32, #tpu.memory_space<smem>>
    %c7_i32_28 = arith.constant 7 : i32
    %c0_i32_29 = arith.constant 0 : i32
    %53 = tpu.memref_slice %arg2[%52, %c0_i32_29] : memref<512x640xf32, #tpu.memory_space<any>> -> memref<1x640xf32, #tpu.memory_space<any>>
    %c7_i32_30 = arith.constant 7 : i32
    %c0_i32_31 = arith.constant 0 : i32
    %54 = tpu.memref_slice %arg3[%c7_i32_30, %c0_i32_31] : memref<32x640xf32, #tpu.memory_space<vmem>> -> memref<1x640xf32, #tpu.memory_space<vmem>>
    %55 = tpu.memref_slice %arg4[%c7_i32_28] : memref<32x!tpu.dma_semaphore, #tpu.memory_space<semaphore_mem>> -> memref<1x!tpu.dma_semaphore, #tpu.memory_space<semaphore_mem>>
    %56 = tpu.memref_squeeze %55 : memref<1x!tpu.dma_semaphore, #tpu.memory_space<semaphore_mem>> -> memref<!tpu.dma_semaphore, #tpu.memory_space<semaphore_mem>>
    tpu.enqueue_dma source(%53 : memref<1x640xf32, #tpu.memory_space<any>>) target(%54 : memref<1x640xf32, #tpu.memory_space<vmem>>) target_semaphore(%56 : memref<!tpu.dma_semaphore, #tpu.memory_space<semaphore_mem>>)
    %c8_i32 = arith.constant 8 : i32
    %57 = arith.addi %0, %c8_i32 : i32
    %58 = arith.index_cast %57 : i32 to index
    %59 = memref.load %arg1[%58] : memref<128xi32, #tpu.memory_space<smem>>
    %c8_i32_32 = arith.constant 8 : i32
    %c0_i32_33 = arith.constant 0 : i32
    %60 = tpu.memref_slice %arg2[%59, %c0_i32_33] : memref<512x640xf32, #tpu.memory_space<any>> -> memref<1x640xf32, #tpu.memory_space<any>>
    %c8_i32_34 = arith.constant 8 : i32
    %c0_i32_35 = arith.constant 0 : i32
    %61 = tpu.memref_slice %arg3[%c8_i32_34, %c0_i32_35] : memref<32x640xf32, #tpu.memory_space<vmem>> -> memref<1x640xf32, #tpu.memory_space<vmem>>
    %62 = tpu.memref_slice %arg4[%c8_i32_32] : memref<32x!tpu.dma_semaphore, #tpu.memory_space<semaphore_mem>> -> memref<1x!tpu.dma_semaphore, #tpu.memory_space<semaphore_mem>>
    %63 = tpu.memref_squeeze %62 : memref<1x!tpu.dma_semaphore, #tpu.memory_space<semaphore_mem>> -> memref<!tpu.dma_semaphore, #tpu.memory_space<semaphore_mem>>
    tpu.enqueue_dma source(%60 : memref<1x640xf32, #tpu.memory_space<any>>) target(%61 : memref<1x640xf32, #tpu.memory_space<vmem>>) target_semaphore(%63 : memref<!tpu.dma_semaphore, #tpu.memory_space<semaphore_mem>>)
    %c9_i32 = arith.constant 9 : i32
    %64 = arith.addi %0, %c9_i32 : i32
    %65 = arith.index_cast %64 : i32 to index
    %66 = memref.load %arg1[%65] : memref<128xi32, #tpu.memory_space<smem>>
    %c9_i32_36 = arith.constant 9 : i32
    %c0_i32_37 = arith.constant 0 : i32
    %67 = tpu.memref_slice %arg2[%66, %c0_i32_37] : memref<512x640xf32, #tpu.memory_space<any>> -> memref<1x640xf32, #tpu.memory_space<any>>
    %c9_i32_38 = arith.constant 9 : i32
    %c0_i32_39 = arith.constant 0 : i32
    %68 = tpu.memref_slice %arg3[%c9_i32_38, %c0_i32_39] : memref<32x640xf32, #tpu.memory_space<vmem>> -> memref<1x640xf32, #tpu.memory_space<vmem>>
    %69 = tpu.memref_slice %arg4[%c9_i32_36] : memref<32x!tpu.dma_semaphore, #tpu.memory_space<semaphore_mem>> -> memref<1x!tpu.dma_semaphore, #tpu.memory_space<semaphore_mem>>
    %70 = tpu.memref_squeeze %69 : memref<1x!tpu.dma_semaphore, #tpu.memory_space<semaphore_mem>> -> memref<!tpu.dma_semaphore, #tpu.memory_space<semaphore_mem>>
    tpu.enqueue_dma source(%67 : memref<1x640xf32, #tpu.memory_space<any>>) target(%68 : memref<1x640xf32, #tpu.memory_space<vmem>>) target_semaphore(%70 : memref<!tpu.dma_semaphore, #tpu.memory_space<semaphore_mem>>)
    %c10_i32 = arith.constant 10 : i32
    %71 = arith.addi %0, %c10_i32 : i32
    %72 = arith.index_cast %71 : i32 to index
    %73 = memref.load %arg1[%72] : memref<128xi32, #tpu.memory_space<smem>>
    %c10_i32_40 = arith.constant 10 : i32
    %c0_i32_41 = arith.constant 0 : i32
    %74 = tpu.memref_slice %arg2[%73, %c0_i32_41] : memref<512x640xf32, #tpu.memory_space<any>> -> memref<1x640xf32, #tpu.memory_space<any>>
    %c10_i32_42 = arith.constant 10 : i32
    %c0_i32_43 = arith.constant 0 : i32
    %75 = tpu.memref_slice %arg3[%c10_i32_42, %c0_i32_43] : memref<32x640xf32, #tpu.memory_space<vmem>> -> memref<1x640xf32, #tpu.memory_space<vmem>>
    %76 = tpu.memref_slice %arg4[%c10_i32_40] : memref<32x!tpu.dma_semaphore, #tpu.memory_space<semaphore_mem>> -> memref<1x!tpu.dma_semaphore, #tpu.memory_space<semaphore_mem>>
    %77 = tpu.memref_squeeze %76 : memref<1x!tpu.dma_semaphore, #tpu.memory_space<semaphore_mem>> -> memref<!tpu.dma_semaphore, #tpu.memory_space<semaphore_mem>>
    tpu.enqueue_dma source(%74 : memref<1x640xf32, #tpu.memory_space<any>>) target(%75 : memref<1x640xf32, #tpu.memory_space<vmem>>) target_semaphore(%77 : memref<!tpu.dma_semaphore, #tpu.memory_space<semaphore_mem>>)
    %c11_i32 = arith.constant 11 : i32
    %78 = arith.addi %0, %c11_i32 : i32
    %79 = arith.index_cast %78 : i32 to index
    %80 = memref.load %arg1[%79] : memref<128xi32, #tpu.memory_space<smem>>
    %c11_i32_44 = arith.constant 11 : i32
    %c0_i32_45 = arith.constant 0 : i32
    %81 = tpu.memref_slice %arg2[%80, %c0_i32_45] : memref<512x640xf32, #tpu.memory_space<any>> -> memref<1x640xf32, #tpu.memory_space<any>>
    %c11_i32_46 = arith.constant 11 : i32
    %c0_i32_47 = arith.constant 0 : i32
    %82 = tpu.memref_slice %arg3[%c11_i32_46, %c0_i32_47] : memref<32x640xf32, #tpu.memory_space<vmem>> -> memref<1x640xf32, #tpu.memory_space<vmem>>
    %83 = tpu.memref_slice %arg4[%c11_i32_44] : memref<32x!tpu.dma_semaphore, #tpu.memory_space<semaphore_mem>> -> memref<1x!tpu.dma_semaphore, #tpu.memory_space<semaphore_mem>>
    %84 = tpu.memref_squeeze %83 : memref<1x!tpu.dma_semaphore, #tpu.memory_space<semaphore_mem>> -> memref<!tpu.dma_semaphore, #tpu.memory_space<semaphore_mem>>
    tpu.enqueue_dma source(%81 : memref<1x640xf32, #tpu.memory_space<any>>) target(%82 : memref<1x640xf32, #tpu.memory_space<vmem>>) target_semaphore(%84 : memref<!tpu.dma_semaphore, #tpu.memory_space<semaphore_mem>>)
    %c12_i32 = arith.constant 12 : i32
    %85 = arith.addi %0, %c12_i32 : i32
    %86 = arith.index_cast %85 : i32 to index
    %87 = memref.load %arg1[%86] : memref<128xi32, #tpu.memory_space<smem>>
    %c12_i32_48 = arith.constant 12 : i32
    %c0_i32_49 = arith.constant 0 : i32
    %88 = tpu.memref_slice %arg2[%87, %c0_i32_49] : memref<512x640xf32, #tpu.memory_space<any>> -> memref<1x640xf32, #tpu.memory_space<any>>
    %c12_i32_50 = arith.constant 12 : i32
    %c0_i32_51 = arith.constant 0 : i32
    %89 = tpu.memref_slice %arg3[%c12_i32_50, %c0_i32_51] : memref<32x640xf32, #tpu.memory_space<vmem>> -> memref<1x640xf32, #tpu.memory_space<vmem>>
    %90 = tpu.memref_slice %arg4[%c12_i32_48] : memref<32x!tpu.dma_semaphore, #tpu.memory_space<semaphore_mem>> -> memref<1x!tpu.dma_semaphore, #tpu.memory_space<semaphore_mem>>
    %91 = tpu.memref_squeeze %90 : memref<1x!tpu.dma_semaphore, #tpu.memory_space<semaphore_mem>> -> memref<!tpu.dma_semaphore, #tpu.memory_space<semaphore_mem>>
    tpu.enqueue_dma source(%88 : memref<1x640xf32, #tpu.memory_space<any>>) target(%89 : memref<1x640xf32, #tpu.memory_space<vmem>>) target_semaphore(%91 : memref<!tpu.dma_semaphore, #tpu.memory_space<semaphore_mem>>)
    %c13_i32 = arith.constant 13 : i32
    %92 = arith.addi %0, %c13_i32 : i32
    %93 = arith.index_cast %92 : i32 to index
    %94 = memref.load %arg1[%93] : memref<128xi32, #tpu.memory_space<smem>>
    %c13_i32_52 = arith.constant 13 : i32
    %c0_i32_53 = arith.constant 0 : i32
    %95 = tpu.memref_slice %arg2[%94, %c0_i32_53] : memref<512x640xf32, #tpu.memory_space<any>> -> memref<1x640xf32, #tpu.memory_space<any>>
    %c13_i32_54 = arith.constant 13 : i32
    %c0_i32_55 = arith.constant 0 : i32
    %96 = tpu.memref_slice %arg3[%c13_i32_54, %c0_i32_55] : memref<32x640xf32, #tpu.memory_space<vmem>> -> memref<1x640xf32, #tpu.memory_space<vmem>>
    %97 = tpu.memref_slice %arg4[%c13_i32_52] : memref<32x!tpu.dma_semaphore, #tpu.memory_space<semaphore_mem>> -> memref<1x!tpu.dma_semaphore, #tpu.memory_space<semaphore_mem>>
    %98 = tpu.memref_squeeze %97 : memref<1x!tpu.dma_semaphore, #tpu.memory_space<semaphore_mem>> -> memref<!tpu.dma_semaphore, #tpu.memory_space<semaphore_mem>>
    tpu.enqueue_dma source(%95 : memref<1x640xf32, #tpu.memory_space<any>>) target(%96 : memref<1x640xf32, #tpu.memory_space<vmem>>) target_semaphore(%98 : memref<!tpu.dma_semaphore, #tpu.memory_space<semaphore_mem>>)
    %c14_i32 = arith.constant 14 : i32
    %99 = arith.addi %0, %c14_i32 : i32
    %100 = arith.index_cast %99 : i32 to index
    %101 = memref.load %arg1[%100] : memref<128xi32, #tpu.memory_space<smem>>
    %c14_i32_56 = arith.constant 14 : i32
    %c0_i32_57 = arith.constant 0 : i32
    %102 = tpu.memref_slice %arg2[%101, %c0_i32_57] : memref<512x640xf32, #tpu.memory_space<any>> -> memref<1x640xf32, #tpu.memory_space<any>>
    %c14_i32_58 = arith.constant 14 : i32
    %c0_i32_59 = arith.constant 0 : i32
    %103 = tpu.memref_slice %arg3[%c14_i32_58, %c0_i32_59] : memref<32x640xf32, #tpu.memory_space<vmem>> -> memref<1x640xf32, #tpu.memory_space<vmem>>
    %104 = tpu.memref_slice %arg4[%c14_i32_56] : memref<32x!tpu.dma_semaphore, #tpu.memory_space<semaphore_mem>> -> memref<1x!tpu.dma_semaphore, #tpu.memory_space<semaphore_mem>>
    %105 = tpu.memref_squeeze %104 : memref<1x!tpu.dma_semaphore, #tpu.memory_space<semaphore_mem>> -> memref<!tpu.dma_semaphore, #tpu.memory_space<semaphore_mem>>
    tpu.enqueue_dma source(%102 : memref<1x640xf32, #tpu.memory_space<any>>) target(%103 : memref<1x640xf32, #tpu.memory_space<vmem>>) target_semaphore(%105 : memref<!tpu.dma_semaphore, #tpu.memory_space<semaphore_mem>>)
    %c15_i32 = arith.constant 15 : i32
    %106 = arith.addi %0, %c15_i32 : i32
    %107 = arith.index_cast %106 : i32 to index
    %108 = memref.load %arg1[%107] : memref<128xi32, #tpu.memory_space<smem>>
    %c15_i32_60 = arith.constant 15 : i32
    %c0_i32_61 = arith.constant 0 : i32
    %109 = tpu.memref_slice %arg2[%108, %c0_i32_61] : memref<512x640xf32, #tpu.memory_space<any>> -> memref<1x640xf32, #tpu.memory_space<any>>
    %c15_i32_62 = arith.constant 15 : i32
    %c0_i32_63 = arith.constant 0 : i32
    %110 = tpu.memref_slice %arg3[%c15_i32_62, %c0_i32_63] : memref<32x640xf32, #tpu.memory_space<vmem>> -> memref<1x640xf32, #tpu.memory_space<vmem>>
    %111 = tpu.memref_slice %arg4[%c15_i32_60] : memref<32x!tpu.dma_semaphore, #tpu.memory_space<semaphore_mem>> -> memref<1x!tpu.dma_semaphore, #tpu.memory_space<semaphore_mem>>
    %112 = tpu.memref_squeeze %111 : memref<1x!tpu.dma_semaphore, #tpu.memory_space<semaphore_mem>> -> memref<!tpu.dma_semaphore, #tpu.memory_space<semaphore_mem>>
    tpu.enqueue_dma source(%109 : memref<1x640xf32, #tpu.memory_space<any>>) target(%110 : memref<1x640xf32, #tpu.memory_space<vmem>>) target_semaphore(%112 : memref<!tpu.dma_semaphore, #tpu.memory_space<semaphore_mem>>)
    %c16_i32 = arith.constant 16 : i32
    %113 = arith.addi %0, %c16_i32 : i32
    %114 = arith.index_cast %113 : i32 to index
    %115 = memref.load %arg1[%114] : memref<128xi32, #tpu.memory_space<smem>>
    %c16_i32_64 = arith.constant 16 : i32
    %c0_i32_65 = arith.constant 0 : i32
    %116 = tpu.memref_slice %arg2[%115, %c0_i32_65] : memref<512x640xf32, #tpu.memory_space<any>> -> memref<1x640xf32, #tpu.memory_space<any>>
    %c16_i32_66 = arith.constant 16 : i32
    %c0_i32_67 = arith.constant 0 : i32
    %117 = tpu.memref_slice %arg3[%c16_i32_66, %c0_i32_67] : memref<32x640xf32, #tpu.memory_space<vmem>> -> memref<1x640xf32, #tpu.memory_space<vmem>>
    %118 = tpu.memref_slice %arg4[%c16_i32_64] : memref<32x!tpu.dma_semaphore, #tpu.memory_space<semaphore_mem>> -> memref<1x!tpu.dma_semaphore, #tpu.memory_space<semaphore_mem>>
    %119 = tpu.memref_squeeze %118 : memref<1x!tpu.dma_semaphore, #tpu.memory_space<semaphore_mem>> -> memref<!tpu.dma_semaphore, #tpu.memory_space<semaphore_mem>>
    tpu.enqueue_dma source(%116 : memref<1x640xf32, #tpu.memory_space<any>>) target(%117 : memref<1x640xf32, #tpu.memory_space<vmem>>) target_semaphore(%119 : memref<!tpu.dma_semaphore, #tpu.memory_space<semaphore_mem>>)
    %c17_i32 = arith.constant 17 : i32
    %120 = arith.addi %0, %c17_i32 : i32
    %121 = arith.index_cast %120 : i32 to index
    %122 = memref.load %arg1[%121] : memref<128xi32, #tpu.memory_space<smem>>
    %c17_i32_68 = arith.constant 17 : i32
    %c0_i32_69 = arith.constant 0 : i32
    %123 = tpu.memref_slice %arg2[%122, %c0_i32_69] : memref<512x640xf32, #tpu.memory_space<any>> -> memref<1x640xf32, #tpu.memory_space<any>>
    %c17_i32_70 = arith.constant 17 : i32
    %c0_i32_71 = arith.constant 0 : i32
    %124 = tpu.memref_slice %arg3[%c17_i32_70, %c0_i32_71] : memref<32x640xf32, #tpu.memory_space<vmem>> -> memref<1x640xf32, #tpu.memory_space<vmem>>
    %125 = tpu.memref_slice %arg4[%c17_i32_68] : memref<32x!tpu.dma_semaphore, #tpu.memory_space<semaphore_mem>> -> memref<1x!tpu.dma_semaphore, #tpu.memory_space<semaphore_mem>>
    %126 = tpu.memref_squeeze %125 : memref<1x!tpu.dma_semaphore, #tpu.memory_space<semaphore_mem>> -> memref<!tpu.dma_semaphore, #tpu.memory_space<semaphore_mem>>
    tpu.enqueue_dma source(%123 : memref<1x640xf32, #tpu.memory_space<any>>) target(%124 : memref<1x640xf32, #tpu.memory_space<vmem>>) target_semaphore(%126 : memref<!tpu.dma_semaphore, #tpu.memory_space<semaphore_mem>>)
    %c18_i32 = arith.constant 18 : i32
    %127 = arith.addi %0, %c18_i32 : i32
    %128 = arith.index_cast %127 : i32 to index
    %129 = memref.load %arg1[%128] : memref<128xi32, #tpu.memory_space<smem>>
    %c18_i32_72 = arith.constant 18 : i32
    %c0_i32_73 = arith.constant 0 : i32
    %130 = tpu.memref_slice %arg2[%129, %c0_i32_73] : memref<512x640xf32, #tpu.memory_space<any>> -> memref<1x640xf32, #tpu.memory_space<any>>
    %c18_i32_74 = arith.constant 18 : i32
    %c0_i32_75 = arith.constant 0 : i32
    %131 = tpu.memref_slice %arg3[%c18_i32_74, %c0_i32_75] : memref<32x640xf32, #tpu.memory_space<vmem>> -> memref<1x640xf32, #tpu.memory_space<vmem>>
    %132 = tpu.memref_slice %arg4[%c18_i32_72] : memref<32x!tpu.dma_semaphore, #tpu.memory_space<semaphore_mem>> -> memref<1x!tpu.dma_semaphore, #tpu.memory_space<semaphore_mem>>
    %133 = tpu.memref_squeeze %132 : memref<1x!tpu.dma_semaphore, #tpu.memory_space<semaphore_mem>> -> memref<!tpu.dma_semaphore, #tpu.memory_space<semaphore_mem>>
    tpu.enqueue_dma source(%130 : memref<1x640xf32, #tpu.memory_space<any>>) target(%131 : memref<1x640xf32, #tpu.memory_space<vmem>>) target_semaphore(%133 : memref<!tpu.dma_semaphore, #tpu.memory_space<semaphore_mem>>)
    %c19_i32 = arith.constant 19 : i32
    %134 = arith.addi %0, %c19_i32 : i32
    %135 = arith.index_cast %134 : i32 to index
    %136 = memref.load %arg1[%135] : memref<128xi32, #tpu.memory_space<smem>>
    %c19_i32_76 = arith.constant 19 : i32
    %c0_i32_77 = arith.constant 0 : i32
    %137 = tpu.memref_slice %arg2[%136, %c0_i32_77] : memref<512x640xf32, #tpu.memory_space<any>> -> memref<1x640xf32, #tpu.memory_space<any>>
    %c19_i32_78 = arith.constant 19 : i32
    %c0_i32_79 = arith.constant 0 : i32
    %138 = tpu.memref_slice %arg3[%c19_i32_78, %c0_i32_79] : memref<32x640xf32, #tpu.memory_space<vmem>> -> memref<1x640xf32, #tpu.memory_space<vmem>>
    %139 = tpu.memref_slice %arg4[%c19_i32_76] : memref<32x!tpu.dma_semaphore, #tpu.memory_space<semaphore_mem>> -> memref<1x!tpu.dma_semaphore, #tpu.memory_space<semaphore_mem>>
    %140 = tpu.memref_squeeze %139 : memref<1x!tpu.dma_semaphore, #tpu.memory_space<semaphore_mem>> -> memref<!tpu.dma_semaphore, #tpu.memory_space<semaphore_mem>>
    tpu.enqueue_dma source(%137 : memref<1x640xf32, #tpu.memory_space<any>>) target(%138 : memref<1x640xf32, #tpu.memory_space<vmem>>) target_semaphore(%140 : memref<!tpu.dma_semaphore, #tpu.memory_space<semaphore_mem>>)
    %c20_i32 = arith.constant 20 : i32
    %141 = arith.addi %0, %c20_i32 : i32
    %142 = arith.index_cast %141 : i32 to index
    %143 = memref.load %arg1[%142] : memref<128xi32, #tpu.memory_space<smem>>
    %c20_i32_80 = arith.constant 20 : i32
    %c0_i32_81 = arith.constant 0 : i32
    %144 = tpu.memref_slice %arg2[%143, %c0_i32_81] : memref<512x640xf32, #tpu.memory_space<any>> -> memref<1x640xf32, #tpu.memory_space<any>>
    %c20_i32_82 = arith.constant 20 : i32
    %c0_i32_83 = arith.constant 0 : i32
    %145 = tpu.memref_slice %arg3[%c20_i32_82, %c0_i32_83] : memref<32x640xf32, #tpu.memory_space<vmem>> -> memref<1x640xf32, #tpu.memory_space<vmem>>
    %146 = tpu.memref_slice %arg4[%c20_i32_80] : memref<32x!tpu.dma_semaphore, #tpu.memory_space<semaphore_mem>> -> memref<1x!tpu.dma_semaphore, #tpu.memory_space<semaphore_mem>>
    %147 = tpu.memref_squeeze %146 : memref<1x!tpu.dma_semaphore, #tpu.memory_space<semaphore_mem>> -> memref<!tpu.dma_semaphore, #tpu.memory_space<semaphore_mem>>
    tpu.enqueue_dma source(%144 : memref<1x640xf32, #tpu.memory_space<any>>) target(%145 : memref<1x640xf32, #tpu.memory_space<vmem>>) target_semaphore(%147 : memref<!tpu.dma_semaphore, #tpu.memory_space<semaphore_mem>>)
    %c21_i32 = arith.constant 21 : i32
    %148 = arith.addi %0, %c21_i32 : i32
    %149 = arith.index_cast %148 : i32 to index
    %150 = memref.load %arg1[%149] : memref<128xi32, #tpu.memory_space<smem>>
    %c21_i32_84 = arith.constant 21 : i32
    %c0_i32_85 = arith.constant 0 : i32
    %151 = tpu.memref_slice %arg2[%150, %c0_i32_85] : memref<512x640xf32, #tpu.memory_space<any>> -> memref<1x640xf32, #tpu.memory_space<any>>
    %c21_i32_86 = arith.constant 21 : i32
    %c0_i32_87 = arith.constant 0 : i32
    %152 = tpu.memref_slice %arg3[%c21_i32_86, %c0_i32_87] : memref<32x640xf32, #tpu.memory_space<vmem>> -> memref<1x640xf32, #tpu.memory_space<vmem>>
    %153 = tpu.memref_slice %arg4[%c21_i32_84] : memref<32x!tpu.dma_semaphore, #tpu.memory_space<semaphore_mem>> -> memref<1x!tpu.dma_semaphore, #tpu.memory_space<semaphore_mem>>
    %154 = tpu.memref_squeeze %153 : memref<1x!tpu.dma_semaphore, #tpu.memory_space<semaphore_mem>> -> memref<!tpu.dma_semaphore, #tpu.memory_space<semaphore_mem>>
    tpu.enqueue_dma source(%151 : memref<1x640xf32, #tpu.memory_space<any>>) target(%152 : memref<1x640xf32, #tpu.memory_space<vmem>>) target_semaphore(%154 : memref<!tpu.dma_semaphore, #tpu.memory_space<semaphore_mem>>)
    %c22_i32 = arith.constant 22 : i32
    %155 = arith.addi %0, %c22_i32 : i32
    %156 = arith.index_cast %155 : i32 to index
    %157 = memref.load %arg1[%156] : memref<128xi32, #tpu.memory_space<smem>>
    %c22_i32_88 = arith.constant 22 : i32
    %c0_i32_89 = arith.constant 0 : i32
    %158 = tpu.memref_slice %arg2[%157, %c0_i32_89] : memref<512x640xf32, #tpu.memory_space<any>> -> memref<1x640xf32, #tpu.memory_space<any>>
    %c22_i32_90 = arith.constant 22 : i32
    %c0_i32_91 = arith.constant 0 : i32
    %159 = tpu.memref_slice %arg3[%c22_i32_90, %c0_i32_91] : memref<32x640xf32, #tpu.memory_space<vmem>> -> memref<1x640xf32, #tpu.memory_space<vmem>>
    %160 = tpu.memref_slice %arg4[%c22_i32_88] : memref<32x!tpu.dma_semaphore, #tpu.memory_space<semaphore_mem>> -> memref<1x!tpu.dma_semaphore, #tpu.memory_space<semaphore_mem>>
    %161 = tpu.memref_squeeze %160 : memref<1x!tpu.dma_semaphore, #tpu.memory_space<semaphore_mem>> -> memref<!tpu.dma_semaphore, #tpu.memory_space<semaphore_mem>>
    tpu.enqueue_dma source(%158 : memref<1x640xf32, #tpu.memory_space<any>>) target(%159 : memref<1x640xf32, #tpu.memory_space<vmem>>) target_semaphore(%161 : memref<!tpu.dma_semaphore, #tpu.memory_space<semaphore_mem>>)
    %c23_i32 = arith.constant 23 : i32
    %162 = arith.addi %0, %c23_i32 : i32
    %163 = arith.index_cast %162 : i32 to index
    %164 = memref.load %arg1[%163] : memref<128xi32, #tpu.memory_space<smem>>
    %c23_i32_92 = arith.constant 23 : i32
    %c0_i32_93 = arith.constant 0 : i32
    %165 = tpu.memref_slice %arg2[%164, %c0_i32_93] : memref<512x640xf32, #tpu.memory_space<any>> -> memref<1x640xf32, #tpu.memory_space<any>>
    %c23_i32_94 = arith.constant 23 : i32
    %c0_i32_95 = arith.constant 0 : i32
    %166 = tpu.memref_slice %arg3[%c23_i32_94, %c0_i32_95] : memref<32x640xf32, #tpu.memory_space<vmem>> -> memref<1x640xf32, #tpu.memory_space<vmem>>
    %167 = tpu.memref_slice %arg4[%c23_i32_92] : memref<32x!tpu.dma_semaphore, #tpu.memory_space<semaphore_mem>> -> memref<1x!tpu.dma_semaphore, #tpu.memory_space<semaphore_mem>>
    %168 = tpu.memref_squeeze %167 : memref<1x!tpu.dma_semaphore, #tpu.memory_space<semaphore_mem>> -> memref<!tpu.dma_semaphore, #tpu.memory_space<semaphore_mem>>
    tpu.enqueue_dma source(%165 : memref<1x640xf32, #tpu.memory_space<any>>) target(%166 : memref<1x640xf32, #tpu.memory_space<vmem>>) target_semaphore(%168 : memref<!tpu.dma_semaphore, #tpu.memory_space<semaphore_mem>>)
    %c24_i32 = arith.constant 24 : i32
    %169 = arith.addi %0, %c24_i32 : i32
    %170 = arith.index_cast %169 : i32 to index
    %171 = memref.load %arg1[%170] : memref<128xi32, #tpu.memory_space<smem>>
    %c24_i32_96 = arith.constant 24 : i32
    %c0_i32_97 = arith.constant 0 : i32
    %172 = tpu.memref_slice %arg2[%171, %c0_i32_97] : memref<512x640xf32, #tpu.memory_space<any>> -> memref<1x640xf32, #tpu.memory_space<any>>
    %c24_i32_98 = arith.constant 24 : i32
    %c0_i32_99 = arith.constant 0 : i32
    %173 = tpu.memref_slice %arg3[%c24_i32_98, %c0_i32_99] : memref<32x640xf32, #tpu.memory_space<vmem>> -> memref<1x640xf32, #tpu.memory_space<vmem>>
    %174 = tpu.memref_slice %arg4[%c24_i32_96] : memref<32x!tpu.dma_semaphore, #tpu.memory_space<semaphore_mem>> -> memref<1x!tpu.dma_semaphore, #tpu.memory_space<semaphore_mem>>
    %175 = tpu.memref_squeeze %174 : memref<1x!tpu.dma_semaphore, #tpu.memory_space<semaphore_mem>> -> memref<!tpu.dma_semaphore, #tpu.memory_space<semaphore_mem>>
    tpu.enqueue_dma source(%172 : memref<1x640xf32, #tpu.memory_space<any>>) target(%173 : memref<1x640xf32, #tpu.memory_space<vmem>>) target_semaphore(%175 : memref<!tpu.dma_semaphore, #tpu.memory_space<semaphore_mem>>)
    %c25_i32 = arith.constant 25 : i32
    %176 = arith.addi %0, %c25_i32 : i32
    %177 = arith.index_cast %176 : i32 to index
    %178 = memref.load %arg1[%177] : memref<128xi32, #tpu.memory_space<smem>>
    %c25_i32_100 = arith.constant 25 : i32
    %c0_i32_101 = arith.constant 0 : i32
    %179 = tpu.memref_slice %arg2[%178, %c0_i32_101] : memref<512x640xf32, #tpu.memory_space<any>> -> memref<1x640xf32, #tpu.memory_space<any>>
    %c25_i32_102 = arith.constant 25 : i32
    %c0_i32_103 = arith.constant 0 : i32
    %180 = tpu.memref_slice %arg3[%c25_i32_102, %c0_i32_103] : memref<32x640xf32, #tpu.memory_space<vmem>> -> memref<1x640xf32, #tpu.memory_space<vmem>>
    %181 = tpu.memref_slice %arg4[%c25_i32_100] : memref<32x!tpu.dma_semaphore, #tpu.memory_space<semaphore_mem>> -> memref<1x!tpu.dma_semaphore, #tpu.memory_space<semaphore_mem>>
    %182 = tpu.memref_squeeze %181 : memref<1x!tpu.dma_semaphore, #tpu.memory_space<semaphore_mem>> -> memref<!tpu.dma_semaphore, #tpu.memory_space<semaphore_mem>>
    tpu.enqueue_dma source(%179 : memref<1x640xf32, #tpu.memory_space<any>>) target(%180 : memref<1x640xf32, #tpu.memory_space<vmem>>) target_semaphore(%182 : memref<!tpu.dma_semaphore, #tpu.memory_space<semaphore_mem>>)
    %c26_i32 = arith.constant 26 : i32
    %183 = arith.addi %0, %c26_i32 : i32
    %184 = arith.index_cast %183 : i32 to index
    %185 = memref.load %arg1[%184] : memref<128xi32, #tpu.memory_space<smem>>
    %c26_i32_104 = arith.constant 26 : i32
    %c0_i32_105 = arith.constant 0 : i32
    %186 = tpu.memref_slice %arg2[%185, %c0_i32_105] : memref<512x640xf32, #tpu.memory_space<any>> -> memref<1x640xf32, #tpu.memory_space<any>>
    %c26_i32_106 = arith.constant 26 : i32
    %c0_i32_107 = arith.constant 0 : i32
    %187 = tpu.memref_slice %arg3[%c26_i32_106, %c0_i32_107] : memref<32x640xf32, #tpu.memory_space<vmem>> -> memref<1x640xf32, #tpu.memory_space<vmem>>
    %188 = tpu.memref_slice %arg4[%c26_i32_104] : memref<32x!tpu.dma_semaphore, #tpu.memory_space<semaphore_mem>> -> memref<1x!tpu.dma_semaphore, #tpu.memory_space<semaphore_mem>>
    %189 = tpu.memref_squeeze %188 : memref<1x!tpu.dma_semaphore, #tpu.memory_space<semaphore_mem>> -> memref<!tpu.dma_semaphore, #tpu.memory_space<semaphore_mem>>
    tpu.enqueue_dma source(%186 : memref<1x640xf32, #tpu.memory_space<any>>) target(%187 : memref<1x640xf32, #tpu.memory_space<vmem>>) target_semaphore(%189 : memref<!tpu.dma_semaphore, #tpu.memory_space<semaphore_mem>>)
    %c27_i32 = arith.constant 27 : i32
    %190 = arith.addi %0, %c27_i32 : i32
    %191 = arith.index_cast %190 : i32 to index
    %192 = memref.load %arg1[%191] : memref<128xi32, #tpu.memory_space<smem>>
    %c27_i32_108 = arith.constant 27 : i32
    %c0_i32_109 = arith.constant 0 : i32
    %193 = tpu.memref_slice %arg2[%192, %c0_i32_109] : memref<512x640xf32, #tpu.memory_space<any>> -> memref<1x640xf32, #tpu.memory_space<any>>
    %c27_i32_110 = arith.constant 27 : i32
    %c0_i32_111 = arith.constant 0 : i32
    %194 = tpu.memref_slice %arg3[%c27_i32_110, %c0_i32_111] : memref<32x640xf32, #tpu.memory_space<vmem>> -> memref<1x640xf32, #tpu.memory_space<vmem>>
    %195 = tpu.memref_slice %arg4[%c27_i32_108] : memref<32x!tpu.dma_semaphore, #tpu.memory_space<semaphore_mem>> -> memref<1x!tpu.dma_semaphore, #tpu.memory_space<semaphore_mem>>
    %196 = tpu.memref_squeeze %195 : memref<1x!tpu.dma_semaphore, #tpu.memory_space<semaphore_mem>> -> memref<!tpu.dma_semaphore, #tpu.memory_space<semaphore_mem>>
    tpu.enqueue_dma source(%193 : memref<1x640xf32, #tpu.memory_space<any>>) target(%194 : memref<1x640xf32, #tpu.memory_space<vmem>>) target_semaphore(%196 : memref<!tpu.dma_semaphore, #tpu.memory_space<semaphore_mem>>)
    %c28_i32 = arith.constant 28 : i32
    %197 = arith.addi %0, %c28_i32 : i32
    %198 = arith.index_cast %197 : i32 to index
    %199 = memref.load %arg1[%198] : memref<128xi32, #tpu.memory_space<smem>>
    %c28_i32_112 = arith.constant 28 : i32
    %c0_i32_113 = arith.constant 0 : i32
    %200 = tpu.memref_slice %arg2[%199, %c0_i32_113] : memref<512x640xf32, #tpu.memory_space<any>> -> memref<1x640xf32, #tpu.memory_space<any>>
    %c28_i32_114 = arith.constant 28 : i32
    %c0_i32_115 = arith.constant 0 : i32
    %201 = tpu.memref_slice %arg3[%c28_i32_114, %c0_i32_115] : memref<32x640xf32, #tpu.memory_space<vmem>> -> memref<1x640xf32, #tpu.memory_space<vmem>>
    %202 = tpu.memref_slice %arg4[%c28_i32_112] : memref<32x!tpu.dma_semaphore, #tpu.memory_space<semaphore_mem>> -> memref<1x!tpu.dma_semaphore, #tpu.memory_space<semaphore_mem>>
    %203 = tpu.memref_squeeze %202 : memref<1x!tpu.dma_semaphore, #tpu.memory_space<semaphore_mem>> -> memref<!tpu.dma_semaphore, #tpu.memory_space<semaphore_mem>>
    tpu.enqueue_dma source(%200 : memref<1x640xf32, #tpu.memory_space<any>>) target(%201 : memref<1x640xf32, #tpu.memory_space<vmem>>) target_semaphore(%203 : memref<!tpu.dma_semaphore, #tpu.memory_space<semaphore_mem>>)
    %c29_i32 = arith.constant 29 : i32
    %204 = arith.addi %0, %c29_i32 : i32
    %205 = arith.index_cast %204 : i32 to index
    %206 = memref.load %arg1[%205] : memref<128xi32, #tpu.memory_space<smem>>
    %c29_i32_116 = arith.constant 29 : i32
    %c0_i32_117 = arith.constant 0 : i32
    %207 = tpu.memref_slice %arg2[%206, %c0_i32_117] : memref<512x640xf32, #tpu.memory_space<any>> -> memref<1x640xf32, #tpu.memory_space<any>>
    %c29_i32_118 = arith.constant 29 : i32
    %c0_i32_119 = arith.constant 0 : i32
    %208 = tpu.memref_slice %arg3[%c29_i32_118, %c0_i32_119] : memref<32x640xf32, #tpu.memory_space<vmem>> -> memref<1x640xf32, #tpu.memory_space<vmem>>
    %209 = tpu.memref_slice %arg4[%c29_i32_116] : memref<32x!tpu.dma_semaphore, #tpu.memory_space<semaphore_mem>> -> memref<1x!tpu.dma_semaphore, #tpu.memory_space<semaphore_mem>>
    %210 = tpu.memref_squeeze %209 : memref<1x!tpu.dma_semaphore, #tpu.memory_space<semaphore_mem>> -> memref<!tpu.dma_semaphore, #tpu.memory_space<semaphore_mem>>
    tpu.enqueue_dma source(%207 : memref<1x640xf32, #tpu.memory_space<any>>) target(%208 : memref<1x640xf32, #tpu.memory_space<vmem>>) target_semaphore(%210 : memref<!tpu.dma_semaphore, #tpu.memory_space<semaphore_mem>>)
    %c30_i32 = arith.constant 30 : i32
    %211 = arith.addi %0, %c30_i32 : i32
    %212 = arith.index_cast %211 : i32 to index
    %213 = memref.load %arg1[%212] : memref<128xi32, #tpu.memory_space<smem>>
    %c30_i32_120 = arith.constant 30 : i32
    %c0_i32_121 = arith.constant 0 : i32
    %214 = tpu.memref_slice %arg2[%213, %c0_i32_121] : memref<512x640xf32, #tpu.memory_space<any>> -> memref<1x640xf32, #tpu.memory_space<any>>
    %c30_i32_122 = arith.constant 30 : i32
    %c0_i32_123 = arith.constant 0 : i32
    %215 = tpu.memref_slice %arg3[%c30_i32_122, %c0_i32_123] : memref<32x640xf32, #tpu.memory_space<vmem>> -> memref<1x640xf32, #tpu.memory_space<vmem>>
    %216 = tpu.memref_slice %arg4[%c30_i32_120] : memref<32x!tpu.dma_semaphore, #tpu.memory_space<semaphore_mem>> -> memref<1x!tpu.dma_semaphore, #tpu.memory_space<semaphore_mem>>
    %217 = tpu.memref_squeeze %216 : memref<1x!tpu.dma_semaphore, #tpu.memory_space<semaphore_mem>> -> memref<!tpu.dma_semaphore, #tpu.memory_space<semaphore_mem>>
    tpu.enqueue_dma source(%214 : memref<1x640xf32, #tpu.memory_space<any>>) target(%215 : memref<1x640xf32, #tpu.memory_space<vmem>>) target_semaphore(%217 : memref<!tpu.dma_semaphore, #tpu.memory_space<semaphore_mem>>)
    %c31_i32 = arith.constant 31 : i32
    %218 = arith.addi %0, %c31_i32 : i32
    %219 = arith.index_cast %218 : i32 to index
    %220 = memref.load %arg1[%219] : memref<128xi32, #tpu.memory_space<smem>>
    %c31_i32_124 = arith.constant 31 : i32
    %c0_i32_125 = arith.constant 0 : i32
    %221 = tpu.memref_slice %arg2[%220, %c0_i32_125] : memref<512x640xf32, #tpu.memory_space<any>> -> memref<1x640xf32, #tpu.memory_space<any>>
    %c31_i32_126 = arith.constant 31 : i32
    %c0_i32_127 = arith.constant 0 : i32
    %222 = tpu.memref_slice %arg3[%c31_i32_126, %c0_i32_127] : memref<32x640xf32, #tpu.memory_space<vmem>> -> memref<1x640xf32, #tpu.memory_space<vmem>>
    %223 = tpu.memref_slice %arg4[%c31_i32_124] : memref<32x!tpu.dma_semaphore, #tpu.memory_space<semaphore_mem>> -> memref<1x!tpu.dma_semaphore, #tpu.memory_space<semaphore_mem>>
    %224 = tpu.memref_squeeze %223 : memref<1x!tpu.dma_semaphore, #tpu.memory_space<semaphore_mem>> -> memref<!tpu.dma_semaphore, #tpu.memory_space<semaphore_mem>>
    tpu.enqueue_dma source(%221 : memref<1x640xf32, #tpu.memory_space<any>>) target(%222 : memref<1x640xf32, #tpu.memory_space<vmem>>) target_semaphore(%224 : memref<!tpu.dma_semaphore, #tpu.memory_space<semaphore_mem>>)
    %c0_i32_128 = arith.constant 0 : i32
    %c0_i32_129 = arith.constant 0 : i32
    %225 = tpu.memref_slice %arg2[%3, %c0_i32_129] : memref<512x640xf32, #tpu.memory_space<any>> -> memref<1x640xf32, #tpu.memory_space<any>>
    %c0_i32_130 = arith.constant 0 : i32
    %c0_i32_131 = arith.constant 0 : i32
    %226 = tpu.memref_slice %arg3[%c0_i32_130, %c0_i32_131] : memref<32x640xf32, #tpu.memory_space<vmem>> -> memref<1x640xf32, #tpu.memory_space<vmem>>
    %227 = tpu.memref_slice %arg4[%c0_i32_128] : memref<32x!tpu.dma_semaphore, #tpu.memory_space<semaphore_mem>> -> memref<1x!tpu.dma_semaphore, #tpu.memory_space<semaphore_mem>>
    %228 = tpu.memref_squeeze %227 : memref<1x!tpu.dma_semaphore, #tpu.memory_space<semaphore_mem>> -> memref<!tpu.dma_semaphore, #tpu.memory_space<semaphore_mem>>
    tpu.wait_dma2 semaphore(%228 : memref<!tpu.dma_semaphore, #tpu.memory_space<semaphore_mem>>) src(%225 : memref<1x640xf32, #tpu.memory_space<any>>) dst(%226 : memref<1x640xf32, #tpu.memory_space<vmem>>)
    %c1_i32_132 = arith.constant 1 : i32
    %c0_i32_133 = arith.constant 0 : i32
    %229 = tpu.memref_slice %arg2[%10, %c0_i32_133] : memref<512x640xf32, #tpu.memory_space<any>> -> memref<1x640xf32, #tpu.memory_space<any>>
    %c1_i32_134 = arith.constant 1 : i32
    %c0_i32_135 = arith.constant 0 : i32
    %230 = tpu.memref_slice %arg3[%c1_i32_134, %c0_i32_135] : memref<32x640xf32, #tpu.memory_space<vmem>> -> memref<1x640xf32, #tpu.memory_space<vmem>>
    %231 = tpu.memref_slice %arg4[%c1_i32_132] : memref<32x!tpu.dma_semaphore, #tpu.memory_space<semaphore_mem>> -> memref<1x!tpu.dma_semaphore, #tpu.memory_space<semaphore_mem>>
    %232 = tpu.memref_squeeze %231 : memref<1x!tpu.dma_semaphore, #tpu.memory_space<semaphore_mem>> -> memref<!tpu.dma_semaphore, #tpu.memory_space<semaphore_mem>>
    tpu.wait_dma2 semaphore(%232 : memref<!tpu.dma_semaphore, #tpu.memory_space<semaphore_mem>>) src(%229 : memref<1x640xf32, #tpu.memory_space<any>>) dst(%230 : memref<1x640xf32, #tpu.memory_space<vmem>>)
    %c2_i32_136 = arith.constant 2 : i32
    %c0_i32_137 = arith.constant 0 : i32
    %233 = tpu.memref_slice %arg2[%17, %c0_i32_137] : memref<512x640xf32, #tpu.memory_space<any>> -> memref<1x640xf32, #tpu.memory_space<any>>
    %c2_i32_138 = arith.constant 2 : i32
    %c0_i32_139 = arith.constant 0 : i32
    %234 = tpu.memref_slice %arg3[%c2_i32_138, %c0_i32_139] : memref<32x640xf32, #tpu.memory_space<vmem>> -> memref<1x640xf32, #tpu.memory_space<vmem>>
    %235 = tpu.memref_slice %arg4[%c2_i32_136] : memref<32x!tpu.dma_semaphore, #tpu.memory_space<semaphore_mem>> -> memref<1x!tpu.dma_semaphore, #tpu.memory_space<semaphore_mem>>
    %236 = tpu.memref_squeeze %235 : memref<1x!tpu.dma_semaphore, #tpu.memory_space<semaphore_mem>> -> memref<!tpu.dma_semaphore, #tpu.memory_space<semaphore_mem>>
    tpu.wait_dma2 semaphore(%236 : memref<!tpu.dma_semaphore, #tpu.memory_space<semaphore_mem>>) src(%233 : memref<1x640xf32, #tpu.memory_space<any>>) dst(%234 : memref<1x640xf32, #tpu.memory_space<vmem>>)
    %c3_i32_140 = arith.constant 3 : i32
    %c0_i32_141 = arith.constant 0 : i32
    %237 = tpu.memref_slice %arg2[%24, %c0_i32_141] : memref<512x640xf32, #tpu.memory_space<any>> -> memref<1x640xf32, #tpu.memory_space<any>>
    %c3_i32_142 = arith.constant 3 : i32
    %c0_i32_143 = arith.constant 0 : i32
    %238 = tpu.memref_slice %arg3[%c3_i32_142, %c0_i32_143] : memref<32x640xf32, #tpu.memory_space<vmem>> -> memref<1x640xf32, #tpu.memory_space<vmem>>
    %239 = tpu.memref_slice %arg4[%c3_i32_140] : memref<32x!tpu.dma_semaphore, #tpu.memory_space<semaphore_mem>> -> memref<1x!tpu.dma_semaphore, #tpu.memory_space<semaphore_mem>>
    %240 = tpu.memref_squeeze %239 : memref<1x!tpu.dma_semaphore, #tpu.memory_space<semaphore_mem>> -> memref<!tpu.dma_semaphore, #tpu.memory_space<semaphore_mem>>
    tpu.wait_dma2 semaphore(%240 : memref<!tpu.dma_semaphore, #tpu.memory_space<semaphore_mem>>) src(%237 : memref<1x640xf32, #tpu.memory_space<any>>) dst(%238 : memref<1x640xf32, #tpu.memory_space<vmem>>)
    %c4_i32_144 = arith.constant 4 : i32
    %c0_i32_145 = arith.constant 0 : i32
    %241 = tpu.memref_slice %arg2[%31, %c0_i32_145] : memref<512x640xf32, #tpu.memory_space<any>> -> memref<1x640xf32, #tpu.memory_space<any>>
    %c4_i32_146 = arith.constant 4 : i32
    %c0_i32_147 = arith.constant 0 : i32
    %242 = tpu.memref_slice %arg3[%c4_i32_146, %c0_i32_147] : memref<32x640xf32, #tpu.memory_space<vmem>> -> memref<1x640xf32, #tpu.memory_space<vmem>>
    %243 = tpu.memref_slice %arg4[%c4_i32_144] : memref<32x!tpu.dma_semaphore, #tpu.memory_space<semaphore_mem>> -> memref<1x!tpu.dma_semaphore, #tpu.memory_space<semaphore_mem>>
    %244 = tpu.memref_squeeze %243 : memref<1x!tpu.dma_semaphore, #tpu.memory_space<semaphore_mem>> -> memref<!tpu.dma_semaphore, #tpu.memory_space<semaphore_mem>>
    tpu.wait_dma2 semaphore(%244 : memref<!tpu.dma_semaphore, #tpu.memory_space<semaphore_mem>>) src(%241 : memref<1x640xf32, #tpu.memory_space<any>>) dst(%242 : memref<1x640xf32, #tpu.memory_space<vmem>>)
    %c5_i32_148 = arith.constant 5 : i32
    %c0_i32_149 = arith.constant 0 : i32
    %245 = tpu.memref_slice %arg2[%38, %c0_i32_149] : memref<512x640xf32, #tpu.memory_space<any>> -> memref<1x640xf32, #tpu.memory_space<any>>
    %c5_i32_150 = arith.constant 5 : i32
    %c0_i32_151 = arith.constant 0 : i32
    %246 = tpu.memref_slice %arg3[%c5_i32_150, %c0_i32_151] : memref<32x640xf32, #tpu.memory_space<vmem>> -> memref<1x640xf32, #tpu.memory_space<vmem>>
    %247 = tpu.memref_slice %arg4[%c5_i32_148] : memref<32x!tpu.dma_semaphore, #tpu.memory_space<semaphore_mem>> -> memref<1x!tpu.dma_semaphore, #tpu.memory_space<semaphore_mem>>
    %248 = tpu.memref_squeeze %247 : memref<1x!tpu.dma_semaphore, #tpu.memory_space<semaphore_mem>> -> memref<!tpu.dma_semaphore, #tpu.memory_space<semaphore_mem>>
    tpu.wait_dma2 semaphore(%248 : memref<!tpu.dma_semaphore, #tpu.memory_space<semaphore_mem>>) src(%245 : memref<1x640xf32, #tpu.memory_space<any>>) dst(%246 : memref<1x640xf32, #tpu.memory_space<vmem>>)
    %c6_i32_152 = arith.constant 6 : i32
    %c0_i32_153 = arith.constant 0 : i32
    %249 = tpu.memref_slice %arg2[%45, %c0_i32_153] : memref<512x640xf32, #tpu.memory_space<any>> -> memref<1x640xf32, #tpu.memory_space<any>>
    %c6_i32_154 = arith.constant 6 : i32
    %c0_i32_155 = arith.constant 0 : i32
    %250 = tpu.memref_slice %arg3[%c6_i32_154, %c0_i32_155] : memref<32x640xf32, #tpu.memory_space<vmem>> -> memref<1x640xf32, #tpu.memory_space<vmem>>
    %251 = tpu.memref_slice %arg4[%c6_i32_152] : memref<32x!tpu.dma_semaphore, #tpu.memory_space<semaphore_mem>> -> memref<1x!tpu.dma_semaphore, #tpu.memory_space<semaphore_mem>>
    %252 = tpu.memref_squeeze %251 : memref<1x!tpu.dma_semaphore, #tpu.memory_space<semaphore_mem>> -> memref<!tpu.dma_semaphore, #tpu.memory_space<semaphore_mem>>
    tpu.wait_dma2 semaphore(%252 : memref<!tpu.dma_semaphore, #tpu.memory_space<semaphore_mem>>) src(%249 : memref<1x640xf32, #tpu.memory_space<any>>) dst(%250 : memref<1x640xf32, #tpu.memory_space<vmem>>)
    %c7_i32_156 = arith.constant 7 : i32
    %c0_i32_157 = arith.constant 0 : i32
    %253 = tpu.memref_slice %arg2[%52, %c0_i32_157] : memref<512x640xf32, #tpu.memory_space<any>> -> memref<1x640xf32, #tpu.memory_space<any>>
    %c7_i32_158 = arith.constant 7 : i32
    %c0_i32_159 = arith.constant 0 : i32
    %254 = tpu.memref_slice %arg3[%c7_i32_158, %c0_i32_159] : memref<32x640xf32, #tpu.memory_space<vmem>> -> memref<1x640xf32, #tpu.memory_space<vmem>>
    %255 = tpu.memref_slice %arg4[%c7_i32_156] : memref<32x!tpu.dma_semaphore, #tpu.memory_space<semaphore_mem>> -> memref<1x!tpu.dma_semaphore, #tpu.memory_space<semaphore_mem>>
    %256 = tpu.memref_squeeze %255 : memref<1x!tpu.dma_semaphore, #tpu.memory_space<semaphore_mem>> -> memref<!tpu.dma_semaphore, #tpu.memory_space<semaphore_mem>>
    tpu.wait_dma2 semaphore(%256 : memref<!tpu.dma_semaphore, #tpu.memory_space<semaphore_mem>>) src(%253 : memref<1x640xf32, #tpu.memory_space<any>>) dst(%254 : memref<1x640xf32, #tpu.memory_space<vmem>>)
    %c8_i32_160 = arith.constant 8 : i32
    %c0_i32_161 = arith.constant 0 : i32
    %257 = tpu.memref_slice %arg2[%59, %c0_i32_161] : memref<512x640xf32, #tpu.memory_space<any>> -> memref<1x640xf32, #tpu.memory_space<any>>
    %c8_i32_162 = arith.constant 8 : i32
    %c0_i32_163 = arith.constant 0 : i32
    %258 = tpu.memref_slice %arg3[%c8_i32_162, %c0_i32_163] : memref<32x640xf32, #tpu.memory_space<vmem>> -> memref<1x640xf32, #tpu.memory_space<vmem>>
    %259 = tpu.memref_slice %arg4[%c8_i32_160] : memref<32x!tpu.dma_semaphore, #tpu.memory_space<semaphore_mem>> -> memref<1x!tpu.dma_semaphore, #tpu.memory_space<semaphore_mem>>
    %260 = tpu.memref_squeeze %259 : memref<1x!tpu.dma_semaphore, #tpu.memory_space<semaphore_mem>> -> memref<!tpu.dma_semaphore, #tpu.memory_space<semaphore_mem>>
    tpu.wait_dma2 semaphore(%260 : memref<!tpu.dma_semaphore, #tpu.memory_space<semaphore_mem>>) src(%257 : memref<1x640xf32, #tpu.memory_space<any>>) dst(%258 : memref<1x640xf32, #tpu.memory_space<vmem>>)
    %c9_i32_164 = arith.constant 9 : i32
    %c0_i32_165 = arith.constant 0 : i32
    %261 = tpu.memref_slice %arg2[%66, %c0_i32_165] : memref<512x640xf32, #tpu.memory_space<any>> -> memref<1x640xf32, #tpu.memory_space<any>>
    %c9_i32_166 = arith.constant 9 : i32
    %c0_i32_167 = arith.constant 0 : i32
    %262 = tpu.memref_slice %arg3[%c9_i32_166, %c0_i32_167] : memref<32x640xf32, #tpu.memory_space<vmem>> -> memref<1x640xf32, #tpu.memory_space<vmem>>
    %263 = tpu.memref_slice %arg4[%c9_i32_164] : memref<32x!tpu.dma_semaphore, #tpu.memory_space<semaphore_mem>> -> memref<1x!tpu.dma_semaphore, #tpu.memory_space<semaphore_mem>>
    %264 = tpu.memref_squeeze %263 : memref<1x!tpu.dma_semaphore, #tpu.memory_space<semaphore_mem>> -> memref<!tpu.dma_semaphore, #tpu.memory_space<semaphore_mem>>
    tpu.wait_dma2 semaphore(%264 : memref<!tpu.dma_semaphore, #tpu.memory_space<semaphore_mem>>) src(%261 : memref<1x640xf32, #tpu.memory_space<any>>) dst(%262 : memref<1x640xf32, #tpu.memory_space<vmem>>)
    %c10_i32_168 = arith.constant 10 : i32
    %c0_i32_169 = arith.constant 0 : i32
    %265 = tpu.memref_slice %arg2[%73, %c0_i32_169] : memref<512x640xf32, #tpu.memory_space<any>> -> memref<1x640xf32, #tpu.memory_space<any>>
    %c10_i32_170 = arith.constant 10 : i32
    %c0_i32_171 = arith.constant 0 : i32
    %266 = tpu.memref_slice %arg3[%c10_i32_170, %c0_i32_171] : memref<32x640xf32, #tpu.memory_space<vmem>> -> memref<1x640xf32, #tpu.memory_space<vmem>>
    %267 = tpu.memref_slice %arg4[%c10_i32_168] : memref<32x!tpu.dma_semaphore, #tpu.memory_space<semaphore_mem>> -> memref<1x!tpu.dma_semaphore, #tpu.memory_space<semaphore_mem>>
    %268 = tpu.memref_squeeze %267 : memref<1x!tpu.dma_semaphore, #tpu.memory_space<semaphore_mem>> -> memref<!tpu.dma_semaphore, #tpu.memory_space<semaphore_mem>>
    tpu.wait_dma2 semaphore(%268 : memref<!tpu.dma_semaphore, #tpu.memory_space<semaphore_mem>>) src(%265 : memref<1x640xf32, #tpu.memory_space<any>>) dst(%266 : memref<1x640xf32, #tpu.memory_space<vmem>>)
    %c11_i32_172 = arith.constant 11 : i32
    %c0_i32_173 = arith.constant 0 : i32
    %269 = tpu.memref_slice %arg2[%80, %c0_i32_173] : memref<512x640xf32, #tpu.memory_space<any>> -> memref<1x640xf32, #tpu.memory_space<any>>
    %c11_i32_174 = arith.constant 11 : i32
    %c0_i32_175 = arith.constant 0 : i32
    %270 = tpu.memref_slice %arg3[%c11_i32_174, %c0_i32_175] : memref<32x640xf32, #tpu.memory_space<vmem>> -> memref<1x640xf32, #tpu.memory_space<vmem>>
    %271 = tpu.memref_slice %arg4[%c11_i32_172] : memref<32x!tpu.dma_semaphore, #tpu.memory_space<semaphore_mem>> -> memref<1x!tpu.dma_semaphore, #tpu.memory_space<semaphore_mem>>
    %272 = tpu.memref_squeeze %271 : memref<1x!tpu.dma_semaphore, #tpu.memory_space<semaphore_mem>> -> memref<!tpu.dma_semaphore, #tpu.memory_space<semaphore_mem>>
    tpu.wait_dma2 semaphore(%272 : memref<!tpu.dma_semaphore, #tpu.memory_space<semaphore_mem>>) src(%269 : memref<1x640xf32, #tpu.memory_space<any>>) dst(%270 : memref<1x640xf32, #tpu.memory_space<vmem>>)
    %c12_i32_176 = arith.constant 12 : i32
    %c0_i32_177 = arith.constant 0 : i32
    %273 = tpu.memref_slice %arg2[%87, %c0_i32_177] : memref<512x640xf32, #tpu.memory_space<any>> -> memref<1x640xf32, #tpu.memory_space<any>>
    %c12_i32_178 = arith.constant 12 : i32
    %c0_i32_179 = arith.constant 0 : i32
    %274 = tpu.memref_slice %arg3[%c12_i32_178, %c0_i32_179] : memref<32x640xf32, #tpu.memory_space<vmem>> -> memref<1x640xf32, #tpu.memory_space<vmem>>
    %275 = tpu.memref_slice %arg4[%c12_i32_176] : memref<32x!tpu.dma_semaphore, #tpu.memory_space<semaphore_mem>> -> memref<1x!tpu.dma_semaphore, #tpu.memory_space<semaphore_mem>>
    %276 = tpu.memref_squeeze %275 : memref<1x!tpu.dma_semaphore, #tpu.memory_space<semaphore_mem>> -> memref<!tpu.dma_semaphore, #tpu.memory_space<semaphore_mem>>
    tpu.wait_dma2 semaphore(%276 : memref<!tpu.dma_semaphore, #tpu.memory_space<semaphore_mem>>) src(%273 : memref<1x640xf32, #tpu.memory_space<any>>) dst(%274 : memref<1x640xf32, #tpu.memory_space<vmem>>)
    %c13_i32_180 = arith.constant 13 : i32
    %c0_i32_181 = arith.constant 0 : i32
    %277 = tpu.memref_slice %arg2[%94, %c0_i32_181] : memref<512x640xf32, #tpu.memory_space<any>> -> memref<1x640xf32, #tpu.memory_space<any>>
    %c13_i32_182 = arith.constant 13 : i32
    %c0_i32_183 = arith.constant 0 : i32
    %278 = tpu.memref_slice %arg3[%c13_i32_182, %c0_i32_183] : memref<32x640xf32, #tpu.memory_space<vmem>> -> memref<1x640xf32, #tpu.memory_space<vmem>>
    %279 = tpu.memref_slice %arg4[%c13_i32_180] : memref<32x!tpu.dma_semaphore, #tpu.memory_space<semaphore_mem>> -> memref<1x!tpu.dma_semaphore, #tpu.memory_space<semaphore_mem>>
    %280 = tpu.memref_squeeze %279 : memref<1x!tpu.dma_semaphore, #tpu.memory_space<semaphore_mem>> -> memref<!tpu.dma_semaphore, #tpu.memory_space<semaphore_mem>>
    tpu.wait_dma2 semaphore(%280 : memref<!tpu.dma_semaphore, #tpu.memory_space<semaphore_mem>>) src(%277 : memref<1x640xf32, #tpu.memory_space<any>>) dst(%278 : memref<1x640xf32, #tpu.memory_space<vmem>>)
    %c14_i32_184 = arith.constant 14 : i32
    %c0_i32_185 = arith.constant 0 : i32
    %281 = tpu.memref_slice %arg2[%101, %c0_i32_185] : memref<512x640xf32, #tpu.memory_space<any>> -> memref<1x640xf32, #tpu.memory_space<any>>
    %c14_i32_186 = arith.constant 14 : i32
    %c0_i32_187 = arith.constant 0 : i32
    %282 = tpu.memref_slice %arg3[%c14_i32_186, %c0_i32_187] : memref<32x640xf32, #tpu.memory_space<vmem>> -> memref<1x640xf32, #tpu.memory_space<vmem>>
    %283 = tpu.memref_slice %arg4[%c14_i32_184] : memref<32x!tpu.dma_semaphore, #tpu.memory_space<semaphore_mem>> -> memref<1x!tpu.dma_semaphore, #tpu.memory_space<semaphore_mem>>
    %284 = tpu.memref_squeeze %283 : memref<1x!tpu.dma_semaphore, #tpu.memory_space<semaphore_mem>> -> memref<!tpu.dma_semaphore, #tpu.memory_space<semaphore_mem>>
    tpu.wait_dma2 semaphore(%284 : memref<!tpu.dma_semaphore, #tpu.memory_space<semaphore_mem>>) src(%281 : memref<1x640xf32, #tpu.memory_space<any>>) dst(%282 : memref<1x640xf32, #tpu.memory_space<vmem>>)
    %c15_i32_188 = arith.constant 15 : i32
    %c0_i32_189 = arith.constant 0 : i32
    %285 = tpu.memref_slice %arg2[%108, %c0_i32_189] : memref<512x640xf32, #tpu.memory_space<any>> -> memref<1x640xf32, #tpu.memory_space<any>>
    %c15_i32_190 = arith.constant 15 : i32
    %c0_i32_191 = arith.constant 0 : i32
    %286 = tpu.memref_slice %arg3[%c15_i32_190, %c0_i32_191] : memref<32x640xf32, #tpu.memory_space<vmem>> -> memref<1x640xf32, #tpu.memory_space<vmem>>
    %287 = tpu.memref_slice %arg4[%c15_i32_188] : memref<32x!tpu.dma_semaphore, #tpu.memory_space<semaphore_mem>> -> memref<1x!tpu.dma_semaphore, #tpu.memory_space<semaphore_mem>>
    %288 = tpu.memref_squeeze %287 : memref<1x!tpu.dma_semaphore, #tpu.memory_space<semaphore_mem>> -> memref<!tpu.dma_semaphore, #tpu.memory_space<semaphore_mem>>
    tpu.wait_dma2 semaphore(%288 : memref<!tpu.dma_semaphore, #tpu.memory_space<semaphore_mem>>) src(%285 : memref<1x640xf32, #tpu.memory_space<any>>) dst(%286 : memref<1x640xf32, #tpu.memory_space<vmem>>)
    %c16_i32_192 = arith.constant 16 : i32
    %c0_i32_193 = arith.constant 0 : i32
    %289 = tpu.memref_slice %arg2[%115, %c0_i32_193] : memref<512x640xf32, #tpu.memory_space<any>> -> memref<1x640xf32, #tpu.memory_space<any>>
    %c16_i32_194 = arith.constant 16 : i32
    %c0_i32_195 = arith.constant 0 : i32
    %290 = tpu.memref_slice %arg3[%c16_i32_194, %c0_i32_195] : memref<32x640xf32, #tpu.memory_space<vmem>> -> memref<1x640xf32, #tpu.memory_space<vmem>>
    %291 = tpu.memref_slice %arg4[%c16_i32_192] : memref<32x!tpu.dma_semaphore, #tpu.memory_space<semaphore_mem>> -> memref<1x!tpu.dma_semaphore, #tpu.memory_space<semaphore_mem>>
    %292 = tpu.memref_squeeze %291 : memref<1x!tpu.dma_semaphore, #tpu.memory_space<semaphore_mem>> -> memref<!tpu.dma_semaphore, #tpu.memory_space<semaphore_mem>>
    tpu.wait_dma2 semaphore(%292 : memref<!tpu.dma_semaphore, #tpu.memory_space<semaphore_mem>>) src(%289 : memref<1x640xf32, #tpu.memory_space<any>>) dst(%290 : memref<1x640xf32, #tpu.memory_space<vmem>>)
    %c17_i32_196 = arith.constant 17 : i32
    %c0_i32_197 = arith.constant 0 : i32
    %293 = tpu.memref_slice %arg2[%122, %c0_i32_197] : memref<512x640xf32, #tpu.memory_space<any>> -> memref<1x640xf32, #tpu.memory_space<any>>
    %c17_i32_198 = arith.constant 17 : i32
    %c0_i32_199 = arith.constant 0 : i32
    %294 = tpu.memref_slice %arg3[%c17_i32_198, %c0_i32_199] : memref<32x640xf32, #tpu.memory_space<vmem>> -> memref<1x640xf32, #tpu.memory_space<vmem>>
    %295 = tpu.memref_slice %arg4[%c17_i32_196] : memref<32x!tpu.dma_semaphore, #tpu.memory_space<semaphore_mem>> -> memref<1x!tpu.dma_semaphore, #tpu.memory_space<semaphore_mem>>
    %296 = tpu.memref_squeeze %295 : memref<1x!tpu.dma_semaphore, #tpu.memory_space<semaphore_mem>> -> memref<!tpu.dma_semaphore, #tpu.memory_space<semaphore_mem>>
    tpu.wait_dma2 semaphore(%296 : memref<!tpu.dma_semaphore, #tpu.memory_space<semaphore_mem>>) src(%293 : memref<1x640xf32, #tpu.memory_space<any>>) dst(%294 : memref<1x640xf32, #tpu.memory_space<vmem>>)
    %c18_i32_200 = arith.constant 18 : i32
    %c0_i32_201 = arith.constant 0 : i32
    %297 = tpu.memref_slice %arg2[%129, %c0_i32_201] : memref<512x640xf32, #tpu.memory_space<any>> -> memref<1x640xf32, #tpu.memory_space<any>>
    %c18_i32_202 = arith.constant 18 : i32
    %c0_i32_203 = arith.constant 0 : i32
    %298 = tpu.memref_slice %arg3[%c18_i32_202, %c0_i32_203] : memref<32x640xf32, #tpu.memory_space<vmem>> -> memref<1x640xf32, #tpu.memory_space<vmem>>
    %299 = tpu.memref_slice %arg4[%c18_i32_200] : memref<32x!tpu.dma_semaphore, #tpu.memory_space<semaphore_mem>> -> memref<1x!tpu.dma_semaphore, #tpu.memory_space<semaphore_mem>>
    %300 = tpu.memref_squeeze %299 : memref<1x!tpu.dma_semaphore, #tpu.memory_space<semaphore_mem>> -> memref<!tpu.dma_semaphore, #tpu.memory_space<semaphore_mem>>
    tpu.wait_dma2 semaphore(%300 : memref<!tpu.dma_semaphore, #tpu.memory_space<semaphore_mem>>) src(%297 : memref<1x640xf32, #tpu.memory_space<any>>) dst(%298 : memref<1x640xf32, #tpu.memory_space<vmem>>)
    %c19_i32_204 = arith.constant 19 : i32
    %c0_i32_205 = arith.constant 0 : i32
    %301 = tpu.memref_slice %arg2[%136, %c0_i32_205] : memref<512x640xf32, #tpu.memory_space<any>> -> memref<1x640xf32, #tpu.memory_space<any>>
    %c19_i32_206 = arith.constant 19 : i32
    %c0_i32_207 = arith.constant 0 : i32
    %302 = tpu.memref_slice %arg3[%c19_i32_206, %c0_i32_207] : memref<32x640xf32, #tpu.memory_space<vmem>> -> memref<1x640xf32, #tpu.memory_space<vmem>>
    %303 = tpu.memref_slice %arg4[%c19_i32_204] : memref<32x!tpu.dma_semaphore, #tpu.memory_space<semaphore_mem>> -> memref<1x!tpu.dma_semaphore, #tpu.memory_space<semaphore_mem>>
    %304 = tpu.memref_squeeze %303 : memref<1x!tpu.dma_semaphore, #tpu.memory_space<semaphore_mem>> -> memref<!tpu.dma_semaphore, #tpu.memory_space<semaphore_mem>>
    tpu.wait_dma2 semaphore(%304 : memref<!tpu.dma_semaphore, #tpu.memory_space<semaphore_mem>>) src(%301 : memref<1x640xf32, #tpu.memory_space<any>>) dst(%302 : memref<1x640xf32, #tpu.memory_space<vmem>>)
    %c20_i32_208 = arith.constant 20 : i32
    %c0_i32_209 = arith.constant 0 : i32
    %305 = tpu.memref_slice %arg2[%143, %c0_i32_209] : memref<512x640xf32, #tpu.memory_space<any>> -> memref<1x640xf32, #tpu.memory_space<any>>
    %c20_i32_210 = arith.constant 20 : i32
    %c0_i32_211 = arith.constant 0 : i32
    %306 = tpu.memref_slice %arg3[%c20_i32_210, %c0_i32_211] : memref<32x640xf32, #tpu.memory_space<vmem>> -> memref<1x640xf32, #tpu.memory_space<vmem>>
    %307 = tpu.memref_slice %arg4[%c20_i32_208] : memref<32x!tpu.dma_semaphore, #tpu.memory_space<semaphore_mem>> -> memref<1x!tpu.dma_semaphore, #tpu.memory_space<semaphore_mem>>
    %308 = tpu.memref_squeeze %307 : memref<1x!tpu.dma_semaphore, #tpu.memory_space<semaphore_mem>> -> memref<!tpu.dma_semaphore, #tpu.memory_space<semaphore_mem>>
    tpu.wait_dma2 semaphore(%308 : memref<!tpu.dma_semaphore, #tpu.memory_space<semaphore_mem>>) src(%305 : memref<1x640xf32, #tpu.memory_space<any>>) dst(%306 : memref<1x640xf32, #tpu.memory_space<vmem>>)
    %c21_i32_212 = arith.constant 21 : i32
    %c0_i32_213 = arith.constant 0 : i32
    %309 = tpu.memref_slice %arg2[%150, %c0_i32_213] : memref<512x640xf32, #tpu.memory_space<any>> -> memref<1x640xf32, #tpu.memory_space<any>>
    %c21_i32_214 = arith.constant 21 : i32
    %c0_i32_215 = arith.constant 0 : i32
    %310 = tpu.memref_slice %arg3[%c21_i32_214, %c0_i32_215] : memref<32x640xf32, #tpu.memory_space<vmem>> -> memref<1x640xf32, #tpu.memory_space<vmem>>
    %311 = tpu.memref_slice %arg4[%c21_i32_212] : memref<32x!tpu.dma_semaphore, #tpu.memory_space<semaphore_mem>> -> memref<1x!tpu.dma_semaphore, #tpu.memory_space<semaphore_mem>>
    %312 = tpu.memref_squeeze %311 : memref<1x!tpu.dma_semaphore, #tpu.memory_space<semaphore_mem>> -> memref<!tpu.dma_semaphore, #tpu.memory_space<semaphore_mem>>
    tpu.wait_dma2 semaphore(%312 : memref<!tpu.dma_semaphore, #tpu.memory_space<semaphore_mem>>) src(%309 : memref<1x640xf32, #tpu.memory_space<any>>) dst(%310 : memref<1x640xf32, #tpu.memory_space<vmem>>)
    %c22_i32_216 = arith.constant 22 : i32
    %c0_i32_217 = arith.constant 0 : i32
    %313 = tpu.memref_slice %arg2[%157, %c0_i32_217] : memref<512x640xf32, #tpu.memory_space<any>> -> memref<1x640xf32, #tpu.memory_space<any>>
    %c22_i32_218 = arith.constant 22 : i32
    %c0_i32_219 = arith.constant 0 : i32
    %314 = tpu.memref_slice %arg3[%c22_i32_218, %c0_i32_219] : memref<32x640xf32, #tpu.memory_space<vmem>> -> memref<1x640xf32, #tpu.memory_space<vmem>>
    %315 = tpu.memref_slice %arg4[%c22_i32_216] : memref<32x!tpu.dma_semaphore, #tpu.memory_space<semaphore_mem>> -> memref<1x!tpu.dma_semaphore, #tpu.memory_space<semaphore_mem>>
    %316 = tpu.memref_squeeze %315 : memref<1x!tpu.dma_semaphore, #tpu.memory_space<semaphore_mem>> -> memref<!tpu.dma_semaphore, #tpu.memory_space<semaphore_mem>>
    tpu.wait_dma2 semaphore(%316 : memref<!tpu.dma_semaphore, #tpu.memory_space<semaphore_mem>>) src(%313 : memref<1x640xf32, #tpu.memory_space<any>>) dst(%314 : memref<1x640xf32, #tpu.memory_space<vmem>>)
    %c23_i32_220 = arith.constant 23 : i32
    %c0_i32_221 = arith.constant 0 : i32
    %317 = tpu.memref_slice %arg2[%164, %c0_i32_221] : memref<512x640xf32, #tpu.memory_space<any>> -> memref<1x640xf32, #tpu.memory_space<any>>
    %c23_i32_222 = arith.constant 23 : i32
    %c0_i32_223 = arith.constant 0 : i32
    %318 = tpu.memref_slice %arg3[%c23_i32_222, %c0_i32_223] : memref<32x640xf32, #tpu.memory_space<vmem>> -> memref<1x640xf32, #tpu.memory_space<vmem>>
    %319 = tpu.memref_slice %arg4[%c23_i32_220] : memref<32x!tpu.dma_semaphore, #tpu.memory_space<semaphore_mem>> -> memref<1x!tpu.dma_semaphore, #tpu.memory_space<semaphore_mem>>
    %320 = tpu.memref_squeeze %319 : memref<1x!tpu.dma_semaphore, #tpu.memory_space<semaphore_mem>> -> memref<!tpu.dma_semaphore, #tpu.memory_space<semaphore_mem>>
    tpu.wait_dma2 semaphore(%320 : memref<!tpu.dma_semaphore, #tpu.memory_space<semaphore_mem>>) src(%317 : memref<1x640xf32, #tpu.memory_space<any>>) dst(%318 : memref<1x640xf32, #tpu.memory_space<vmem>>)
    %c24_i32_224 = arith.constant 24 : i32
    %c0_i32_225 = arith.constant 0 : i32
    %321 = tpu.memref_slice %arg2[%171, %c0_i32_225] : memref<512x640xf32, #tpu.memory_space<any>> -> memref<1x640xf32, #tpu.memory_space<any>>
    %c24_i32_226 = arith.constant 24 : i32
    %c0_i32_227 = arith.constant 0 : i32
    %322 = tpu.memref_slice %arg3[%c24_i32_226, %c0_i32_227] : memref<32x640xf32, #tpu.memory_space<vmem>> -> memref<1x640xf32, #tpu.memory_space<vmem>>
    %323 = tpu.memref_slice %arg4[%c24_i32_224] : memref<32x!tpu.dma_semaphore, #tpu.memory_space<semaphore_mem>> -> memref<1x!tpu.dma_semaphore, #tpu.memory_space<semaphore_mem>>
    %324 = tpu.memref_squeeze %323 : memref<1x!tpu.dma_semaphore, #tpu.memory_space<semaphore_mem>> -> memref<!tpu.dma_semaphore, #tpu.memory_space<semaphore_mem>>
    tpu.wait_dma2 semaphore(%324 : memref<!tpu.dma_semaphore, #tpu.memory_space<semaphore_mem>>) src(%321 : memref<1x640xf32, #tpu.memory_space<any>>) dst(%322 : memref<1x640xf32, #tpu.memory_space<vmem>>)
    %c25_i32_228 = arith.constant 25 : i32
    %c0_i32_229 = arith.constant 0 : i32
    %325 = tpu.memref_slice %arg2[%178, %c0_i32_229] : memref<512x640xf32, #tpu.memory_space<any>> -> memref<1x640xf32, #tpu.memory_space<any>>
    %c25_i32_230 = arith.constant 25 : i32
    %c0_i32_231 = arith.constant 0 : i32
    %326 = tpu.memref_slice %arg3[%c25_i32_230, %c0_i32_231] : memref<32x640xf32, #tpu.memory_space<vmem>> -> memref<1x640xf32, #tpu.memory_space<vmem>>
    %327 = tpu.memref_slice %arg4[%c25_i32_228] : memref<32x!tpu.dma_semaphore, #tpu.memory_space<semaphore_mem>> -> memref<1x!tpu.dma_semaphore, #tpu.memory_space<semaphore_mem>>
    %328 = tpu.memref_squeeze %327 : memref<1x!tpu.dma_semaphore, #tpu.memory_space<semaphore_mem>> -> memref<!tpu.dma_semaphore, #tpu.memory_space<semaphore_mem>>
    tpu.wait_dma2 semaphore(%328 : memref<!tpu.dma_semaphore, #tpu.memory_space<semaphore_mem>>) src(%325 : memref<1x640xf32, #tpu.memory_space<any>>) dst(%326 : memref<1x640xf32, #tpu.memory_space<vmem>>)
    %c26_i32_232 = arith.constant 26 : i32
    %c0_i32_233 = arith.constant 0 : i32
    %329 = tpu.memref_slice %arg2[%185, %c0_i32_233] : memref<512x640xf32, #tpu.memory_space<any>> -> memref<1x640xf32, #tpu.memory_space<any>>
    %c26_i32_234 = arith.constant 26 : i32
    %c0_i32_235 = arith.constant 0 : i32
    %330 = tpu.memref_slice %arg3[%c26_i32_234, %c0_i32_235] : memref<32x640xf32, #tpu.memory_space<vmem>> -> memref<1x640xf32, #tpu.memory_space<vmem>>
    %331 = tpu.memref_slice %arg4[%c26_i32_232] : memref<32x!tpu.dma_semaphore, #tpu.memory_space<semaphore_mem>> -> memref<1x!tpu.dma_semaphore, #tpu.memory_space<semaphore_mem>>
    %332 = tpu.memref_squeeze %331 : memref<1x!tpu.dma_semaphore, #tpu.memory_space<semaphore_mem>> -> memref<!tpu.dma_semaphore, #tpu.memory_space<semaphore_mem>>
    tpu.wait_dma2 semaphore(%332 : memref<!tpu.dma_semaphore, #tpu.memory_space<semaphore_mem>>) src(%329 : memref<1x640xf32, #tpu.memory_space<any>>) dst(%330 : memref<1x640xf32, #tpu.memory_space<vmem>>)
    %c27_i32_236 = arith.constant 27 : i32
    %c0_i32_237 = arith.constant 0 : i32
    %333 = tpu.memref_slice %arg2[%192, %c0_i32_237] : memref<512x640xf32, #tpu.memory_space<any>> -> memref<1x640xf32, #tpu.memory_space<any>>
    %c27_i32_238 = arith.constant 27 : i32
    %c0_i32_239 = arith.constant 0 : i32
    %334 = tpu.memref_slice %arg3[%c27_i32_238, %c0_i32_239] : memref<32x640xf32, #tpu.memory_space<vmem>> -> memref<1x640xf32, #tpu.memory_space<vmem>>
    %335 = tpu.memref_slice %arg4[%c27_i32_236] : memref<32x!tpu.dma_semaphore, #tpu.memory_space<semaphore_mem>> -> memref<1x!tpu.dma_semaphore, #tpu.memory_space<semaphore_mem>>
    %336 = tpu.memref_squeeze %335 : memref<1x!tpu.dma_semaphore, #tpu.memory_space<semaphore_mem>> -> memref<!tpu.dma_semaphore, #tpu.memory_space<semaphore_mem>>
    tpu.wait_dma2 semaphore(%336 : memref<!tpu.dma_semaphore, #tpu.memory_space<semaphore_mem>>) src(%333 : memref<1x640xf32, #tpu.memory_space<any>>) dst(%334 : memref<1x640xf32, #tpu.memory_space<vmem>>)
    %c28_i32_240 = arith.constant 28 : i32
    %c0_i32_241 = arith.constant 0 : i32
    %337 = tpu.memref_slice %arg2[%199, %c0_i32_241] : memref<512x640xf32, #tpu.memory_space<any>> -> memref<1x640xf32, #tpu.memory_space<any>>
    %c28_i32_242 = arith.constant 28 : i32
    %c0_i32_243 = arith.constant 0 : i32
    %338 = tpu.memref_slice %arg3[%c28_i32_242, %c0_i32_243] : memref<32x640xf32, #tpu.memory_space<vmem>> -> memref<1x640xf32, #tpu.memory_space<vmem>>
    %339 = tpu.memref_slice %arg4[%c28_i32_240] : memref<32x!tpu.dma_semaphore, #tpu.memory_space<semaphore_mem>> -> memref<1x!tpu.dma_semaphore, #tpu.memory_space<semaphore_mem>>
    %340 = tpu.memref_squeeze %339 : memref<1x!tpu.dma_semaphore, #tpu.memory_space<semaphore_mem>> -> memref<!tpu.dma_semaphore, #tpu.memory_space<semaphore_mem>>
    tpu.wait_dma2 semaphore(%340 : memref<!tpu.dma_semaphore, #tpu.memory_space<semaphore_mem>>) src(%337 : memref<1x640xf32, #tpu.memory_space<any>>) dst(%338 : memref<1x640xf32, #tpu.memory_space<vmem>>)
    %c29_i32_244 = arith.constant 29 : i32
    %c0_i32_245 = arith.constant 0 : i32
    %341 = tpu.memref_slice %arg2[%206, %c0_i32_245] : memref<512x640xf32, #tpu.memory_space<any>> -> memref<1x640xf32, #tpu.memory_space<any>>
    %c29_i32_246 = arith.constant 29 : i32
    %c0_i32_247 = arith.constant 0 : i32
    %342 = tpu.memref_slice %arg3[%c29_i32_246, %c0_i32_247] : memref<32x640xf32, #tpu.memory_space<vmem>> -> memref<1x640xf32, #tpu.memory_space<vmem>>
    %343 = tpu.memref_slice %arg4[%c29_i32_244] : memref<32x!tpu.dma_semaphore, #tpu.memory_space<semaphore_mem>> -> memref<1x!tpu.dma_semaphore, #tpu.memory_space<semaphore_mem>>
    %344 = tpu.memref_squeeze %343 : memref<1x!tpu.dma_semaphore, #tpu.memory_space<semaphore_mem>> -> memref<!tpu.dma_semaphore, #tpu.memory_space<semaphore_mem>>
    tpu.wait_dma2 semaphore(%344 : memref<!tpu.dma_semaphore, #tpu.memory_space<semaphore_mem>>) src(%341 : memref<1x640xf32, #tpu.memory_space<any>>) dst(%342 : memref<1x640xf32, #tpu.memory_space<vmem>>)
    %c30_i32_248 = arith.constant 30 : i32
    %c0_i32_249 = arith.constant 0 : i32
    %345 = tpu.memref_slice %arg2[%213, %c0_i32_249] : memref<512x640xf32, #tpu.memory_space<any>> -> memref<1x640xf32, #tpu.memory_space<any>>
    %c30_i32_250 = arith.constant 30 : i32
    %c0_i32_251 = arith.constant 0 : i32
    %346 = tpu.memref_slice %arg3[%c30_i32_250, %c0_i32_251] : memref<32x640xf32, #tpu.memory_space<vmem>> -> memref<1x640xf32, #tpu.memory_space<vmem>>
    %347 = tpu.memref_slice %arg4[%c30_i32_248] : memref<32x!tpu.dma_semaphore, #tpu.memory_space<semaphore_mem>> -> memref<1x!tpu.dma_semaphore, #tpu.memory_space<semaphore_mem>>
    %348 = tpu.memref_squeeze %347 : memref<1x!tpu.dma_semaphore, #tpu.memory_space<semaphore_mem>> -> memref<!tpu.dma_semaphore, #tpu.memory_space<semaphore_mem>>
    tpu.wait_dma2 semaphore(%348 : memref<!tpu.dma_semaphore, #tpu.memory_space<semaphore_mem>>) src(%345 : memref<1x640xf32, #tpu.memory_space<any>>) dst(%346 : memref<1x640xf32, #tpu.memory_space<vmem>>)
    %c31_i32_252 = arith.constant 31 : i32
    %c0_i32_253 = arith.constant 0 : i32
    %349 = tpu.memref_slice %arg2[%220, %c0_i32_253] : memref<512x640xf32, #tpu.memory_space<any>> -> memref<1x640xf32, #tpu.memory_space<any>>
    %c31_i32_254 = arith.constant 31 : i32
    %c0_i32_255 = arith.constant 0 : i32
    %350 = tpu.memref_slice %arg3[%c31_i32_254, %c0_i32_255] : memref<32x640xf32, #tpu.memory_space<vmem>> -> memref<1x640xf32, #tpu.memory_space<vmem>>
    %351 = tpu.memref_slice %arg4[%c31_i32_252] : memref<32x!tpu.dma_semaphore, #tpu.memory_space<semaphore_mem>> -> memref<1x!tpu.dma_semaphore, #tpu.memory_space<semaphore_mem>>
    %352 = tpu.memref_squeeze %351 : memref<1x!tpu.dma_semaphore, #tpu.memory_space<semaphore_mem>> -> memref<!tpu.dma_semaphore, #tpu.memory_space<semaphore_mem>>
    tpu.wait_dma2 semaphore(%352 : memref<!tpu.dma_semaphore, #tpu.memory_space<semaphore_mem>>) src(%349 : memref<1x640xf32, #tpu.memory_space<any>>) dst(%350 : memref<1x640xf32, #tpu.memory_space<vmem>>)
    return
  }
  func.func @transform_1(%arg0: i32, %arg1: memref<128xi32, #tpu.memory_space<smem>>) -> (i32, i32) {
    %c0_i32 = arith.constant 0 : i32
    %c0_i32_0 = arith.constant 0 : i32
    return %arg0, %c0_i32 : i32, i32
  }
}

</mosaic_0001>

<bundles_post_ra>
// kernel: flair_embed.1
= control target key start
LH: loop header
LB: loop body
LE: loop exit
PB: predicated region body
PF: predicated region fallthrough
CT: control target
= control target key end

     0   :  { %s2870_s0 = inlined_call_operand.vmem [shape: s32[128], index: 0, kind: input, shape index: {}]   ;;  %s2871_s1 = inlined_call_operand.hbm [shape: f32[512,640], index: 1, kind: input, shape index: {}]   ;;  %s2872_s2 = inlined_call_operand.hbm [shape: f32[128,640], index: 2, kind: output, shape index: {}]  }
   0x1   :  { %2889 = sst [smem:[#allocation80_spill]] %s2872_s2  ;;  %s7_s11 = sshll.u32 %s2870_s0, 4  ;;  %s8_s11 = int_to_ptr.vmem [resolvable:$true] %s7_s11 }
   0x2   :  { %s1121_s12 = scalar_lea.vmem %s8_s11, 16  ;;  %p1126_p1 = scmp.lt.s32.totalorder %s8_s11, %s8_s11 }
   0x3   :  { %p1122_p0 = scmp.ne.s32.totalorder %s8_s11, %s1121_s12  ;;  %p1127_p2 = scmp.lt.s32.totalorder %s1121_s12, %s1121_s12 }
   0x5   :  { %p1128_p3 = por %p1127_p2, %p1126_p1 }
   0x7   :  { %p1129_p4 = pnand %p1128_p3, %p1122_p0 }
   0x9   :  { %1132 = shalt.err (!%p1129_p4)  }
   0xa   :  { %s2023_s13 = smov [#allocation4]  }
   0xb   :  { %10 = dma.vmem_to_smem %s8_s11, 16, %s2023_s13, [#allocation3] }
   0xc   :  { %1941 = dma.done.wait [#allocation3], 16 }
   0xd   :  { %1942 = vsyncadd [#allocation3], 4294967280 }
   0xe   :  { %12 = sfence }
   0xf   :  { %13 = vsyncpa [#allocation6], 0 }
  0x10   :  { %15 = vsyncpa [#allocation6 + $0x1], 0  ;;  %s2047_s14 = smov 0   ;;  %s2049_s15 = smov 0  }
  0x11   :  { %s2051_s0 = smov 0  }
  0x12 LB: > { %2890 = sst [smem:[#allocation73_spill]] %s2013_s14  ;;  %s1010_s16 = sadd.s32 4294967295, %s2021_s0   ;;  %s2021_s0 = sphi %s2051_s0, %s2909_s0   ;;  %s2017_s15 = sphi %s2049_s15, %s2911_s15   ;;  %s2013_s14 = sphi %s2047_s14, %s2910_s14  }
  0x13   : > { %2891 = sst [smem:[#allocation74_spill]] %s2017_s15  ;;  %s2064_s17 = sadd.s32 1, %s2021_s0  }
  0x14   : > { %2892 = sst [smem:[#allocation75_spill]] %s2064_s17  ;;  %s24_s18 = ssub.s32 %s2021_s0, %s2064_s17 }
  0x15   : > { %s27_s19 = sadd.s32 1, %s2017_s15  ;;  %p25_p5 = scmp.eq.s32.totalorder %s24_s18, 0 }
  0x16   : > { %p1011_p6 = scmp.ne.s32.totalorder %s24_s18, 0  ;;  %p31_p7 = scmp.eq.s32.totalorder %s2021_s0, 3 }
  0x17   : > { %p36_p8 = scmp.ne.s32.totalorder %s2017_s15, %s2013_s14  ;;  %p37_p10 = scmp.eq.s32.totalorder %s1010_s16, 3 }
  0x18   : > { %s2073_s20 = scalar_select %p25_p5, %s2017_s15, %s27_s19  }
  0x19   : > { %p2075_p9 = por %p1011_p6, %p31_p7  ;;  %p2079_p11 = por %p37_p10, %p36_p8 }
  0x1a   : > { %2893 = sst [smem:[#allocation76_spill]] %s2073_s20  ;;  %p1012_p12 = scmp.ge.s32.totalorder %s2021_s0, 4 }
  0x1b   : > { %s2894_s21 = scalar_select %p2075_p9, 1, 0 }
  0x1c   : > { %s2896_s22 = scalar_select %p2079_p11, 1, 0 }
  0x1d   : > { %2895 = sst [smem:[#allocation77_spill]] %s2894_s21  ;;  %46 = sbr.rel (%p1012_p12) target bundleno = 923 (0x39b), region = 12 }
  0x1e   : > { %2897 = sst [smem:[#allocation78_spill]] %s2896_s22 }
  0x24   : > { %s2873_s23 = sand.u32 1, %s2017_s15   ;;  %s2086_s24 = sshll.u32 %s2021_s0, 5 }
  0x25   : > { %s1083_s25 = smul.u32 160, %s2873_s23  ;;  %s56_s26 = sld [smem:[#allocation4 + %s2086_s24]] }
  0x26   : > { %s68_s27 = sadd.s32 1, %s2086_s24  ;;  %s83_s5 = sadd.s32 2, %s2086_s24 }
  0x27   : > { %s2092_s28 = scalar_lea.vmem [#allocation5], %s1083_s25  ;;  %s2095_s30 = sld [smem:[#allocation4 + %s68_s27]] }
  0x28   : > { %s64_s29 = sshll.u32 %s2092_s28, 4  ;;  %s76_s3 = scalar_lea.vmem %s2092_s28, 1 [#allocation5]  ;;  %s2097_s29 = int_to_ptr.vmem [resolvable:$true] %s64_s29 }
  0x29   : > { %2898 = sst [smem:[#allocation79_spill]] %s2097_s29  ;;  %s79_s4 = sshll.u32 %s76_s3, 4  ;;  %s2101_s4 = int_to_ptr.vmem [resolvable:$true] %s79_s4 }
  0x2a   : > { %s2103_s9 = sld [smem:[#allocation4 + %s83_s5]]  ;;  %s91_s10 = scalar_lea.vmem %s2092_s28, 2 [#allocation5] }
  0x2b   : > { %s57_s6 = sshrl.u32 %s56_s26, 3  ;;  %s58_s7 = sand.u32 7, %s56_s26  }
  0x2c   : > { %s59_s8 = smul.u32 40, %s57_s6  ;;  %s2114_s26 = scalar_lea.hbm %s2871_s1, 40960 }
  0x2d   : > { %s70_s12 = sshrl.u32 %s2095_s30, 3  ;;  %s71_s16 = sand.u32 7, %s2095_s30  }
  0x2e   : > { %s60_s11 = sadd.s32 %s59_s8, %s58_s7  ;;  %s72_s27 = smul.u32 40, %s70_s12 }
  0x2f   : > { %s1014_s13 = sshll.u32 %s60_s11, 4 }
  0x30   : > { %s62_s25 = scalar_lea.hbm %s2871_s1, %s1014_s13 }
  0x31   : > { %s1133_s23 = scalar_lea.hbm %s62_s25, 80  ;;  %p1136_p0 = scmp.lt.u32.totalorder %s62_s25, %s2871_s1 }
  0x32   : > { %p1134_p13 = scmp.ne.s32.totalorder %s62_s25, %s1133_s23  ;;  %p1137_p1 = scmp.lt.u32.totalorder %s2114_s26, %s1133_s23 }
  0x33   : > { %p1139_p3 = scmp.lt.u32.totalorder %s1133_s23, %s62_s25 }
  0x34   : > { %p1138_p2 = por %p1137_p1, %p1136_p0 }
  0x36   : > { %p1140_p4 = por %p1139_p3, %p1138_p2 }
  0x38   : > { %p1141_p5 = pnand %p1140_p4, %p1134_p13 }
  0x3a   : > { %1144 = shalt.err (!%p1141_p5)  }
  0x3b   : > { %s1145_s7 = scalar_lea.vmem %s2097_s29, 80  ;;  %s2024_s20 = smov [#allocation5]  }
  0x3c   : > { %p1146_p6 = scmp.ne.s32.totalorder %s2097_s29, %s1145_s7  ;;  %s1147_s8 = sshll.u32 %s2024_s20, 4  ;;  %s2122_s8 = int_to_ptr.vmem [resolvable:$false] %s1147_s8 }
  0x3d   : > { %s2125_s11 = scalar_lea.vmem %s2122_s8, 5120  ;;  %p2878_p7 = scmp.lt.s32.totalorder %s2097_s29, %s2122_s8 }
  0x3e   : > { %p1151_p8 = scmp.lt.s32.totalorder %s2125_s11, %s1145_s7 }
  0x40   : > { %p1152_p10 = por %p1151_p8, %p2878_p7 }
  0x42   : > { %p1153_p12 = pnand %p1152_p10, %p1146_p6 }
  0x44   : > { %1156 = shalt.err (!%p1153_p12)  }
  0x45   : > { %s2879_s23 = smov 128   ;;  %s2881_s12 = smov 1  }
  0x46   : > { %67 = dma.hbm_to_vmem [thread:$0]  %s62_s25, 80, %s2097_s29, [#allocation2], %s2879_s23, %s2879_s23, %s2881_s12 }
  0x47   : > { %s73_s13 = sadd.s32 %s72_s27, %s71_s16  ;;  %s94_s18 = sshll.u32 %s91_s10, 4  ;;  %s95_s18 = int_to_ptr.vmem [resolvable:$true] %s94_s18 }
  0x48   : > { %s1015_s19 = sshll.u32 %s73_s13, 4  ;;  %s85_s3 = sshrl.u32 %s2103_s9, 3 }
  0x49   : > { %s75_s7 = scalar_lea.hbm %s2871_s1, %s1015_s19  ;;  %s86_s20 = sand.u32 7, %s2103_s9  }
  0x4a   : > { %s1157_s17 = scalar_lea.hbm %s75_s7, 80  ;;  %p1160_p0 = scmp.lt.u32.totalorder %s75_s7, %s2871_s1 }
  0x4b   : > { %p1158_p13 = scmp.ne.s32.totalorder %s75_s7, %s1157_s17  ;;  %p1161_p1 = scmp.lt.u32.totalorder %s2114_s26, %s1157_s17 }
  0x4c   : > { %p1163_p3 = scmp.lt.u32.totalorder %s1157_s17, %s75_s7 }
  0x4d   : > { %p1162_p2 = por %p1161_p1, %p1160_p0 }
  0x4f   : > { %p1164_p4 = por %p1163_p3, %p1162_p2 }
  0x51   : > { %p1165_p5 = pnand %p1164_p4, %p1158_p13 }
  0x53   : > { %1168 = shalt.err (!%p1165_p5)  }
  0x54   : > { %s1169_s30 = scalar_lea.vmem %s2101_s4, 80  ;;  %p1174_p8 = scmp.lt.s32.totalorder %s2101_s4, %s2122_s8 }
  0x55   : > { %p1170_p6 = scmp.ne.s32.totalorder %s2101_s4, %s1169_s30  ;;  %p1175_p10 = scmp.lt.s32.totalorder %s2125_s11, %s1169_s30 }
  0x57   : > { %p1176_p12 = por %p1175_p10, %p1174_p8 }
  0x59   : > { %p1177_p7 = pnand %p1176_p12, %p1170_p6 }
  0x5b   : > { %1180 = shalt.err (!%p1177_p7)  }
  0x5c   : > { %82 = dma.hbm_to_vmem [thread:$0]  %s75_s7, 80, %s2101_s4, [#allocation2 + $0x1], %s2879_s23, %s2879_s23, %s2881_s12 }
  0x5d   : > { %s87_s14 = smul.u32 40, %s85_s3  ;;  %s98_s17 = sadd.s32 3, %s2086_s24 }
  0x5e   : > { %s106_s22 = scalar_lea.vmem %s2092_s28, 3 [#allocation5]  ;;  %s2161_s10 = sld [smem:[#allocation4 + %s98_s17]] }
  0x5f   : > { %s88_s9 = sadd.s32 %s87_s14, %s86_s20  ;;  %s109_s25 = sshll.u32 %s106_s22, 4  ;;  %s2166_s25 = int_to_ptr.vmem [resolvable:$true] %s109_s25 }
  0x60   : > { %s1016_s16 = sshll.u32 %s88_s9, 4 }
  0x61   : > { %s90_s19 = scalar_lea.hbm %s2871_s1, %s1016_s16 }
  0x62   : > { %s1181_s6 = scalar_lea.hbm %s90_s19, 80  ;;  %p1184_p13 = scmp.lt.u32.totalorder %s90_s19, %s2871_s1 }
  0x63   : > { %p1182_p7 = scmp.ne.s32.totalorder %s90_s19, %s1181_s6  ;;  %p1185_p0 = scmp.lt.u32.totalorder %s2114_s26, %s1181_s6 }
  0x64   : > { %p1187_p2 = scmp.lt.u32.totalorder %s1181_s6, %s90_s19 }
  0x65   : > { %p1186_p1 = por %p1185_p0, %p1184_p13 }
  0x67   : > { %p1188_p3 = por %p1187_p2, %p1186_p1 }
  0x69   : > { %p1189_p4 = pnand %p1188_p3, %p1182_p7 }
  0x6b   : > { %1192 = shalt.err (!%p1189_p4)  }
  0x6c   : > { %s1193_s4 = scalar_lea.vmem %s95_s18, 80  ;;  %p1198_p6 = scmp.lt.s32.totalorder %s95_s18, %s2122_s8 }
  0x6d   : > { %p1194_p5 = scmp.ne.s32.totalorder %s95_s18, %s1193_s4  ;;  %p1199_p8 = scmp.lt.s32.totalorder %s2125_s11, %s1193_s4 }
  0x6f   : > { %p1200_p10 = por %p1199_p8, %p1198_p6 }
  0x71   : > { %p1201_p12 = pnand %p1200_p10, %p1194_p5 }
  0x73   : > { %1204 = shalt.err (!%p1201_p12)  }
  0x74   : > { %97 = dma.hbm_to_vmem [thread:$0]  %s90_s19, 80, %s95_s18, [#allocation2 + $0x2], %s2879_s23, %s2879_s23, %s2881_s12 }
  0x75   : > { %s113_s3 = sadd.s32 4, %s2086_s24  ;;  %s121_s7 = scalar_lea.vmem %s2092_s28, 4 [#allocation5] }
  0x76   : > { %s2179_s20 = sld [smem:[#allocation4 + %s113_s3]]  ;;  %s124_s14 = sshll.u32 %s121_s7, 4  ;;  %s2183_s14 = int_to_ptr.vmem [resolvable:$true] %s124_s14 }
  0x77   : > { %s100_s17 = sshrl.u32 %s2161_s10, 3  ;;  %s101_s22 = sand.u32 7, %s2161_s10  }
  0x78   : > { %s102_s9 = smul.u32 40, %s100_s17  ;;  %s128_s16 = sadd.s32 5, %s2086_s24 }
  0x79   : > { %s136_s27 = scalar_lea.vmem %s2092_s28, 5 [#allocation5]  ;;  %s2187_s6 = sld [smem:[#allocation4 + %s128_s16]] }
  0x7a   : > { %s103_s13 = sadd.s32 %s102_s9, %s101_s22  ;;  %s139_s30 = sshll.u32 %s136_s27, 4  ;;  %s2207_s30 = int_to_ptr.vmem [resolvable:$true] %s139_s30 }
  0x7b   : > { %s1017_s5 = sshll.u32 %s103_s13, 4 }
  0x7c   : > { %s105_s4 = scalar_lea.hbm %s2871_s1, %s1017_s5  ;;  %s115_s3 = sshrl.u32 %s2179_s20, 3 }
  0x7d   : > { %s1205_s23 = scalar_lea.hbm %s105_s4, 80  ;;  %p1208_p13 = scmp.lt.u32.totalorder %s105_s4, %s2871_s1 }
  0x7e   : > { %p1206_p7 = scmp.ne.s32.totalorder %s105_s4, %s1205_s23  ;;  %p1209_p0 = scmp.lt.u32.totalorder %s2114_s26, %s1205_s23 }
  0x7f   : > { %p1211_p2 = scmp.lt.u32.totalorder %s1205_s23, %s105_s4 }
  0x80   : > { %p1210_p1 = por %p1209_p0, %p1208_p13 }
  0x82   : > { %p1212_p3 = por %p1211_p2, %p1210_p1 }
  0x84   : > { %p1213_p4 = pnand %p1212_p3, %p1206_p7 }
  0x86   : > { %1216 = shalt.err (!%p1213_p4)  }
  0x87   : > { %s1217_s10 = scalar_lea.vmem %s2166_s25, 80  ;;  %p1222_p6 = scmp.lt.s32.totalorder %s2166_s25, %s2122_s8 }
  0x88   : > { %p1218_p5 = scmp.ne.s32.totalorder %s2166_s25, %s1217_s10  ;;  %p1223_p8 = scmp.lt.s32.totalorder %s2125_s11, %s1217_s10 }
  0x8a   : > { %p1224_p10 = por %p1223_p8, %p1222_p6 }
  0x8c   : > { %p1225_p12 = pnand %p1224_p10, %p1218_p5 }
  0x8e   : > { %1228 = shalt.err (!%p1225_p12)  }
  0x8f   : > { %s2899_s12 = smov 1   ;;  %s2900_s17 = smov 128  }
  0x90   : > { %112 = dma.hbm_to_vmem [thread:$0]  %s105_s4, 80, %s2166_s25, [#allocation2 + $0x3], %s2900_s17, %s2900_s17, %s2899_s12 }
  0x91   : > { %s116_s23 = sand.u32 7, %s2179_s20   ;;  %s117_s22 = smul.u32 40, %s115_s3 }
  0x92   : > { %s143_s9 = sadd.s32 6, %s2086_s24  ;;  %s130_s27 = sshrl.u32 %s2187_s6, 3 }
  0x93   : > { %s118_s16 = sadd.s32 %s117_s22, %s116_s23  ;;  %s131_s5 = sand.u32 7, %s2187_s6  }
  0x94   : > { %s1018_s13 = sshll.u32 %s118_s16, 4  ;;  %s132_s10 = smul.u32 40, %s130_s27 }
  0x95   : > { %s120_s7 = scalar_lea.hbm %s2871_s1, %s1018_s13 }
  0x96   : > { %s1229_s2 = scalar_lea.hbm %s120_s7, 80  ;;  %p1232_p13 = scmp.lt.u32.totalorder %s120_s7, %s2871_s1 }
  0x97   : > { %p1230_p7 = scmp.ne.s32.totalorder %s120_s7, %s1229_s2  ;;  %p1233_p0 = scmp.lt.u32.totalorder %s2114_s26, %s1229_s2 }
  0x98   : > { %p1235_p2 = scmp.lt.u32.totalorder %s1229_s2, %s120_s7 }
  0x99   : > { %p1234_p1 = por %p1233_p0, %p1232_p13 }
  0x9b   : > { %p1236_p3 = por %p1235_p2, %p1234_p1 }
  0x9d   : > { %p1237_p4 = pnand %p1236_p3, %p1230_p7 }
  0x9f   : > { %1240 = shalt.err (!%p1237_p4)  }
  0xa0   : > { %s1241_s25 = scalar_lea.vmem %s2183_s14, 80  ;;  %p1246_p6 = scmp.lt.s32.totalorder %s2183_s14, %s2122_s8 }
  0xa1   : > { %p1242_p5 = scmp.ne.s32.totalorder %s2183_s14, %s1241_s25  ;;  %p1247_p8 = scmp.lt.s32.totalorder %s2125_s11, %s1241_s25 }
  0xa3   : > { %p1248_p10 = por %p1247_p8, %p1246_p6 }
  0xa5   : > { %p1249_p12 = pnand %p1248_p10, %p1242_p5 }
  0xa7   : > { %1252 = shalt.err (!%p1249_p12)  }
  0xa8   : > { %127 = dma.hbm_to_vmem [thread:$0]  %s120_s7, 80, %s2183_s14, [#allocation2 + $0x4], %s2900_s17, %s2900_s17, %s2899_s12 }
  0xa9   : > { %s133_s2 = sadd.s32 %s132_s10, %s131_s5  ;;  %s2228_s21 = sld [smem:[#allocation4 + %s143_s9]] }
  0xaa   : > { %s1019_s29 = sshll.u32 %s133_s2, 4  ;;  %s151_s20 = scalar_lea.vmem %s2092_s28, 6 [#allocation5] }
  0xab   : > { %s135_s3 = scalar_lea.hbm %s2871_s1, %s1019_s29  ;;  %s154_s23 = sshll.u32 %s151_s20, 4  ;;  %s2247_s23 = int_to_ptr.vmem [resolvable:$true] %s154_s23 }
  0xac   : > { %s1253_s22 = scalar_lea.hbm %s135_s3, 80  ;;  %p1256_p13 = scmp.lt.u32.totalorder %s135_s3, %s2871_s1 }
  0xad   : > { %p1254_p7 = scmp.ne.s32.totalorder %s135_s3, %s1253_s22  ;;  %p1257_p0 = scmp.lt.u32.totalorder %s2114_s26, %s1253_s22 }
  0xae   : > { %p1259_p2 = scmp.lt.u32.totalorder %s1253_s22, %s135_s3 }
  0xaf   : > { %p1258_p1 = por %p1257_p0, %p1256_p13 }
  0xb1   : > { %p1260_p3 = por %p1259_p2, %p1258_p1 }
  0xb3   : > { %p1261_p4 = pnand %p1260_p3, %p1254_p7 }
  0xb5   : > { %1264 = shalt.err (!%p1261_p4)  }
  0xb6   : > { %s1265_s14 = scalar_lea.vmem %s2207_s30, 80  ;;  %p1270_p6 = scmp.lt.s32.totalorder %s2207_s30, %s2122_s8 }
  0xb7   : > { %p1266_p5 = scmp.ne.s32.totalorder %s2207_s30, %s1265_s14  ;;  %p1271_p8 = scmp.lt.s32.totalorder %s2125_s11, %s1265_s14 }
  0xb9   : > { %p1272_p10 = por %p1271_p8, %p1270_p6 }
  0xbb   : > { %p1273_p12 = pnand %p1272_p10, %p1266_p5 }
  0xbd   : > { %1276 = shalt.err (!%p1273_p12)  }
  0xbe   : > { %142 = dma.hbm_to_vmem [thread:$0]  %s135_s3, 80, %s2207_s30, [#allocation2 + $0x5], %s2900_s17, %s2900_s17, %s2899_s12 }
  0xbf   : > { %s158_s9 = sadd.s32 7, %s2086_s24  ;;  %s166_s5 = scalar_lea.vmem %s2092_s28, 7 [#allocation5] }
  0xc0   : > { %s2250_s13 = sld [smem:[#allocation4 + %s158_s9]]  ;;  %s145_s18 = sshrl.u32 %s2228_s21, 3 }
  0xc1   : > { %s146_s19 = sand.u32 7, %s2228_s21   ;;  %s147_s7 = smul.u32 40, %s145_s18 }
  0xc2   : > { %s169_s10 = sshll.u32 %s166_s5, 4  ;;  %s173_s25 = sadd.s32 8, %s2086_s24  ;;  %s2255_s10 = int_to_ptr.vmem [resolvable:$true] %s169_s10 }
  0xc3   : > { %s148_s2 = sadd.s32 %s147_s7, %s146_s19  ;;  %s2258_s29 = sld [smem:[#allocation4 + %s173_s25]] }
  0xc4   : > { %s1020_s20 = sshll.u32 %s148_s2, 4  ;;  %s181_s30 = scalar_lea.vmem %s2092_s28, 40 [#allocation5] }
  0xc5   : > { %s150_s3 = scalar_lea.hbm %s2871_s1, %s1020_s20 }
  0xc6   : > { %s160_s22 = sshrl.u32 %s2250_s13, 3  ;;  %s1277_s16 = scalar_lea.hbm %s150_s3, 80 }
  0xc7   : > { %p1278_p7 = scmp.ne.s32.totalorder %s150_s3, %s1277_s16  ;;  %p1280_p13 = scmp.lt.u32.totalorder %s150_s3, %s2871_s1 }
  0xc8   : > { %p1281_p0 = scmp.lt.u32.totalorder %s2114_s26, %s1277_s16  ;;  %p1283_p2 = scmp.lt.u32.totalorder %s1277_s16, %s150_s3 }
  0xca   : > { %p1282_p1 = por %p1281_p0, %p1280_p13 }
  0xcc   : > { %p1284_p3 = por %p1283_p2, %p1282_p1 }
  0xce   : > { %p1285_p4 = pnand %p1284_p3, %p1278_p7 }
  0xd0   : > { %1288 = shalt.err (!%p1285_p4)  }
  0xd1   : > { %s1289_s21 = scalar_lea.vmem %s2247_s23, 80  ;;  %p1294_p6 = scmp.lt.s32.totalorder %s2247_s23, %s2122_s8 }
  0xd2   : > { %p1290_p5 = scmp.ne.s32.totalorder %s2247_s23, %s1289_s21  ;;  %p1295_p8 = scmp.lt.s32.totalorder %s2125_s11, %s1289_s21 }
  0xd4   : > { %p1296_p10 = por %p1295_p8, %p1294_p6 }
  0xd6   : > { %p1297_p12 = pnand %p1296_p10, %p1290_p5 }
  0xd8   : > { %1300 = shalt.err (!%p1297_p12)  }
  0xd9   : > { %157 = dma.hbm_to_vmem [thread:$0]  %s150_s3, 80, %s2247_s23, [#allocation2 + $0x6], %s2900_s17, %s2900_s17, %s2899_s12 }
  0xda   : > { %s161_s9 = sand.u32 7, %s2250_s13   ;;  %s162_s5 = smul.u32 40, %s160_s22 }
  0xdb   : > { %s184_s18 = sshll.u32 %s181_s30, 4  ;;  %s188_s19 = sadd.s32 9, %s2086_s24  ;;  %s185_s18 = int_to_ptr.vmem [resolvable:$true] %s184_s18 }
  0xdc   : > { %s163_s7 = sadd.s32 %s162_s5, %s161_s9  ;;  %s175_s25 = sshrl.u32 %s2258_s29, 3 }
  0xdd   : > { %s1021_s2 = sshll.u32 %s163_s7, 4  ;;  %s176_s20 = sand.u32 7, %s2258_s29  }
  0xde   : > { %s165_s16 = scalar_lea.hbm %s2871_s1, %s1021_s2  ;;  %s177_s27 = smul.u32 40, %s175_s25 }
  0xdf   : > { %s1301_s14 = scalar_lea.hbm %s165_s16, 80  ;;  %p1304_p13 = scmp.lt.u32.totalorder %s165_s16, %s2871_s1 }
  0xe0   : > { %p1302_p7 = scmp.ne.s32.totalorder %s165_s16, %s1301_s14  ;;  %p1305_p0 = scmp.lt.u32.totalorder %s2114_s26, %s1301_s14 }
  0xe1   : > { %p1307_p2 = scmp.lt.u32.totalorder %s1301_s14, %s165_s16 }
  0xe2   : > { %p1306_p1 = por %p1305_p0, %p1304_p13 }
  0xe4   : > { %p1308_p3 = por %p1307_p2, %p1306_p1 }
  0xe6   : > { %p1309_p4 = pnand %p1308_p3, %p1302_p7 }
  0xe8   : > { %1312 = shalt.err (!%p1309_p4)  }
  0xe9   : > { %s1313_s23 = scalar_lea.vmem %s2255_s10, 80  ;;  %p1318_p6 = scmp.lt.s32.totalorder %s2255_s10, %s2122_s8 }
  0xea   : > { %p1314_p5 = scmp.ne.s32.totalorder %s2255_s10, %s1313_s23  ;;  %p1319_p8 = scmp.lt.s32.totalorder %s2125_s11, %s1313_s23 }
  0xec   : > { %p1320_p10 = por %p1319_p8, %p1318_p6 }
  0xee   : > { %p1321_p12 = pnand %p1320_p10, %p1314_p5 }
  0xf0   : > { %1324 = shalt.err (!%p1321_p12)  }
  0xf1   : > { %172 = dma.hbm_to_vmem [thread:$0]  %s165_s16, 80, %s2255_s10, [#allocation2 + $0x7], %s2900_s17, %s2900_s17, %s2899_s12 }
  0xf2   : > { %s178_s15 = sadd.s32 %s177_s27, %s176_s20  ;;  %s2298_s29 = sld [smem:[#allocation4 + %s188_s19]] }
  0xf3   : > { %s1022_s13 = sshll.u32 %s178_s15, 4  ;;  %s196_s9 = scalar_lea.vmem %s2092_s28, 41 [#allocation5] }
  0xf4   : > { %s180_s22 = scalar_lea.hbm %s2871_s1, %s1022_s13 }
  0xf5   : > { %s1325_s5 = scalar_lea.hbm %s180_s22, 80  ;;  %p1328_p13 = scmp.lt.u32.totalorder %s180_s22, %s2871_s1 }
  0xf6   : > { %p1326_p7 = scmp.ne.s32.totalorder %s180_s22, %s1325_s5  ;;  %p1329_p0 = scmp.lt.u32.totalorder %s2114_s26, %s1325_s5 }
  0xf7   : > { %p1331_p2 = scmp.lt.u32.totalorder %s1325_s5, %s180_s22 }
  0xf8   : > { %p1330_p1 = por %p1329_p0, %p1328_p13 }
  0xfa   : > { %p1332_p3 = por %p1331_p2, %p1330_p1 }
  0xfc   : > { %p1333_p4 = pnand %p1332_p3, %p1326_p7 }
  0xfe   : > { %1336 = shalt.err (!%p1333_p4)  }
  0xff   : > { %s1337_s10 = scalar_lea.vmem %s185_s18, 80  ;;  %p1342_p6 = scmp.lt.s32.totalorder %s185_s18, %s2122_s8 }
 0x100   : > { %p1338_p5 = scmp.ne.s32.totalorder %s185_s18, %s1337_s10  ;;  %p1343_p8 = scmp.lt.s32.totalorder %s2125_s11, %s1337_s10 }
 0x102   : > { %p1344_p10 = por %p1343_p8, %p1342_p6 }
 0x104   : > { %p1345_p12 = pnand %p1344_p10, %p1338_p5 }
 0x106   : > { %1348 = shalt.err (!%p1345_p12)  }
 0x107   : > { %187 = dma.hbm_to_vmem [thread:$0]  %s180_s22, 80, %s185_s18, [#allocation2 + $0x8], %s2900_s17, %s2900_s17, %s2899_s12 }
 0x108   : > { %s199_s19 = sshll.u32 %s196_s9, 4  ;;  %s203_s2 = sadd.s32 10, %s2086_s24  ;;  %s2314_s19 = int_to_ptr.vmem [resolvable:$true] %s199_s19 }
 0x109   : > { %s2316_s20 = sld [smem:[#allocation4 + %s203_s2]]  ;;  %s211_s6 = scalar_lea.vmem %s2092_s28, 42 [#allocation5] }
 0x10a   : > { %s218_s4 = sadd.s32 11, %s2086_s24  ;;  %s190_s16 = sshrl.u32 %s2298_s29, 3 }
 0x10b   : > { %s191_s27 = sand.u32 7, %s2298_s29   ;;  %s192_s14 = smul.u32 40, %s190_s16 }
 0x10c   : > { %s214_s21 = sshll.u32 %s211_s6, 4  ;;  %s2324_s23 = sld [smem:[#allocation4 + %s218_s4]]  ;;  %s2322_s21 = int_to_ptr.vmem [resolvable:$true] %s214_s21 }
 0x10d   : > { %s193_s18 = sadd.s32 %s192_s14, %s191_s27  ;;  %s226_s15 = scalar_lea.vmem %s2092_s28, 43 [#allocation5] }
 0x10e   : > { %s1023_s13 = sshll.u32 %s193_s18, 4 }
 0x10f   : > { %s205_s30 = sshrl.u32 %s2316_s20, 3  ;;  %s195_s9 = scalar_lea.hbm %s2871_s1, %s1023_s13 }
 0x110   : > { %s206_s5 = sand.u32 7, %s2316_s20   ;;  %s1349_s7 = scalar_lea.hbm %s195_s9, 80 }
 0x111   : > { %p1350_p7 = scmp.ne.s32.totalorder %s195_s9, %s1349_s7  ;;  %p1352_p13 = scmp.lt.u32.totalorder %s195_s9, %s2871_s1 }
 0x112   : > { %p1353_p0 = scmp.lt.u32.totalorder %s2114_s26, %s1349_s7  ;;  %p1355_p2 = scmp.lt.u32.totalorder %s1349_s7, %s195_s9 }
 0x114   : > { %p1354_p1 = por %p1353_p0, %p1352_p13 }
 0x116   : > { %p1356_p3 = por %p1355_p2, %p1354_p1 }
 0x118   : > { %p1357_p4 = pnand %p1356_p3, %p1350_p7 }
 0x11a   : > { %1360 = shalt.err (!%p1357_p4)  }
 0x11b   : > { %s1361_s29 = scalar_lea.vmem %s2314_s19, 80  ;;  %p1366_p6 = scmp.lt.s32.totalorder %s2314_s19, %s2122_s8 }
 0x11c   : > { %p1362_p5 = scmp.ne.s32.totalorder %s2314_s19, %s1361_s29  ;;  %p1367_p8 = scmp.lt.s32.totalorder %s2125_s11, %s1361_s29 }
 0x11e   : > { %p1368_p10 = por %p1367_p8, %p1366_p6 }
 0x120   : > { %p1369_p12 = pnand %p1368_p10, %p1362_p5 }
 0x122   : > { %1372 = shalt.err (!%p1369_p12)  }
 0x123   : > { %202 = dma.hbm_to_vmem [thread:$0]  %s195_s9, 80, %s2314_s19, [#allocation2 + $0x9], %s2900_s17, %s2900_s17, %s2899_s12 }
 0x124   : > { %s207_s2 = smul.u32 40, %s205_s30  ;;  %s229_s20 = sshll.u32 %s226_s15, 4  ;;  %s2347_s20 = int_to_ptr.vmem [resolvable:$true] %s229_s20 }
 0x125   : > { %s220_s6 = sshrl.u32 %s2324_s23, 3  ;;  %s221_s4 = sand.u32 7, %s2324_s23  }
 0x126   : > { %s208_s16 = sadd.s32 %s207_s2, %s206_s5  ;;  %s222_s27 = smul.u32 40, %s220_s6 }
 0x127   : > { %s1024_s14 = sshll.u32 %s208_s16, 4 }
 0x128   : > { %s210_s3 = scalar_lea.hbm %s2871_s1, %s1024_s14  ;;  %s223_s22 = sadd.s32 %s222_s27, %s221_s4 }
 0x129   : > { %s1373_s7 = scalar_lea.hbm %s210_s3, 80  ;;  %p1376_p13 = scmp.lt.u32.totalorder %s210_s3, %s2871_s1 }
 0x12a   : > { %p1374_p7 = scmp.ne.s32.totalorder %s210_s3, %s1373_s7  ;;  %p1377_p0 = scmp.lt.u32.totalorder %s2114_s26, %s1373_s7 }
 0x12b   : > { %p1379_p2 = scmp.lt.u32.totalorder %s1373_s7, %s210_s3 }
 0x12c   : > { %p1378_p1 = por %p1377_p0, %p1376_p13 }
 0x12e   : > { %p1380_p3 = por %p1379_p2, %p1378_p1 }
 0x130   : > { %p1381_p4 = pnand %p1380_p3, %p1374_p7 }
 0x132   : > { %1384 = shalt.err (!%p1381_p4)  }
 0x133   : > { %s1385_s19 = scalar_lea.vmem %s2322_s21, 80  ;;  %p1390_p6 = scmp.lt.s32.totalorder %s2322_s21, %s2122_s8 }
 0x134   : > { %p1386_p5 = scmp.ne.s32.totalorder %s2322_s21, %s1385_s19  ;;  %p1391_p8 = scmp.lt.s32.totalorder %s2125_s11, %s1385_s19 }
 0x136   : > { %p1392_p10 = por %p1391_p8, %p1390_p6 }
 0x138   : > { %p1393_p12 = pnand %p1392_p10, %p1386_p5 }
 0x13a   : > { %1396 = shalt.err (!%p1393_p12)  }
 0x13b   : > { %217 = dma.hbm_to_vmem [thread:$0]  %s210_s3, 80, %s2322_s21, [#allocation2 + $0xa], %s2900_s17, %s2900_s17, %s2899_s12 }
 0x13c   : > { %s1025_s23 = sshll.u32 %s223_s22, 4  ;;  %s233_s15 = sadd.s32 12, %s2086_s24 }
 0x13d   : > { %s225_s5 = scalar_lea.hbm %s2871_s1, %s1025_s23  ;;  %s2369_s29 = sld [smem:[#allocation4 + %s233_s15]] }
 0x13e   : > { %s1397_s2 = scalar_lea.hbm %s225_s5, 80  ;;  %p1400_p13 = scmp.lt.u32.totalorder %s225_s5, %s2871_s1 }
 0x13f   : > { %p1398_p7 = scmp.ne.s32.totalorder %s225_s5, %s1397_s2  ;;  %p1401_p0 = scmp.lt.u32.totalorder %s2114_s26, %s1397_s2 }
 0x140   : > { %p1403_p2 = scmp.lt.u32.totalorder %s1397_s2, %s225_s5 }
 0x141   : > { %p1402_p1 = por %p1401_p0, %p1400_p13 }
 0x143   : > { %p1404_p3 = por %p1403_p2, %p1402_p1 }
 0x145   : > { %p1405_p4 = pnand %p1404_p3, %p1398_p7 }
 0x147   : > { %1408 = shalt.err (!%p1405_p4)  }
 0x148   : > { %s1409_s21 = scalar_lea.vmem %s2347_s20, 80  ;;  %p1414_p6 = scmp.lt.s32.totalorder %s2347_s20, %s2122_s8 }
 0x149   : > { %p1410_p5 = scmp.ne.s32.totalorder %s2347_s20, %s1409_s21  ;;  %p1415_p8 = scmp.lt.s32.totalorder %s2125_s11, %s1409_s21 }
 0x14b   : > { %p1416_p10 = por %p1415_p8, %p1414_p6 }
 0x14d   : > { %p1417_p12 = pnand %p1416_p10, %p1410_p5 }
 0x14f   : > { %1420 = shalt.err (!%p1417_p12)  }
 0x150   : > { %232 = dma.hbm_to_vmem [thread:$0]  %s225_s5, 80, %s2347_s20, [#allocation2 + $0xb], %s2900_s17, %s2900_s17, %s2899_s12 }
 0x151   : > { %s241_s16 = scalar_lea.vmem %s2092_s28, 44 [#allocation5]  ;;  %s248_s27 = sadd.s32 13, %s2086_s24 }
 0x152   : > { %s244_s14 = sshll.u32 %s241_s16, 4  ;;  %s2386_s18 = sld [smem:[#allocation4 + %s248_s27]]  ;;  %s2388_s14 = int_to_ptr.vmem [resolvable:$true] %s244_s14 }
 0x153   : > { %s256_s13 = scalar_lea.vmem %s2092_s28, 45 [#allocation5]  ;;  %s263_s22 = sadd.s32 14, %s2086_s24 }
 0x154   : > { %s259_s3 = sshll.u32 %s256_s13, 4  ;;  %s235_s7 = sshrl.u32 %s2369_s29, 3  ;;  %s2394_s3 = int_to_ptr.vmem [resolvable:$true] %s259_s3 }
 0x155   : > { %s236_s25 = sand.u32 7, %s2369_s29   ;;  %s237_s10 = smul.u32 40, %s235_s7 }
 0x156   : > { %s2396_s19 = sld [smem:[#allocation4 + %s263_s22]]  ;;  %s271_s20 = scalar_lea.vmem %s2092_s28, 46 [#allocation5] }
 0x157   : > { %s238_s23 = sadd.s32 %s237_s10, %s236_s25 }
 0x158   : > { %s250_s15 = sshrl.u32 %s2386_s18, 3  ;;  %s1026_s30 = sshll.u32 %s238_s23, 4 }
 0x159   : > { %s251_s9 = sand.u32 7, %s2386_s18   ;;  %s240_s6 = scalar_lea.hbm %s2871_s1, %s1026_s30 }
 0x15a   : > { %s252_s4 = smul.u32 40, %s250_s15  ;;  %s1421_s21 = scalar_lea.hbm %s240_s6, 80 }
 0x15b   : > { %p1422_p7 = scmp.ne.s32.totalorder %s240_s6, %s1421_s21  ;;  %p1424_p13 = scmp.lt.u32.totalorder %s240_s6, %s2871_s1 }
 0x15c   : > { %p1425_p0 = scmp.lt.u32.totalorder %s2114_s26, %s1421_s21  ;;  %p1427_p2 = scmp.lt.u32.totalorder %s1421_s21, %s240_s6 }
 0x15e   : > { %p1426_p1 = por %p1425_p0, %p1424_p13 }
 0x160   : > { %p1428_p3 = por %p1427_p2, %p1426_p1 }
 0x162   : > { %p1429_p4 = pnand %p1428_p3, %p1422_p7 }
 0x164   : > { %1432 = shalt.err (!%p1429_p4)  }
 0x165   : > { %s1433_s29 = scalar_lea.vmem %s2388_s14, 80  ;;  %p1438_p6 = scmp.lt.s32.totalorder %s2388_s14, %s2122_s8 }
 0x166   : > { %p1434_p5 = scmp.ne.s32.totalorder %s2388_s14, %s1433_s29  ;;  %p1439_p8 = scmp.lt.s32.totalorder %s2125_s11, %s1433_s29 }
 0x168   : > { %p1440_p10 = por %p1439_p8, %p1438_p6 }
 0x16a   : > { %p1441_p12 = pnand %p1440_p10, %p1434_p5 }
 0x16c   : > { %1444 = shalt.err (!%p1441_p12)  }
 0x16d   : > { %247 = dma.hbm_to_vmem [thread:$0]  %s240_s6, 80, %s2388_s14, [#allocation2 + $0xc], %s2900_s17, %s2900_s17, %s2899_s12 }
 0x16e   : > { %s253_s18 = sadd.s32 %s252_s4, %s251_s9  ;;  %s274_s13 = sshll.u32 %s271_s20, 4  ;;  %s275_s13 = int_to_ptr.vmem [resolvable:$true] %s274_s13 }
 0x16f   : > { %s1027_s22 = sshll.u32 %s253_s18, 4  ;;  %s265_s7 = sshrl.u32 %s2396_s19, 3 }
 0x170   : > { %s255_s23 = scalar_lea.hbm %s2871_s1, %s1027_s22  ;;  %s266_s15 = sand.u32 7, %s2396_s19  }
 0x171   : > { %s1445_s30 = scalar_lea.hbm %s255_s23, 80  ;;  %p1448_p13 = scmp.lt.u32.totalorder %s255_s23, %s2871_s1 }
 0x172   : > { %p1446_p7 = scmp.ne.s32.totalorder %s255_s23, %s1445_s30  ;;  %p1449_p0 = scmp.lt.u32.totalorder %s2114_s26, %s1445_s30 }
 0x173   : > { %p1451_p2 = scmp.lt.u32.totalorder %s1445_s30, %s255_s23 }
 0x174   : > { %p1450_p1 = por %p1449_p0, %p1448_p13 }
 0x176   : > { %p1452_p3 = por %p1451_p2, %p1450_p1 }
 0x178   : > { %p1453_p4 = pnand %p1452_p3, %p1446_p7 }
 0x17a   : > { %1456 = shalt.err (!%p1453_p4)  }
 0x17b   : > { %s1457_s14 = scalar_lea.vmem %s2394_s3, 80  ;;  %p1462_p6 = scmp.lt.s32.totalorder %s2394_s3, %s2122_s8 }
 0x17c   : > { %p1458_p5 = scmp.ne.s32.totalorder %s2394_s3, %s1457_s14  ;;  %p1463_p8 = scmp.lt.s32.totalorder %s2125_s11, %s1457_s14 }
 0x17e   : > { %p1464_p10 = por %p1463_p8, %p1462_p6 }
 0x180   : > { %p1465_p12 = pnand %p1464_p10, %p1458_p5 }
 0x182   : > { %1468 = shalt.err (!%p1465_p12)  }
 0x183   : > { %262 = dma.hbm_to_vmem [thread:$0]  %s255_s23, 80, %s2394_s3, [#allocation2 + $0xd], %s2900_s17, %s2900_s17, %s2899_s12 }
 0x184   : > { %s267_s19 = smul.u32 40, %s265_s7  ;;  %s278_s20 = sadd.s32 15, %s2086_s24 }
 0x185   : > { %s286_s9 = scalar_lea.vmem %s2092_s28, 47 [#allocation5]  ;;  %s2437_s4 = sld [smem:[#allocation4 + %s278_s20]] }
 0x186   : > { %s268_s6 = sadd.s32 %s267_s19, %s266_s15  ;;  %s289_s16 = sshll.u32 %s286_s9, 4  ;;  %s2442_s16 = int_to_ptr.vmem [resolvable:$true] %s289_s16 }
 0x187   : > { %s1028_s21 = sshll.u32 %s268_s6, 4 }
 0x188   : > { %s270_s18 = scalar_lea.hbm %s2871_s1, %s1028_s21 }
 0x189   : > { %s1469_s22 = scalar_lea.hbm %s270_s18, 80  ;;  %p1472_p13 = scmp.lt.u32.totalorder %s270_s18, %s2871_s1 }
 0x18a   : > { %p1470_p7 = scmp.ne.s32.totalorder %s270_s18, %s1469_s22  ;;  %p1473_p0 = scmp.lt.u32.totalorder %s2114_s26, %s1469_s22 }
 0x18b   : > { %p1475_p2 = scmp.lt.u32.totalorder %s1469_s22, %s270_s18 }
 0x18c   : > { %p1474_p1 = por %p1473_p0, %p1472_p13 }
 0x18e   : > { %p1476_p3 = por %p1475_p2, %p1474_p1 }
 0x190   : > { %p1477_p4 = pnand %p1476_p3, %p1470_p7 }
 0x192   : > { %1480 = shalt.err (!%p1477_p4)  }
 0x193   : > { %s1481_s3 = scalar_lea.vmem %s275_s13, 80  ;;  %p1486_p6 = scmp.lt.s32.totalorder %s275_s13, %s2122_s8 }
 0x194   : > { %p1482_p5 = scmp.ne.s32.totalorder %s275_s13, %s1481_s3  ;;  %p1487_p8 = scmp.lt.s32.totalorder %s2125_s11, %s1481_s3 }
 0x196   : > { %p1488_p10 = por %p1487_p8, %p1486_p6 }
 0x198   : > { %p1489_p12 = pnand %p1488_p10, %p1482_p5 }
 0x19a   : > { %1492 = shalt.err (!%p1489_p12)  }
 0x19b   : > { %277 = dma.hbm_to_vmem [thread:$0]  %s270_s18, 80, %s275_s13, [#allocation2 + $0xe], %s2900_s17, %s2900_s17, %s2899_s12 }
 0x19c   : > { %s293_s7 = sadd.s32 16, %s2086_s24  ;;  %s301_s23 = scalar_lea.vmem %s2092_s28, 80 [#allocation5] }
 0x19d   : > { %s2455_s15 = sld [smem:[#allocation4 + %s293_s7]]  ;;  %s304_s30 = sshll.u32 %s301_s23, 4  ;;  %s2459_s30 = int_to_ptr.vmem [resolvable:$true] %s304_s30 }
 0x19e   : > { %s280_s5 = sshrl.u32 %s2437_s4, 3  ;;  %s281_s2 = sand.u32 7, %s2437_s4  }
 0x19f   : > { %s282_s14 = smul.u32 40, %s280_s5  ;;  %s308_s19 = sadd.s32 17, %s2086_s24 }
 0x1a0   : > { %s316_s20 = scalar_lea.vmem %s2092_s28, 81 [#allocation5]  ;;  %s2463_s6 = sld [smem:[#allocation4 + %s308_s19]] }
 0x1a1   : > { %s283_s9 = sadd.s32 %s282_s14, %s281_s2  ;;  %s319_s27 = sshll.u32 %s316_s20, 4  ;;  %s2483_s27 = int_to_ptr.vmem [resolvable:$true] %s319_s27 }
 0x1a2   : > { %s1029_s21 = sshll.u32 %s283_s9, 4 }
 0x1a3   : > { %s285_s18 = scalar_lea.hbm %s2871_s1, %s1029_s21  ;;  %s295_s22 = sshrl.u32 %s2455_s15, 3 }
 0x1a4   : > { %s1493_s25 = scalar_lea.hbm %s285_s18, 80  ;;  %p1496_p13 = scmp.lt.u32.totalorder %s285_s18, %s2871_s1 }
 0x1a5   : > { %p1494_p7 = scmp.ne.s32.totalorder %s285_s18, %s1493_s25  ;;  %p1497_p0 = scmp.lt.u32.totalorder %s2114_s26, %s1493_s25 }
 0x1a6   : > { %p1499_p2 = scmp.lt.u32.totalorder %s1493_s25, %s285_s18 }
 0x1a7   : > { %p1498_p1 = por %p1497_p0, %p1496_p13 }
 0x1a9   : > { %p1500_p3 = por %p1499_p2, %p1498_p1 }
 0x1ab   : > { %p1501_p4 = pnand %p1500_p3, %p1494_p7 }
 0x1ad   : > { %1504 = shalt.err (!%p1501_p4)  }
 0x1ae   : > { %s1505_s4 = scalar_lea.vmem %s2442_s16, 80  ;;  %p1510_p6 = scmp.lt.s32.totalorder %s2442_s16, %s2122_s8 }
 0x1af   : > { %p1506_p5 = scmp.ne.s32.totalorder %s2442_s16, %s1505_s4  ;;  %p1511_p8 = scmp.lt.s32.totalorder %s2125_s11, %s1505_s4 }
 0x1b1   : > { %p1512_p10 = por %p1511_p8, %p1510_p6 }
 0x1b3   : > { %p1513_p12 = pnand %p1512_p10, %p1506_p5 }
 0x1b5   : > { %1516 = shalt.err (!%p1513_p12)  }
 0x1b6   : > { %292 = dma.hbm_to_vmem [thread:$0]  %s285_s18, 80, %s2442_s16, [#allocation2 + $0xf], %s2900_s17, %s2900_s17, %s2899_s12 }
 0x1b7   : > { %s296_s7 = sand.u32 7, %s2455_s15   ;;  %s297_s23 = smul.u32 40, %s295_s22 }
 0x1b8   : > { %s323_s5 = sadd.s32 18, %s2086_s24  ;;  %s310_s14 = sshrl.u32 %s2463_s6, 3 }
 0x1b9   : > { %s298_s2 = sadd.s32 %s297_s23, %s296_s7  ;;  %s311_s20 = sand.u32 7, %s2463_s6  }
 0x1ba   : > { %s1030_s19 = sshll.u32 %s298_s2, 4  ;;  %s312_s29 = smul.u32 40, %s310_s14 }
 0x1bb   : > { %s300_s13 = scalar_lea.hbm %s2871_s1, %s1030_s19 }
 0x1bc   : > { %s1517_s25 = scalar_lea.hbm %s300_s13, 80  ;;  %p1520_p13 = scmp.lt.u32.totalorder %s300_s13, %s2871_s1 }
 0x1bd   : > { %p1518_p7 = scmp.ne.s32.totalorder %s300_s13, %s1517_s25  ;;  %p1521_p0 = scmp.lt.u32.totalorder %s2114_s26, %s1517_s25 }
 0x1be   : > { %p1523_p2 = scmp.lt.u32.totalorder %s1517_s25, %s300_s13 }
 0x1bf   : > { %p1522_p1 = por %p1521_p0, %p1520_p13 }
 0x1c1   : > { %p1524_p3 = por %p1523_p2, %p1522_p1 }
 0x1c3   : > { %p1525_p4 = pnand %p1524_p3, %p1518_p7 }
 0x1c5   : > { %1528 = shalt.err (!%p1525_p4)  }
 0x1c6   : > { %s1529_s16 = scalar_lea.vmem %s2459_s30, 80  ;;  %p1534_p6 = scmp.lt.s32.totalorder %s2459_s30, %s2122_s8 }
 0x1c7   : > { %p1530_p5 = scmp.ne.s32.totalorder %s2459_s30, %s1529_s16  ;;  %p1535_p8 = scmp.lt.s32.totalorder %s2125_s11, %s1529_s16 }
 0x1c9   : > { %p1536_p10 = por %p1535_p8, %p1534_p6 }
 0x1cb   : > { %p1537_p12 = pnand %p1536_p10, %p1530_p5 }
 0x1cd   : > { %1540 = shalt.err (!%p1537_p12)  }
 0x1ce   : > { %307 = dma.hbm_to_vmem [thread:$0]  %s300_s13, 80, %s2459_s30, [#allocation2 + $0x10], %s2900_s17, %s2900_s17, %s2899_s12 }
 0x1cf   : > { %s313_s15 = sadd.s32 %s312_s29, %s311_s20  ;;  %s2504_s6 = sld [smem:[#allocation4 + %s323_s5]] }
 0x1d0   : > { %s1031_s18 = sshll.u32 %s313_s15, 4  ;;  %s331_s22 = scalar_lea.vmem %s2092_s28, 82 [#allocation5] }
 0x1d1   : > { %s315_s23 = scalar_lea.hbm %s2871_s1, %s1031_s18  ;;  %s334_s2 = sshll.u32 %s331_s22, 4  ;;  %s2523_s2 = int_to_ptr.vmem [resolvable:$true] %s334_s2 }
 0x1d2   : > { %s1541_s14 = scalar_lea.hbm %s315_s23, 80  ;;  %p1544_p13 = scmp.lt.u32.totalorder %s315_s23, %s2871_s1 }
 0x1d3   : > { %p1542_p7 = scmp.ne.s32.totalorder %s315_s23, %s1541_s14  ;;  %p1545_p0 = scmp.lt.u32.totalorder %s2114_s26, %s1541_s14 }
 0x1d4   : > { %p1547_p2 = scmp.lt.u32.totalorder %s1541_s14, %s315_s23 }
 0x1d5   : > { %p1546_p1 = por %p1545_p0, %p1544_p13 }
 0x1d7   : > { %p1548_p3 = por %p1547_p2, %p1546_p1 }
 0x1d9   : > { %p1549_p4 = pnand %p1548_p3, %p1542_p7 }
 0x1db   : > { %1552 = shalt.err (!%p1549_p4)  }
 0x1dc   : > { %s1553_s30 = scalar_lea.vmem %s2483_s27, 80  ;;  %p1558_p6 = scmp.lt.s32.totalorder %s2483_s27, %s2122_s8 }
 0x1dd   : > { %p1554_p5 = scmp.ne.s32.totalorder %s2483_s27, %s1553_s30  ;;  %p1559_p8 = scmp.lt.s32.totalorder %s2125_s11, %s1553_s30 }
 0x1df   : > { %p1560_p10 = por %p1559_p8, %p1558_p6 }
 0x1e1   : > { %p1561_p12 = pnand %p1560_p10, %p1554_p5 }
 0x1e3   : > { %1564 = shalt.err (!%p1561_p12)  }
 0x1e4   : > { %322 = dma.hbm_to_vmem [thread:$0]  %s315_s23, 80, %s2483_s27, [#allocation2 + $0x11], %s2900_s17, %s2900_s17, %s2899_s12 }
 0x1e5   : > { %s338_s5 = sadd.s32 19, %s2086_s24  ;;  %s346_s21 = scalar_lea.vmem %s2092_s28, 83 [#allocation5] }
 0x1e6   : > { %s2526_s20 = sld [smem:[#allocation4 + %s338_s5]]  ;;  %s325_s13 = sshrl.u32 %s2504_s6, 3 }
 0x1e7   : > { %s326_s29 = sand.u32 7, %s2504_s6   ;;  %s327_s25 = smul.u32 40, %s325_s13 }
 0x1e8   : > { %s349_s10 = sshll.u32 %s346_s21, 4  ;;  %s353_s3 = sadd.s32 20, %s2086_s24  ;;  %s2531_s10 = int_to_ptr.vmem [resolvable:$true] %s349_s10 }
 0x1e9   : > { %s328_s16 = sadd.s32 %s327_s25, %s326_s29  ;;  %s2534_s15 = sld [smem:[#allocation4 + %s353_s3]] }
 0x1ea   : > { %s1032_s18 = sshll.u32 %s328_s16, 4  ;;  %s361_s27 = scalar_lea.vmem %s2092_s28, 84 [#allocation5] }
 0x1eb   : > { %s330_s7 = scalar_lea.hbm %s2871_s1, %s1032_s18 }
 0x1ec   : > { %s340_s23 = sshrl.u32 %s2526_s20, 3  ;;  %s1565_s14 = scalar_lea.hbm %s330_s7, 80 }
 0x1ed   : > { %p1566_p7 = scmp.ne.s32.totalorder %s330_s7, %s1565_s14  ;;  %p1568_p13 = scmp.lt.u32.totalorder %s330_s7, %s2871_s1 }
 0x1ee   : > { %p1569_p0 = scmp.lt.u32.totalorder %s2114_s26, %s1565_s14  ;;  %p1571_p2 = scmp.lt.u32.totalorder %s1565_s14, %s330_s7 }
 0x1f0   : > { %p1570_p1 = por %p1569_p0, %p1568_p13 }
 0x1f2   : > { %p1572_p3 = por %p1571_p2, %p1570_p1 }
 0x1f4   : > { %p1573_p4 = pnand %p1572_p3, %p1566_p7 }
 0x1f6   : > { %1576 = shalt.err (!%p1573_p4)  }
 0x1f7   : > { %s1577_s6 = scalar_lea.vmem %s2523_s2, 80  ;;  %p1582_p6 = scmp.lt.s32.totalorder %s2523_s2, %s2122_s8 }
 0x1f8   : > { %p1578_p5 = scmp.ne.s32.totalorder %s2523_s2, %s1577_s6  ;;  %p1583_p8 = scmp.lt.s32.totalorder %s2125_s11, %s1577_s6 }
 0x1fa   : > { %p1584_p10 = por %p1583_p8, %p1582_p6 }
 0x1fc   : > { %p1585_p12 = pnand %p1584_p10, %p1578_p5 }
 0x1fe   : > { %1588 = shalt.err (!%p1585_p12)  }
 0x1ff   : > { %337 = dma.hbm_to_vmem [thread:$0]  %s330_s7, 80, %s2523_s2, [#allocation2 + $0x12], %s2900_s17, %s2900_s17, %s2899_s12 }
 0x200   : > { %s341_s30 = sand.u32 7, %s2526_s20   ;;  %s342_s5 = smul.u32 40, %s340_s23 }
 0x201   : > { %s364_s21 = sshll.u32 %s361_s27, 4  ;;  %s368_s13 = sadd.s32 21, %s2086_s24  ;;  %s365_s21 = int_to_ptr.vmem [resolvable:$true] %s364_s21 }
 0x202   : > { %s343_s29 = sadd.s32 %s342_s5, %s341_s30  ;;  %s355_s25 = sshrl.u32 %s2534_s15, 3 }
 0x203   : > { %s1033_s3 = sshll.u32 %s343_s29, 4  ;;  %s356_s16 = sand.u32 7, %s2534_s15  }
 0x204   : > { %s345_s4 = scalar_lea.hbm %s2871_s1, %s1033_s3  ;;  %s357_s14 = smul.u32 40, %s355_s25 }
 0x205   : > { %s1589_s19 = scalar_lea.hbm %s345_s4, 80  ;;  %p1592_p13 = scmp.lt.u32.totalorder %s345_s4, %s2871_s1 }
 0x206   : > { %p1590_p7 = scmp.ne.s32.totalorder %s345_s4, %s1589_s19  ;;  %p1593_p0 = scmp.lt.u32.totalorder %s2114_s26, %s1589_s19 }
 0x207   : > { %p1595_p2 = scmp.lt.u32.totalorder %s1589_s19, %s345_s4 }
 0x208   : > { %p1594_p1 = por %p1593_p0, %p1592_p13 }
 0x20a   : > { %p1596_p3 = por %p1595_p2, %p1594_p1 }
 0x20c   : > { %p1597_p4 = pnand %p1596_p3, %p1590_p7 }
 0x20e   : > { %1600 = shalt.err (!%p1597_p4)  }
 0x20f   : > { %s1601_s2 = scalar_lea.vmem %s2531_s10, 80  ;;  %p1606_p6 = scmp.lt.s32.totalorder %s2531_s10, %s2122_s8 }
 0x210   : > { %p1602_p5 = scmp.ne.s32.totalorder %s2531_s10, %s1601_s2  ;;  %p1607_p8 = scmp.lt.s32.totalorder %s2125_s11, %s1601_s2 }
 0x212   : > { %p1608_p10 = por %p1607_p8, %p1606_p6 }
 0x214   : > { %p1609_p12 = pnand %p1608_p10, %p1602_p5 }
 0x216   : > { %1612 = shalt.err (!%p1609_p12)  }
 0x217   : > { %352 = dma.hbm_to_vmem [thread:$0]  %s345_s4, 80, %s2531_s10, [#allocation2 + $0x13], %s2900_s17, %s2900_s17, %s2899_s12 }
 0x218   : > { %s358_s20 = sadd.s32 %s357_s14, %s356_s16  ;;  %s2574_s27 = sld [smem:[#allocation4 + %s368_s13]] }
 0x219   : > { %s1034_s15 = sshll.u32 %s358_s20, 4  ;;  %s376_s5 = scalar_lea.vmem %s2092_s28, 85 [#allocation5] }
 0x21a   : > { %s360_s30 = scalar_lea.hbm %s2871_s1, %s1034_s15 }
 0x21b   : > { %s1613_s29 = scalar_lea.hbm %s360_s30, 80  ;;  %p1616_p13 = scmp.lt.u32.totalorder %s360_s30, %s2871_s1 }
 0x21c   : > { %p1614_p7 = scmp.ne.s32.totalorder %s360_s30, %s1613_s29  ;;  %p1617_p0 = scmp.lt.u32.totalorder %s2114_s26, %s1613_s29 }
 0x21d   : > { %p1619_p2 = scmp.lt.u32.totalorder %s1613_s29, %s360_s30 }
 0x21e   : > { %p1618_p1 = por %p1617_p0, %p1616_p13 }
 0x220   : > { %p1620_p3 = por %p1619_p2, %p1618_p1 }
 0x222   : > { %p1621_p4 = pnand %p1620_p3, %p1614_p7 }
 0x224   : > { %1624 = shalt.err (!%p1621_p4)  }
 0x225   : > { %s1625_s10 = scalar_lea.vmem %s365_s21, 80  ;;  %p1630_p6 = scmp.lt.s32.totalorder %s365_s21, %s2122_s8 }
 0x226   : > { %p1626_p5 = scmp.ne.s32.totalorder %s365_s21, %s1625_s10  ;;  %p1631_p8 = scmp.lt.s32.totalorder %s2125_s11, %s1625_s10 }
 0x228   : > { %p1632_p10 = por %p1631_p8, %p1630_p6 }
 0x22a   : > { %p1633_p12 = pnand %p1632_p10, %p1626_p5 }
 0x22c   : > { %1636 = shalt.err (!%p1633_p12)  }
 0x22d   : > { %367 = dma.hbm_to_vmem [thread:$0]  %s360_s30, 80, %s365_s21, [#allocation2 + $0x14], %s2900_s17, %s2900_s17, %s2899_s12 }
 0x22e   : > { %s379_s13 = sshll.u32 %s376_s5, 4  ;;  %s383_s16 = sadd.s32 22, %s2086_s24  ;;  %s2590_s13 = int_to_ptr.vmem [resolvable:$true] %s379_s13 }
 0x22f   : > { %s2592_s18 = sld [smem:[#allocation4 + %s383_s16]]  ;;  %s391_s22 = scalar_lea.vmem %s2092_s28, 86 [#allocation5] }
 0x230   : > { %s398_s4 = sadd.s32 23, %s2086_s24  ;;  %s370_s14 = sshrl.u32 %s2574_s27, 3 }
 0x231   : > { %s371_s19 = sand.u32 7, %s2574_s27   ;;  %s372_s9 = smul.u32 40, %s370_s14 }
 0x232   : > { %s394_s6 = sshll.u32 %s391_s22, 4  ;;  %s2600_s2 = sld [smem:[#allocation4 + %s398_s4]]  ;;  %s2598_s6 = int_to_ptr.vmem [resolvable:$true] %s394_s6 }
 0x233   : > { %s373_s21 = sadd.s32 %s372_s9, %s371_s19  ;;  %s406_s20 = scalar_lea.vmem %s2092_s28, 87 [#allocation5] }
 0x234   : > { %s1035_s15 = sshll.u32 %s373_s21, 4 }
 0x235   : > { %s385_s7 = sshrl.u32 %s2592_s18, 3  ;;  %s375_s5 = scalar_lea.hbm %s2871_s1, %s1035_s15 }
 0x236   : > { %s386_s29 = sand.u32 7, %s2592_s18   ;;  %s1637_s25 = scalar_lea.hbm %s375_s5, 80 }
 0x237   : > { %p1638_p7 = scmp.ne.s32.totalorder %s375_s5, %s1637_s25  ;;  %p1640_p13 = scmp.lt.u32.totalorder %s375_s5, %s2871_s1 }
 0x238   : > { %p1641_p0 = scmp.lt.u32.totalorder %s2114_s26, %s1637_s25  ;;  %p1643_p2 = scmp.lt.u32.totalorder %s1637_s25, %s375_s5 }
 0x23a   : > { %p1642_p1 = por %p1641_p0, %p1640_p13 }
 0x23c   : > { %p1644_p3 = por %p1643_p2, %p1642_p1 }
 0x23e   : > { %p1645_p4 = pnand %p1644_p3, %p1638_p7 }
 0x240   : > { %1648 = shalt.err (!%p1645_p4)  }
 0x241   : > { %s1649_s27 = scalar_lea.vmem %s2590_s13, 80  ;;  %p1654_p6 = scmp.lt.s32.totalorder %s2590_s13, %s2122_s8 }
 0x242   : > { %p1650_p5 = scmp.ne.s32.totalorder %s2590_s13, %s1649_s27  ;;  %p1655_p8 = scmp.lt.s32.totalorder %s2125_s11, %s1649_s27 }
 0x244   : > { %p1656_p10 = por %p1655_p8, %p1654_p6 }
 0x246   : > { %p1657_p12 = pnand %p1656_p10, %p1650_p5 }
 0x248   : > { %1660 = shalt.err (!%p1657_p12)  }
 0x249   : > { %382 = dma.hbm_to_vmem [thread:$0]  %s375_s5, 80, %s2590_s13, [#allocation2 + $0x15], %s2900_s17, %s2900_s17, %s2899_s12 }
 0x24a   : > { %s387_s16 = smul.u32 40, %s385_s7  ;;  %s409_s18 = sshll.u32 %s406_s20, 4  ;;  %s2623_s18 = int_to_ptr.vmem [resolvable:$true] %s409_s18 }
 0x24b   : > { %s400_s22 = sshrl.u32 %s2600_s2, 3  ;;  %s401_s4 = sand.u32 7, %s2600_s2  }
 0x24c   : > { %s388_s14 = sadd.s32 %s387_s16, %s386_s29  ;;  %s402_s19 = smul.u32 40, %s400_s22 }
 0x24d   : > { %s1036_s9 = sshll.u32 %s388_s14, 4 }
 0x24e   : > { %s390_s23 = scalar_lea.hbm %s2871_s1, %s1036_s9  ;;  %s403_s30 = sadd.s32 %s402_s19, %s401_s4 }
 0x24f   : > { %s1661_s25 = scalar_lea.hbm %s390_s23, 80  ;;  %p1664_p13 = scmp.lt.u32.totalorder %s390_s23, %s2871_s1 }
 0x250   : > { %p1662_p7 = scmp.ne.s32.totalorder %s390_s23, %s1661_s25  ;;  %p1665_p0 = scmp.lt.u32.totalorder %s2114_s26, %s1661_s25 }
 0x251   : > { %p1667_p2 = scmp.lt.u32.totalorder %s1661_s25, %s390_s23 }
 0x252   : > { %p1666_p1 = por %p1665_p0, %p1664_p13 }
 0x254   : > { %p1668_p3 = por %p1667_p2, %p1666_p1 }
 0x256   : > { %p1669_p4 = pnand %p1668_p3, %p1662_p7 }
 0x258   : > { %1672 = shalt.err (!%p1669_p4)  }
 0x259   : > { %s1673_s13 = scalar_lea.vmem %s2598_s6, 80  ;;  %p1678_p6 = scmp.lt.s32.totalorder %s2598_s6, %s2122_s8 }
 0x25a   : > { %p1674_p5 = scmp.ne.s32.totalorder %s2598_s6, %s1673_s13  ;;  %p1679_p8 = scmp.lt.s32.totalorder %s2125_s11, %s1673_s13 }
 0x25c   : > { %p1680_p10 = por %p1679_p8, %p1678_p6 }
 0x25e   : > { %p1681_p12 = pnand %p1680_p10, %p1674_p5 }
 0x260   : > { %1684 = shalt.err (!%p1681_p12)  }
 0x261   : > { %397 = dma.hbm_to_vmem [thread:$0]  %s390_s23, 80, %s2598_s6, [#allocation2 + $0x16], %s2900_s17, %s2900_s17, %s2899_s12 }
 0x262   : > { %s1037_s2 = sshll.u32 %s403_s30, 4  ;;  %s413_s20 = sadd.s32 24, %s2086_s24 }
 0x263   : > { %s405_s29 = scalar_lea.hbm %s2871_s1, %s1037_s2  ;;  %s2645_s27 = sld [smem:[#allocation4 + %s413_s20]] }
 0x264   : > { %s1685_s16 = scalar_lea.hbm %s405_s29, 80  ;;  %p1688_p13 = scmp.lt.u32.totalorder %s405_s29, %s2871_s1 }
 0x265   : > { %p1686_p7 = scmp.ne.s32.totalorder %s405_s29, %s1685_s16  ;;  %p1689_p0 = scmp.lt.u32.totalorder %s2114_s26, %s1685_s16 }
 0x266   : > { %p1691_p2 = scmp.lt.u32.totalorder %s1685_s16, %s405_s29 }
 0x267   : > { %p1690_p1 = por %p1689_p0, %p1688_p13 }
 0x269   : > { %p1692_p3 = por %p1691_p2, %p1690_p1 }
 0x26b   : > { %p1693_p4 = pnand %p1692_p3, %p1686_p7 }
 0x26d   : > { %1696 = shalt.err (!%p1693_p4)  }
 0x26e   : > { %s1697_s6 = scalar_lea.vmem %s2623_s18, 80  ;;  %p1702_p6 = scmp.lt.s32.totalorder %s2623_s18, %s2122_s8 }
 0x26f   : > { %p1698_p5 = scmp.ne.s32.totalorder %s2623_s18, %s1697_s6  ;;  %p1703_p8 = scmp.lt.s32.totalorder %s2125_s11, %s1697_s6 }
 0x271   : > { %p1704_p10 = por %p1703_p8, %p1702_p6 }
 0x273   : > { %p1705_p12 = pnand %p1704_p10, %p1698_p5 }
 0x275   : > { %1708 = shalt.err (!%p1705_p12)  }
 0x276   : > { %412 = dma.hbm_to_vmem [thread:$0]  %s405_s29, 80, %s2623_s18, [#allocation2 + $0x17], %s2900_s17, %s2900_s17, %s2899_s12 }
 0x277   : > { %s421_s14 = scalar_lea.vmem %s2092_s28, 120 [#allocation5]  ;;  %s428_s19 = sadd.s32 25, %s2086_s24 }
 0x278   : > { %s424_s9 = sshll.u32 %s421_s14, 4  ;;  %s2662_s21 = sld [smem:[#allocation4 + %s428_s19]]  ;;  %s2664_s9 = int_to_ptr.vmem [resolvable:$true] %s424_s9 }
 0x279   : > { %s436_s15 = scalar_lea.vmem %s2092_s28, 121 [#allocation5]  ;;  %s443_s30 = sadd.s32 26, %s2086_s24 }
 0x27a   : > { %s439_s23 = sshll.u32 %s436_s15, 4  ;;  %s415_s25 = sshrl.u32 %s2645_s27, 3  ;;  %s2670_s23 = int_to_ptr.vmem [resolvable:$true] %s439_s23 }
 0x27b   : > { %s416_s3 = sand.u32 7, %s2645_s27   ;;  %s417_s10 = smul.u32 40, %s415_s25 }
 0x27c   : > { %s2672_s13 = sld [smem:[#allocation4 + %s443_s30]]  ;;  %s451_s18 = scalar_lea.vmem %s2092_s28, 122 [#allocation5] }
 0x27d   : > { %s418_s2 = sadd.s32 %s417_s10, %s416_s3 }
 0x27e   : > { %s430_s20 = sshrl.u32 %s2662_s21, 3  ;;  %s1038_s7 = sshll.u32 %s418_s2, 4 }
 0x27f   : > { %s431_s5 = sand.u32 7, %s2662_s21   ;;  %s420_s22 = scalar_lea.hbm %s2871_s1, %s1038_s7 }
 0x280   : > { %s432_s4 = smul.u32 40, %s430_s20  ;;  %s1709_s6 = scalar_lea.hbm %s420_s22, 80 }
 0x281   : > { %p1710_p7 = scmp.ne.s32.totalorder %s420_s22, %s1709_s6  ;;  %p1712_p13 = scmp.lt.u32.totalorder %s420_s22, %s2871_s1 }
 0x282   : > { %p1713_p0 = scmp.lt.u32.totalorder %s2114_s26, %s1709_s6  ;;  %p1715_p2 = scmp.lt.u32.totalorder %s1709_s6, %s420_s22 }
 0x284   : > { %p1714_p1 = por %p1713_p0, %p1712_p13 }
 0x286   : > { %p1716_p3 = por %p1715_p2, %p1714_p1 }
 0x288   : > { %p1717_p4 = pnand %p1716_p3, %p1710_p7 }
 0x28a   : > { %1720 = shalt.err (!%p1717_p4)  }
 0x28b   : > { %s1721_s27 = scalar_lea.vmem %s2664_s9, 80  ;;  %p1726_p6 = scmp.lt.s32.totalorder %s2664_s9, %s2122_s8 }
 0x28c   : > { %p1722_p5 = scmp.ne.s32.totalorder %s2664_s9, %s1721_s27  ;;  %p1727_p8 = scmp.lt.s32.totalorder %s2125_s11, %s1721_s27 }
 0x28e   : > { %p1728_p10 = por %p1727_p8, %p1726_p6 }
 0x290   : > { %p1729_p12 = pnand %p1728_p10, %p1722_p5 }
 0x292   : > { %1732 = shalt.err (!%p1729_p12)  }
 0x293   : > { %427 = dma.hbm_to_vmem [thread:$0]  %s420_s22, 80, %s2664_s9, [#allocation2 + $0x18], %s2900_s17, %s2900_s17, %s2899_s12 }
 0x294   : > { %s433_s21 = sadd.s32 %s432_s4, %s431_s5  ;;  %s454_s15 = sshll.u32 %s451_s18, 4  ;;  %s455_s15 = int_to_ptr.vmem [resolvable:$true] %s454_s15 }
 0x295   : > { %s1039_s30 = sshll.u32 %s433_s21, 4  ;;  %s445_s25 = sshrl.u32 %s2672_s13, 3 }
 0x296   : > { %s435_s2 = scalar_lea.hbm %s2871_s1, %s1039_s30  ;;  %s446_s20 = sand.u32 7, %s2672_s13  }
 0x297   : > { %s1733_s7 = scalar_lea.hbm %s435_s2, 80  ;;  %p1736_p13 = scmp.lt.u32.totalorder %s435_s2, %s2871_s1 }
 0x298   : > { %p1734_p7 = scmp.ne.s32.totalorder %s435_s2, %s1733_s7  ;;  %p1737_p0 = scmp.lt.u32.totalorder %s2114_s26, %s1733_s7 }
 0x299   : > { %p1739_p2 = scmp.lt.u32.totalorder %s1733_s7, %s435_s2 }
 0x29a   : > { %p1738_p1 = por %p1737_p0, %p1736_p13 }
 0x29c   : > { %p1740_p3 = por %p1739_p2, %p1738_p1 }
 0x29e   : > { %p1741_p4 = pnand %p1740_p3, %p1734_p7 }
 0x2a0   : > { %1744 = shalt.err (!%p1741_p4)  }
 0x2a1   : > { %s1745_s9 = scalar_lea.vmem %s2670_s23, 80  ;;  %p1750_p6 = scmp.lt.s32.totalorder %s2670_s23, %s2122_s8 }
 0x2a2   : > { %p1746_p5 = scmp.ne.s32.totalorder %s2670_s23, %s1745_s9  ;;  %p1751_p8 = scmp.lt.s32.totalorder %s2125_s11, %s1745_s9 }
 0x2a4   : > { %p1752_p10 = por %p1751_p8, %p1750_p6 }
 0x2a6   : > { %p1753_p12 = pnand %p1752_p10, %p1746_p5 }
 0x2a8   : > { %1756 = shalt.err (!%p1753_p12)  }
 0x2a9   : > { %442 = dma.hbm_to_vmem [thread:$0]  %s435_s2, 80, %s2670_s23, [#allocation2 + $0x19], %s2900_s17, %s2900_s17, %s2899_s12 }
 0x2aa   : > { %s447_s13 = smul.u32 40, %s445_s25  ;;  %s458_s18 = sadd.s32 27, %s2086_s24 }
 0x2ab   : > { %s466_s5 = scalar_lea.vmem %s2092_s28, 123 [#allocation5]  ;;  %s2713_s4 = sld [smem:[#allocation4 + %s458_s18]] }
 0x2ac   : > { %s448_s22 = sadd.s32 %s447_s13, %s446_s20  ;;  %s469_s14 = sshll.u32 %s466_s5, 4  ;;  %s2718_s14 = int_to_ptr.vmem [resolvable:$true] %s469_s14 }
 0x2ad   : > { %s1040_s6 = sshll.u32 %s448_s22, 4 }
 0x2ae   : > { %s450_s21 = scalar_lea.hbm %s2871_s1, %s1040_s6 }
 0x2af   : > { %s1757_s30 = scalar_lea.hbm %s450_s21, 80  ;;  %p1760_p13 = scmp.lt.u32.totalorder %s450_s21, %s2871_s1 }
 0x2b0   : > { %p1758_p7 = scmp.ne.s32.totalorder %s450_s21, %s1757_s30  ;;  %p1761_p0 = scmp.lt.u32.totalorder %s2114_s26, %s1757_s30 }
 0x2b1   : > { %p1763_p2 = scmp.lt.u32.totalorder %s1757_s30, %s450_s21 }
 0x2b2   : > { %p1762_p1 = por %p1761_p0, %p1760_p13 }
 0x2b4   : > { %p1764_p3 = por %p1763_p2, %p1762_p1 }
 0x2b6   : > { %p1765_p4 = pnand %p1764_p3, %p1758_p7 }
 0x2b8   : > { %1768 = shalt.err (!%p1765_p4)  }
 0x2b9   : > { %s1769_s23 = scalar_lea.vmem %s455_s15, 80  ;;  %p1774_p6 = scmp.lt.s32.totalorder %s455_s15, %s2122_s8 }
 0x2ba   : > { %p1770_p5 = scmp.ne.s32.totalorder %s455_s15, %s1769_s23  ;;  %p1775_p8 = scmp.lt.s32.totalorder %s2125_s11, %s1769_s23 }
 0x2bc   : > { %p1776_p10 = por %p1775_p8, %p1774_p6 }
 0x2be   : > { %p1777_p12 = pnand %p1776_p10, %p1770_p5 }
 0x2c0   : > { %1780 = shalt.err (!%p1777_p12)  }
 0x2c1   : > { %457 = dma.hbm_to_vmem [thread:$0]  %s450_s21, 80, %s455_s15, [#allocation2 + $0x1a], %s2900_s17, %s2900_s17, %s2899_s12 }
 0x2c2   : > { %s473_s25 = sadd.s32 28, %s2086_s24  ;;  %s481_s2 = scalar_lea.vmem %s2092_s28, 124 [#allocation5] }
 0x2c3   : > { %s2731_s20 = sld [smem:[#allocation4 + %s473_s25]]  ;;  %s484_s7 = sshll.u32 %s481_s2, 4  ;;  %s2735_s7 = int_to_ptr.vmem [resolvable:$true] %s484_s7 }
 0x2c4   : > { %s460_s29 = sshrl.u32 %s2713_s4, 3  ;;  %s461_s16 = sand.u32 7, %s2713_s4  }
 0x2c5   : > { %s462_s9 = smul.u32 40, %s460_s29  ;;  %s488_s13 = sadd.s32 29, %s2086_s24 }
 0x2c6   : > { %s496_s18 = scalar_lea.vmem %s2092_s28, 125 [#allocation5]  ;;  %s2739_s22 = sld [smem:[#allocation4 + %s488_s13]] }
 0x2c7   : > { %s463_s5 = sadd.s32 %s462_s9, %s461_s16  ;;  %s499_s19 = sshll.u32 %s496_s18, 4  ;;  %s2759_s19 = int_to_ptr.vmem [resolvable:$true] %s499_s19 }
 0x2c8   : > { %s1041_s6 = sshll.u32 %s463_s5, 4 }
 0x2c9   : > { %s465_s21 = scalar_lea.hbm %s2871_s1, %s1041_s6  ;;  %s475_s30 = sshrl.u32 %s2731_s20, 3 }
 0x2ca   : > { %s1781_s3 = scalar_lea.hbm %s465_s21, 80  ;;  %p1784_p13 = scmp.lt.u32.totalorder %s465_s21, %s2871_s1 }
 0x2cb   : > { %p1782_p7 = scmp.ne.s32.totalorder %s465_s21, %s1781_s3  ;;  %p1785_p0 = scmp.lt.u32.totalorder %s2114_s26, %s1781_s3 }
 0x2cc   : > { %p1787_p2 = scmp.lt.u32.totalorder %s1781_s3, %s465_s21 }
 0x2cd   : > { %p1786_p1 = por %p1785_p0, %p1784_p13 }
 0x2cf   : > { %p1788_p3 = por %p1787_p2, %p1786_p1 }
 0x2d1   : > { %p1789_p4 = pnand %p1788_p3, %p1782_p7 }
 0x2d3   : > { %1792 = shalt.err (!%p1789_p4)  }
 0x2d4   : > { %s1793_s4 = scalar_lea.vmem %s2718_s14, 80  ;;  %p1798_p6 = scmp.lt.s32.totalorder %s2718_s14, %s2122_s8 }
 0x2d5   : > { %p1794_p5 = scmp.ne.s32.totalorder %s2718_s14, %s1793_s4  ;;  %p1799_p8 = scmp.lt.s32.totalorder %s2125_s11, %s1793_s4 }
 0x2d7   : > { %p1800_p10 = por %p1799_p8, %p1798_p6 }
 0x2d9   : > { %p1801_p12 = pnand %p1800_p10, %p1794_p5 }
 0x2db   : > { %1804 = shalt.err (!%p1801_p12)  }
 0x2dc   : > { %472 = dma.hbm_to_vmem [thread:$0]  %s465_s21, 80, %s2718_s14, [#allocation2 + $0x1b], %s2900_s17, %s2900_s17, %s2899_s12 }
 0x2dd   : > { %s476_s25 = sand.u32 7, %s2731_s20   ;;  %s477_s2 = smul.u32 40, %s475_s30 }
 0x2de   : > { %s503_s29 = sadd.s32 30, %s2086_s24  ;;  %s490_s9 = sshrl.u32 %s2739_s22, 3 }
 0x2df   : > { %s478_s16 = sadd.s32 %s477_s2, %s476_s25  ;;  %s491_s18 = sand.u32 7, %s2739_s22  }
 0x2e0   : > { %s1042_s13 = sshll.u32 %s478_s16, 4  ;;  %s492_s27 = smul.u32 40, %s490_s9 }
 0x2e1   : > { %s480_s15 = scalar_lea.hbm %s2871_s1, %s1042_s13 }
 0x2e2   : > { %s1805_s3 = scalar_lea.hbm %s480_s15, 80  ;;  %p1808_p13 = scmp.lt.u32.totalorder %s480_s15, %s2871_s1 }
 0x2e3   : > { %p1806_p7 = scmp.ne.s32.totalorder %s480_s15, %s1805_s3  ;;  %p1809_p0 = scmp.lt.u32.totalorder %s2114_s26, %s1805_s3 }
 0x2e4   : > { %p1811_p2 = scmp.lt.u32.totalorder %s1805_s3, %s480_s15 }
 0x2e5   : > { %p1810_p1 = por %p1809_p0, %p1808_p13 }
 0x2e7   : > { %p1812_p3 = por %p1811_p2, %p1810_p1 }
 0x2e9   : > { %p1813_p4 = pnand %p1812_p3, %p1806_p7 }
 0x2eb   : > { %1816 = shalt.err (!%p1813_p4)  }
 0x2ec   : > { %s1817_s14 = scalar_lea.vmem %s2735_s7, 80  ;;  %p1822_p6 = scmp.lt.s32.totalorder %s2735_s7, %s2122_s8 }
 0x2ed   : > { %p1818_p5 = scmp.ne.s32.totalorder %s2735_s7, %s1817_s14  ;;  %p1823_p8 = scmp.lt.s32.totalorder %s2125_s11, %s1817_s14 }
 0x2ef   : > { %p1824_p10 = por %p1823_p8, %p1822_p6 }
 0x2f1   : > { %p1825_p12 = pnand %p1824_p10, %p1818_p5 }
 0x2f3   : > { %1828 = shalt.err (!%p1825_p12)  }
 0x2f4   : > { %487 = dma.hbm_to_vmem [thread:$0]  %s480_s15, 80, %s2735_s7, [#allocation2 + $0x1c], %s2900_s17, %s2900_s17, %s2899_s12 }
 0x2f5   : > { %s493_s20 = sadd.s32 %s492_s27, %s491_s18  ;;  %s2780_s22 = sld [smem:[#allocation4 + %s503_s29]] }
 0x2f6   : > { %s1043_s21 = sshll.u32 %s493_s20, 4  ;;  %s511_s2 = scalar_lea.vmem %s2092_s28, 126 [#allocation5] }
 0x2f7   : > { %s495_s25 = scalar_lea.hbm %s2871_s1, %s1043_s21 }
 0x2f8   : > { %s1829_s16 = scalar_lea.hbm %s495_s25, 80  ;;  %p1832_p13 = scmp.lt.u32.totalorder %s495_s25, %s2871_s1 }
 0x2f9   : > { %p1830_p7 = scmp.ne.s32.totalorder %s495_s25, %s1829_s16  ;;  %p1833_p0 = scmp.lt.u32.totalorder %s2114_s26, %s1829_s16 }
 0x2fa   : > { %p1835_p2 = scmp.lt.u32.totalorder %s1829_s16, %s495_s25 }
 0x2fb   : > { %p1834_p1 = por %p1833_p0, %p1832_p13 }
 0x2fd   : > { %p1836_p3 = por %p1835_p2, %p1834_p1 }
 0x2ff   : > { %p1837_p4 = pnand %p1836_p3, %p1830_p7 }
 0x301   : > { %1840 = shalt.err (!%p1837_p4)  }
 0x302   : > { %s1841_s7 = scalar_lea.vmem %s2759_s19, 80  ;;  %p1846_p6 = scmp.lt.s32.totalorder %s2759_s19, %s2122_s8 }
 0x303   : > { %p1842_p5 = scmp.ne.s32.totalorder %s2759_s19, %s1841_s7  ;;  %p1847_p8 = scmp.lt.s32.totalorder %s2125_s11, %s1841_s7 }
 0x305   : > { %p1848_p10 = por %p1847_p8, %p1846_p6 }
 0x307   : > { %p1849_p12 = pnand %p1848_p10, %p1842_p5 }
 0x309   : > { %1852 = shalt.err (!%p1849_p12)  }
 0x30a   : > { %502 = dma.hbm_to_vmem [thread:$0]  %s495_s25, 80, %s2759_s19, [#allocation2 + $0x1d], %s2900_s17, %s2900_s17, %s2899_s12 }
 0x30b   : > { %s518_s29 = sadd.s32 31, %s2086_s24  ;;  %s514_s18 = sshll.u32 %s511_s2, 4  ;;  %s515_s18 = int_to_ptr.vmem [resolvable:$true] %s514_s18 }
 0x30c   : > { %s2800_s5 = sld [smem:[#allocation4 + %s518_s29]]  ;;  %s505_s6 = sshrl.u32 %s2780_s22, 3 }
 0x30d   : > { %s506_s15 = sand.u32 7, %s2780_s22   ;;  %s507_s27 = smul.u32 40, %s505_s6 }
 0x30e   : > { %s526_s3 = scalar_lea.vmem %s2092_s28, 127 [#allocation5] }
 0x30f   : > { %s508_s10 = sadd.s32 %s507_s27, %s506_s15  ;;  %s529_s14 = sshll.u32 %s526_s3, 4  ;;  %s530_s14 = int_to_ptr.vmem [resolvable:$true] %s529_s14 }
 0x310   : > { %s1044_s23 = sshll.u32 %s508_s10, 4 }
 0x311   : > { %s510_s30 = scalar_lea.hbm %s2871_s1, %s1044_s23 }
 0x312   : > { %s520_s4 = sshrl.u32 %s2800_s5, 3  ;;  %s1853_s19 = scalar_lea.hbm %s510_s30, 80 }
 0x313   : > { %p1854_p7 = scmp.ne.s32.totalorder %s510_s30, %s1853_s19  ;;  %p1856_p13 = scmp.lt.u32.totalorder %s510_s30, %s2871_s1 }
 0x314   : > { %p1857_p0 = scmp.lt.u32.totalorder %s2114_s26, %s1853_s19  ;;  %p1859_p2 = scmp.lt.u32.totalorder %s1853_s19, %s510_s30 }
 0x316   : > { %p1858_p1 = por %p1857_p0, %p1856_p13 }
 0x318   : > { %p1860_p3 = por %p1859_p2, %p1858_p1 }
 0x31a   : > { %p1861_p4 = pnand %p1860_p3, %p1854_p7 }
 0x31c   : > { %1864 = shalt.err (!%p1861_p4)  }
 0x31d   : > { %s1865_s28 = scalar_lea.vmem %s515_s18, 80  ;;  %p1870_p6 = scmp.lt.s32.totalorder %s515_s18, %s2122_s8 }
 0x31e   : > { %p1866_p5 = scmp.ne.s32.totalorder %s515_s18, %s1865_s28  ;;  %p1871_p8 = scmp.lt.s32.totalorder %s2125_s11, %s1865_s28 }
 0x320   : > { %p1872_p10 = por %p1871_p8, %p1870_p6 }
 0x322   : > { %p1873_p12 = pnand %p1872_p10, %p1866_p5 }
 0x324   : > { %1876 = shalt.err (!%p1873_p12)  }
 0x325   : > { %517 = dma.hbm_to_vmem [thread:$0]  %s510_s30, 80, %s515_s18, [#allocation2 + $0x1e], %s2900_s17, %s2900_s17, %s2899_s12 }
 0x326   : > { %s521_s22 = sand.u32 7, %s2800_s5   ;;  %s522_s2 = smul.u32 40, %s520_s4 }
 0x328   : > { %s523_s16 = sadd.s32 %s522_s2, %s521_s22 }
 0x329   : > { %s1045_s9 = sshll.u32 %s523_s16, 4 }
 0x32a   : > { %s525_s29 = scalar_lea.hbm %s2871_s1, %s1045_s9 }
 0x32b   : > { %s1877_s6 = scalar_lea.hbm %s525_s29, 80  ;;  %p1880_p13 = scmp.lt.u32.totalorder %s525_s29, %s2871_s1 }
 0x32c   : > { %p1878_p7 = scmp.ne.s32.totalorder %s525_s29, %s1877_s6  ;;  %p1881_p0 = scmp.lt.u32.totalorder %s2114_s26, %s1877_s6 }
 0x32d   : > { %p1883_p2 = scmp.lt.u32.totalorder %s1877_s6, %s525_s29 }
 0x32e   : > { %p1882_p1 = por %p1881_p0, %p1880_p13 }
 0x330   : > { %p1884_p3 = por %p1883_p2, %p1882_p1 }
 0x332   : > { %p1885_p4 = pnand %p1884_p3, %p1878_p7 }
 0x334   : > { %1888 = shalt.err (!%p1885_p4)  }
 0x335   : > { %s1889_s18 = scalar_lea.vmem %s530_s14, 80  ;;  %p1894_p6 = scmp.lt.s32.totalorder %s530_s14, %s2122_s8 }
 0x336   : > { %p1890_p5 = scmp.ne.s32.totalorder %s530_s14, %s1889_s18  ;;  %p1895_p8 = scmp.lt.s32.totalorder %s2125_s11, %s1889_s18 }
 0x338   : > { %p1896_p10 = por %p1895_p8, %p1894_p6 }
 0x33a   : > { %p1897_p12 = pnand %p1896_p10, %p1890_p5 }
 0x33c   : > { %1900 = shalt.err (!%p1897_p12)  }
 0x33d   : > { %532 = dma.hbm_to_vmem [thread:$0]  %s525_s29, 80, %s530_s14, [#allocation2 + $0x1f], %s2900_s17, %s2900_s17, %s2899_s12 }
 0x33e   : > { %1943 = dma.done.wait [#allocation2], 80 }
 0x33f   : > { %1944 = vsyncadd [#allocation2], 4294967216 }
 0x340   : > { %1945 = dma.done.wait [#allocation2 + $0x1], 80 }
 0x341   : > { %1946 = vsyncadd [#allocation2 + $0x1], 4294967216 }
 0x342   : > { %1947 = dma.done.wait [#allocation2 + $0x2], 80 }
 0x343   : > { %1948 = vsyncadd [#allocation2 + $0x2], 4294967216 }
 0x344   : > { %1949 = dma.done.wait [#allocation2 + $0x3], 80 }
 0x345   : > { %1950 = vsyncadd [#allocation2 + $0x3], 4294967216 }
 0x346   : > { %1951 = dma.done.wait [#allocation2 + $0x4], 80 }
 0x347   : > { %1952 = vsyncadd [#allocation2 + $0x4], 4294967216 }
 0x348   : > { %1953 = dma.done.wait [#allocation2 + $0x5], 80 }
 0x349   : > { %1954 = vsyncadd [#allocation2 + $0x5], 4294967216 }
 0x34a   : > { %1955 = dma.done.wait [#allocation2 + $0x6], 80 }
 0x34b   : > { %1956 = vsyncadd [#allocation2 + $0x6], 4294967216 }
 0x34c   : > { %1957 = dma.done.wait [#allocation2 + $0x7], 80 }
 0x34d   : > { %1958 = vsyncadd [#allocation2 + $0x7], 4294967216 }
 0x34e   : > { %1959 = dma.done.wait [#allocation2 + $0x8], 80 }
 0x34f   : > { %1960 = vsyncadd [#allocation2 + $0x8], 4294967216 }
 0x350   : > { %1961 = dma.done.wait [#allocation2 + $0x9], 80 }
 0x351   : > { %1962 = vsyncadd [#allocation2 + $0x9], 4294967216 }
 0x352   : > { %1963 = dma.done.wait [#allocation2 + $0xa], 80 }
 0x353   : > { %1964 = vsyncadd [#allocation2 + $0xa], 4294967216 }
 0x354   : > { %1965 = dma.done.wait [#allocation2 + $0xb], 80 }
 0x355   : > { %1966 = vsyncadd [#allocation2 + $0xb], 4294967216 }
 0x356   : > { %1967 = dma.done.wait [#allocation2 + $0xc], 80 }
 0x357   : > { %1968 = vsyncadd [#allocation2 + $0xc], 4294967216 }
 0x358   : > { %1969 = dma.done.wait [#allocation2 + $0xd], 80 }
 0x359   : > { %1970 = vsyncadd [#allocation2 + $0xd], 4294967216 }
 0x35a   : > { %1971 = dma.done.wait [#allocation2 + $0xe], 80 }
 0x35b   : > { %1972 = vsyncadd [#allocation2 + $0xe], 4294967216 }
 0x35c   : > { %1973 = dma.done.wait [#allocation2 + $0xf], 80 }
 0x35d   : > { %1974 = vsyncadd [#allocation2 + $0xf], 4294967216 }
 0x35e   : > { %1975 = dma.done.wait [#allocation2 + $0x10], 80 }
 0x35f   : > { %1976 = vsyncadd [#allocation2 + $0x10], 4294967216 }
 0x360   : > { %1977 = dma.done.wait [#allocation2 + $0x11], 80 }
 0x361   : > { %1978 = vsyncadd [#allocation2 + $0x11], 4294967216 }
 0x362   : > { %1979 = dma.done.wait [#allocation2 + $0x12], 80 }
 0x363   : > { %1980 = vsyncadd [#allocation2 + $0x12], 4294967216 }
 0x364   : > { %1981 = dma.done.wait [#allocation2 + $0x13], 80 }
 0x365   : > { %1982 = vsyncadd [#allocation2 + $0x13], 4294967216 }
 0x366   : > { %1983 = dma.done.wait [#allocation2 + $0x14], 80 }
 0x367   : > { %1984 = vsyncadd [#allocation2 + $0x14], 4294967216 }
 0x368   : > { %1985 = dma.done.wait [#allocation2 + $0x15], 80 }
 0x369   : > { %1986 = vsyncadd [#allocation2 + $0x15], 4294967216 }
 0x36a   : > { %1987 = dma.done.wait [#allocation2 + $0x16], 80 }
 0x36b   : > { %1988 = vsyncadd [#allocation2 + $0x16], 4294967216 }
 0x36c   : > { %1989 = dma.done.wait [#allocation2 + $0x17], 80 }
 0x36d   : > { %1990 = vsyncadd [#allocation2 + $0x17], 4294967216 }
 0x36e   : > { %1991 = dma.done.wait [#allocation2 + $0x18], 80 }
 0x36f   : > { %1992 = vsyncadd [#allocation2 + $0x18], 4294967216 }
 0x370   : > { %1993 = dma.done.wait [#allocation2 + $0x19], 80 }
 0x371   : > { %1994 = vsyncadd [#allocation2 + $0x19], 4294967216 }
 0x372   : > { %1995 = dma.done.wait [#allocation2 + $0x1a], 80 }
 0x373   : > { %1996 = vsyncadd [#allocation2 + $0x1a], 4294967216 }
 0x374   : > { %1997 = dma.done.wait [#allocation2 + $0x1b], 80 }
 0x375   : > { %1998 = vsyncadd [#allocation2 + $0x1b], 4294967216 }
 0x376   : > { %1999 = dma.done.wait [#allocation2 + $0x1c], 80 }
 0x377   : > { %2000 = vsyncadd [#allocation2 + $0x1c], 4294967216 }
 0x378   : > { %2001 = dma.done.wait [#allocation2 + $0x1d], 80 }
 0x379   : > { %2002 = vsyncadd [#allocation2 + $0x1d], 4294967216 }
 0x37a   : > { %2003 = dma.done.wait [#allocation2 + $0x1e], 80 }
 0x37b   : > { %2004 = vsyncadd [#allocation2 + $0x1e], 4294967216 }
 0x37c   : > { %2005 = dma.done.wait [#allocation2 + $0x1f], 80 }
 0x37d   : > { %2006 = vsyncadd [#allocation2 + $0x1f], 4294967216  ;;  %s2901_s26 = sld [smem:[#allocation74_spill]]  ;;  %s2902_s12 = sld [smem:[#allocation79_spill]] }
 0x37e   : > { %s1084_s5 = smul.u32 2560, %s2021_s0  ;;  %s2904_s23 = sld [smem:[#allocation80_spill]] }
 0x383   : > { %s2905_s20 = sand.u32 1, %s2901_s26   ;;  %s1901_s30 = scalar_lea.vmem %s2902_s12, 2560 }
 0x384   : > { %s612_s14 = scalar_lea.hbm %s2904_s23, %s1084_s5  ;;  %s599_s21 = scalar_lea.sflag [#allocation6], %s2905_s20 }
 0x385   : > { %p1902_p7 = scmp.ne.s32.totalorder %s2902_s12, %s1901_s30  ;;  %p1909_p1 = scmp.lt.s32.totalorder %s2125_s11, %s1901_s30 }
 0x386   : > { %p2906_p2 = scmp.lt.s32.totalorder %s2902_s12, %s2122_s8 }
 0x387   : > { %p1903_p13 = pnand %p1902_p7, %p2075_p9 }
 0x388   : > { %p1910_p3 = por %p1909_p1, %p2906_p2 }
 0x389   : > { %p1904_p0 = pneg %p1903_p13 }
 0x38b   : > { %p1911_p4 = pnand %p1910_p3, %p1904_p0 }
 0x38d   : > { %1914 = shalt.err (!%p1911_p4)
}
 0x38e   : > { %s1915_s4 = scalar_lea.hbm %s612_s14, 2560  ;;  %s1919_s25 = scalar_lea.hbm %s2904_s23, 10240 }
 0x38f   : > { %p1916_p5 = scmp.ne.s32.totalorder %s612_s14, %s1915_s4  ;;  %p1920_p10 = scmp.lt.u32.totalorder %s612_s14, %s2904_s23 }
 0x390   : > { %p1921_p12 = scmp.lt.u32.totalorder %s1919_s25, %s1915_s4  ;;  %p1923_p13 = scmp.lt.u32.totalorder %s1915_s4, %s612_s14 }
 0x391   : > { %p1917_p6 = pnand %p1916_p5, %p2075_p9 }
 0x392   : > { %p1922_p7 = por %p1921_p12, %p1920_p10 }
 0x393   : > { %p1918_p8 = pneg %p1917_p6 }
 0x394   : > { %p1924_p1 = por %p1923_p13, %p1922_p7 }
 0x396   : > { %p1925_p0 = pnand %p1924_p1, %p1918_p8 }
 0x398   : > { %1928 = shalt.err (!%p1925_p0)
}
 0x399   : > { %s2027_s8 = smov 640   ;;  %s2028_s11 = smov 40  }
 0x39a   : > { %1085 = dma.vmem_to_hbm [thread:$0]  (%p2075_p9), %s2902_s12, 2560, %s612_s14, %s599_s21, %s2027_s8, %s2027_s8, %s2028_s11  }
 0x39b PF: > { %s2907_s2 = sld [smem:[#allocation73_spill]]  ;;  %p1091_p2 = scmp.ge.s32.totalorder %s2021_s0, 1 }
 0x39d   : > { %p1088_p3 = pnand %p1091_p2, %p2079_p11 }
 0x3a1   : > { %s628_s9 = sand.u32 1, %s2907_s2  }
 0x3a2   : > { %s629_s13 = scalar_lea.sflag [#allocation6], %s628_s9 }
 0x3a3   : > { %2008 = dma.done.wait (!%p1088_p3), %s629_s13, 2560  }
 0x3a4   : > { %2010 = vsyncadd (!%p1088_p3), %s629_s13, 4294964736  ;;  %s2909_s0 = sld [smem:[#allocation75_spill]]  ;;  %s2910_s14 = sld [smem:[#allocation74_spill]] }
 0x3a5   : > { %s2911_s15 = sld [smem:[#allocation76_spill]] }
 0x3aa   : > { %p18_p4 = scmp.ge.s32.totalorder %s2909_s0, 5  }
 0x3ac   :  { %20 = sbr.rel (!%p18_p4) target bundleno = 18 (0x12), region = 169 }
 0x3b3   :  { %634 = vsyncpa [#allocation6], 1 }
 0x3b4   :  { %636 = vsyncpa [#allocation6 + $0x1], 1 }
 0x3b5   :  { %637 = vsyncmov [#allocation2] }
 0x3b8   :  { %s638_s7 = vpop.sfrf %637 }
 0x3b9   :  { %p1051_p9 = scmp.ne.s32.totalorder %s638_s7, 0 }
 0x3bb   :  { %642 = shalt.err (%p1051_p9)  }
 0x3bc   :  { %644 = vsyncmov [#allocation2 + $0x1] }
 0x3bf   :  { %s645_s29 = vpop.sfrf %644 }
 0x3c0   :  { %p1052_p11 = scmp.ne.s32.totalorder %s645_s29, 0 }
 0x3c2   :  { %649 = shalt.err (%p1052_p11)  }
 0x3c3   :  { %651 = vsyncmov [#allocation2 + $0x2] }
 0x3c6   :  { %s652_s6 = vpop.sfrf %651 }
 0x3c7   :  { %p1053_p5 = scmp.ne.s32.totalorder %s652_s6, 0 }
 0x3c9   :  { %656 = shalt.err (%p1053_p5)  }
 0x3ca   :  { %658 = vsyncmov [#allocation2 + $0x3] }
 0x3cd   :  { %s659_s27 = vpop.sfrf %658 }
 0x3ce   :  { %p1054_p6 = scmp.ne.s32.totalorder %s659_s27, 0 }
 0x3d0   :  { %663 = shalt.err (%p1054_p6)  }
 0x3d1   :  { %665 = vsyncmov [#allocation2 + $0x4] }
 0x3d4   :  { %s666_s0 = vpop.sfrf %665 }
 0x3d5   :  { %p1055_p8 = scmp.ne.s32.totalorder %s666_s0, 0 }
 0x3d7   :  { %670 = shalt.err (%p1055_p8)  }
 0x3d8   :  { %672 = vsyncmov [#allocation2 + $0x5] }
 0x3db   :  { %s673_s1 = vpop.sfrf %672 }
 0x3dc   :  { %p1056_p10 = scmp.ne.s32.totalorder %s673_s1, 0 }
 0x3de   :  { %677 = shalt.err (%p1056_p10)  }
 0x3df   :  { %679 = vsyncmov [#allocation2 + $0x6] }
 0x3e2   :  { %s680_s15 = vpop.sfrf %679 }
 0x3e3   :  { %p1057_p12 = scmp.ne.s32.totalorder %s680_s15, 0 }
 0x3e5   :  { %684 = shalt.err (%p1057_p12)  }
 0x3e6   :  { %686 = vsyncmov [#allocation2 + $0x7] }
 0x3e9   :  { %s687_s18 = vpop.sfrf %686 }
 0x3ea   :  { %p1058_p7 = scmp.ne.s32.totalorder %s687_s18, 0 }
 0x3ec   :  { %691 = shalt.err (%p1058_p7)  }
 0x3ed   :  { %693 = vsyncmov [#allocation2 + $0x8] }
 0x3f0   :  { %s694_s26 = vpop.sfrf %693 }
 0x3f1   :  { %p1059_p13 = scmp.ne.s32.totalorder %s694_s26, 0 }
 0x3f3   :  { %698 = shalt.err (%p1059_p13)  }
 0x3f4   :  { %700 = vsyncmov [#allocation2 + $0x9] }
 0x3f7   :  { %s701_s12 = vpop.sfrf %700 }
 0x3f8   :  { %p1060_p1 = scmp.ne.s32.totalorder %s701_s12, 0 }
 0x3fa   :  { %705 = shalt.err (%p1060_p1)  }
 0x3fb   :  { %707 = vsyncmov [#allocation2 + $0xa] }
 0x3fe   :  { %s708_s17 = vpop.sfrf %707 }
 0x3ff   :  { %p1061_p0 = scmp.ne.s32.totalorder %s708_s17, 0 }
 0x401   :  { %712 = shalt.err (%p1061_p0)  }
 0x402   :  { %714 = vsyncmov [#allocation2 + $0xb] }
 0x405   :  { %s715_s5 = vpop.sfrf %714 }
 0x406   :  { %p1062_p2 = scmp.ne.s32.totalorder %s715_s5, 0 }
 0x408   :  { %719 = shalt.err (%p1062_p2)  }
 0x409   :  { %721 = vsyncmov [#allocation2 + $0xc] }
 0x40c   :  { %s722_s3 = vpop.sfrf %721 }
 0x40d   :  { %p1063_p3 = scmp.ne.s32.totalorder %s722_s3, 0 }
 0x40f   :  { %726 = shalt.err (%p1063_p3)  }
 0x410   :  { %728 = vsyncmov [#allocation2 + $0xd] }
 0x413   :  { %s729_s10 = vpop.sfrf %728 }
 0x414   :  { %p1064_p4 = scmp.ne.s32.totalorder %s729_s10, 0 }
 0x416   :  { %733 = shalt.err (%p1064_p4)  }
 0x417   :  { %735 = vsyncmov [#allocation2 + $0xe] }
 0x41a   :  { %s736_s23 = vpop.sfrf %735 }
 0x41b   :  { %p1065_p9 = scmp.ne.s32.totalorder %s736_s23, 0 }
 0x41d   :  { %740 = shalt.err (%p1065_p9)  }
 0x41e   :  { %742 = vsyncmov [#allocation2 + $0xf] }
 0x421   :  { %s743_s14 = vpop.sfrf %742 }
 0x422   :  { %p1066_p11 = scmp.ne.s32.totalorder %s743_s14, 0 }
 0x424   :  { %747 = shalt.err (%p1066_p11)  }
 0x425   :  { %749 = vsyncmov [#allocation2 + $0x10] }
 0x428   :  { %s750_s20 = vpop.sfrf %749 }
 0x429   :  { %p1067_p5 = scmp.ne.s32.totalorder %s750_s20, 0 }
 0x42b   :  { %754 = shalt.err (%p1067_p5)  }
 0x42c   :  { %756 = vsyncmov [#allocation2 + $0x11] }
 0x42f   :  { %s757_s21 = vpop.sfrf %756 }
 0x430   :  { %p1068_p6 = scmp.ne.s32.totalorder %s757_s21, 0 }
 0x432   :  { %761 = shalt.err (%p1068_p6)  }
 0x433   :  { %763 = vsyncmov [#allocation2 + $0x12] }
 0x436   :  { %s764_s30 = vpop.sfrf %763 }
 0x437   :  { %p1069_p8 = scmp.ne.s32.totalorder %s764_s30, 0 }
 0x439   :  { %768 = shalt.err (%p1069_p8)  }
 0x43a   :  { %770 = vsyncmov [#allocation2 + $0x13] }
 0x43d   :  { %s771_s4 = vpop.sfrf %770 }
 0x43e   :  { %p1070_p10 = scmp.ne.s32.totalorder %s771_s4, 0 }
 0x440   :  { %775 = shalt.err (%p1070_p10)  }
 0x441   :  { %777 = vsyncmov [#allocation2 + $0x14] }
 0x444   :  { %s778_s19 = vpop.sfrf %777 }
 0x445   :  { %p1071_p12 = scmp.ne.s32.totalorder %s778_s19, 0 }
 0x447   :  { %782 = shalt.err (%p1071_p12)  }
 0x448   :  { %784 = vsyncmov [#allocation2 + $0x15] }
 0x44b   :  { %s785_s24 = vpop.sfrf %784 }
 0x44c   :  { %p1072_p7 = scmp.ne.s32.totalorder %s785_s24, 0 }
 0x44e   :  { %789 = shalt.err (%p1072_p7)  }
 0x44f   :  { %791 = vsyncmov [#allocation2 + $0x16] }
 0x452   :  { %s792_s25 = vpop.sfrf %791 }
 0x453   :  { %p1073_p13 = scmp.ne.s32.totalorder %s792_s25, 0 }
 0x455   :  { %796 = shalt.err (%p1073_p13)  }
 0x456   :  { %798 = vsyncmov [#allocation2 + $0x17] }
 0x459   :  { %s799_s28 = vpop.sfrf %798 }
 0x45a   :  { %p1074_p1 = scmp.ne.s32.totalorder %s799_s28, 0 }
 0x45c   :  { %803 = shalt.err (%p1074_p1)  }
 0x45d   :  { %805 = vsyncmov [#allocation2 + $0x18] }
 0x460   :  { %s806_s22 = vpop.sfrf %805 }
 0x461   :  { %p1075_p0 = scmp.ne.s32.totalorder %s806_s22, 0 }
 0x463   :  { %810 = shalt.err (%p1075_p0)  }
 0x464   :  { %812 = vsyncmov [#allocation2 + $0x19] }
 0x467   :  { %s813_s8 = vpop.sfrf %812 }
 0x468   :  { %p1076_p2 = scmp.ne.s32.totalorder %s813_s8, 0 }
 0x46a   :  { %817 = shalt.err (%p1076_p2)  }
 0x46b   :  { %819 = vsyncmov [#allocation2 + $0x1a] }
 0x46e   :  { %s820_s11 = vpop.sfrf %819 }
 0x46f   :  { %p1077_p3 = scmp.ne.s32.totalorder %s820_s11, 0 }
 0x471   :  { %824 = shalt.err (%p1077_p3)  }
 0x472   :  { %826 = vsyncmov [#allocation2 + $0x1b] }
 0x475   :  { %s827_s2 = vpop.sfrf %826 }
 0x476   :  { %p1078_p4 = scmp.ne.s32.totalorder %s827_s2, 0 }
 0x478   :  { %831 = shalt.err (%p1078_p4)  }
 0x479   :  { %833 = vsyncmov [#allocation2 + $0x1c] }
 0x47c   :  { %s834_s16 = vpop.sfrf %833 }
 0x47d   :  { %p1079_p9 = scmp.ne.s32.totalorder %s834_s16, 0 }
 0x47f   :  { %838 = shalt.err (%p1079_p9)  }
 0x480   :  { %840 = vsyncmov [#allocation2 + $0x1d] }
 0x483   :  { %s841_s9 = vpop.sfrf %840 }
 0x484   :  { %p1080_p11 = scmp.ne.s32.totalorder %s841_s9, 0 }
 0x486   :  { %845 = shalt.err (%p1080_p11)  }
 0x487   :  { %847 = vsyncmov [#allocation2 + $0x1e] }
 0x48a   :  { %s848_s13 = vpop.sfrf %847 }
 0x48b   :  { %p1081_p5 = scmp.ne.s32.totalorder %s848_s13, 0 }
 0x48d   :  { %852 = shalt.err (%p1081_p5)  }
 0x48e   :  { %854 = vsyncmov [#allocation2 + $0x1f] }
 0x491   :  { %s855_s7 = vpop.sfrf %854 }
 0x492   :  { %p1082_p6 = scmp.ne.s32.totalorder %s855_s7, 0 }
 0x494   :  { %859 = shalt.err (%p1082_p6)  }

</bundles_post_ra>
